<compile_context>
chip_gen: v7x
topology: tpu7x:2x2x1
jax: 0.10.0
libtpu: 0.0.40
codegen_flags: <defaults>
</compile_context>

<pallas_src>
import math

import jax
import jax.numpy as jnp
from jax import lax
from jax.experimental import pallas as pl
from jax.experimental.pallas import tpu as pltpu

NP = 8  # padded LSTM batch dim (full sublane)


def _tree_sum(terms):
    """Balanced-tree sum to keep the per-step VPU add chain shallow."""
    while len(terms) > 1:
        nxt = [terms[i] + terms[i + 1] for i in range(0, len(terms) - 1, 2)]
        if len(terms) % 2:
            nxt.append(terms[-1])
        terms = nxt
    return terms[0]


def lstm_kernel(x_ref, h0_ref, c0_ref, p_ref,
                hs_ref, h_out_ref, c_out_ref,
                xg_ref):
    N, H = h0_ref.shape              # padded batch (8), hidden (8)
    T = x_ref.shape[0] // N          # time steps (12)
    Din = x_ref.shape[1]             # input dim (6)
    G = 4 * H                        # gate width (32)
    hp = lax.Precision.HIGHEST       # hoisted bulk matmuls: exact f32, off the serial chain

    # ---- unpack the single packed parameter buffer (static sub-tile slices, prologue only)
    p = p_ref[...]                                   # (8 + 2H, 4H)
    w1 = p[0:Din, 0:H]                               # (Din, H)
    b1 = p[Din:Din + 1, 0:H]                         # (1, H)
    bg = p[Din + 1:Din + 2, 0:G]                     # (1, 4H)   fused & pre-scaled biases
    wih = p[8:8 + H, 0:G]                            # (H, 4H)   pre-scaled i/f/o columns
    whh = p[8 + H:8 + 2 * H, 0:G]                    # (H, 4H)   pre-scaled i/f/o columns

    # ---- hoisted x-path: first_layer + ReLU and the input half of the LSTM gates ----
    x2 = x_ref[...]                                                        # (T*N, Din)
    pre = jnp.maximum(
        jnp.dot(x2, w1, precision=hp,
                preferred_element_type=jnp.float32) + b1, 0.0)             # (T*N, H)
    # Stage xgates in VMEM scratch; per-step slices are re-loaded (vld off the chain),
    # keeping vreg pressure low across the fully-unrolled recurrence.
    xg_ref[...] = jnp.dot(pre, wih, precision=hp,
                          preferred_element_type=jnp.float32) + bg         # (T*N, 4H)

    # loop-invariant W_hh rows, broadcast to (N, 4H) ONCE (JAX does not CSE broadcasts)
    whh_b = [jnp.broadcast_to(whh[k:k + 1, :], (N, G)) for k in range(H)]

    h = h0_ref[...]                                                        # (N, H)
    c = c0_ref[...]                                                        # (N, H)
    for t in range(T):                                # fully unrolled recurrence
        xg_t = xg_ref[t * N:(t + 1) * N, :]           # (N, 4H), static aligned slice
        # gates = xg_t + h @ W_hh as an 8-wide VPU broadcast-FMA tree (MXU off the chain)
        terms = [xg_t] + [h[:, k:k + 1] * whh_b[k] for k in range(H)]
        gates = _tree_sum(terms)                      # (N, 4H), i/f/o cols pre-scaled by 0.5
        # single EUP pass: tanh on the full tile; sigmoid(x) = 0.5*(tanh(x/2)+1)
        th = jnp.tanh(gates)
        i_g = 0.5 * (th[:, 0 * H:1 * H] + 1.0)
        f_g = 0.5 * (th[:, 1 * H:2 * H] + 1.0)
        g_g = th[:, 2 * H:3 * H]
        o_g = 0.5 * (th[:, 3 * H:4 * H] + 1.0)
        c = f_g * c + i_g * g_g
        h = o_g * jnp.tanh(c)
        hs_ref[t * N:(t + 1) * N, :] = h              # write h history straight to output

    h_out_ref[...] = h
    c_out_ref[...] = c


def pack_params(params):
    """Pack the tiny parameter tensors into one (8 + 2H, 4H) f32 buffer (done once, at init).

    Folds in:  bg = b_ih + b_hh,  and the 0.5 pre-scale of the i/f/o gate columns of
    W_ih / W_hh / bg used by the tanh-based sigmoid in the kernel.
    Layout:  rows [0:Din]   -> W1 (cols 0:H)
             row  [Din]     -> b1 (cols 0:H)
             row  [Din+1]   -> bg (cols 0:4H)
             rows [8:8+H]   -> W_ih
             rows [8+H:8+2H]-> W_hh
    """
    Din, H = params["w1"].shape
    G = 4 * H
    assert Din + 2 <= 8, "packed layout assumes the x-path block fits in the first 8 rows"
    scale = jnp.concatenate([jnp.full((H,), 0.5, jnp.float32),   # i
                             jnp.full((H,), 0.5, jnp.float32),   # f
                             jnp.ones((H,), jnp.float32),        # g (tanh gate, unscaled)
                             jnp.full((H,), 0.5, jnp.float32)])  # o
    bg = (params["bih"] + params["bhh"]) * scale
    wih = params["wih"] * scale
    whh = params["whh"] * scale
    P = jnp.zeros((8 + 2 * H, G), jnp.float32)
    P = P.at[0:Din, 0:H].set(params["w1"])
    P = P.at[Din:Din + 1, 0:H].set(params["b1"])
    P = P.at[Din + 1:Din + 2, 0:G].set(bg)
    P = P.at[8:8 + H, :].set(wih)
    P = P.at[8 + H:8 + 2 * H, :].set(whh)
    return P


@jax.jit
def lstm_forward(x, h0, c0, packed, wout, bout):
    """x: (T, N, Din); h0, c0: (1, N, H). Returns (y, h_n, c_n) like the torch module."""
    T, N, Din = x.shape
    H = h0.shape[-1]

    assert N <= NP, "LSTM batch dim must fit in one padded sublane group"
    pad = NP - N
    x_p = jnp.pad(x, ((0, 0), (0, pad), (0, 0)))
    h0_p = jnp.pad(h0[0], ((0, pad), (0, 0)))
    c0_p = jnp.pad(c0[0], ((0, pad), (0, 0)))
    x2 = x_p.reshape(T * NP, Din)
    # guard: the kernel derives T as x_ref.shape[0] // h0_ref.shape[0]
    assert x2.shape[0] == T * NP and h0_p.shape[0] == NP

    vmem = pl.BlockSpec(memory_space=pltpu.MemorySpace.VMEM)
    hs, h_n, c_n = pl.pallas_call(
        lstm_kernel,
        out_shape=(
            jax.ShapeDtypeStruct((T * NP, H), jnp.float32),   # per-step hidden states
            jax.ShapeDtypeStruct((NP, H), jnp.float32),       # h_n
            jax.ShapeDtypeStruct((NP, H), jnp.float32),       # c_n
        ),
        in_specs=[vmem] * 4,
        out_specs=(vmem, vmem, vmem),
        scratch_shapes=[pltpu.VMEM((T * NP, 4 * H), jnp.float32)],   # staged x-gates
    )(x2, h0_p, c0_p, packed)

    # Dout=1 output projection + bias in the wrapper: XLA fuses it with the de-pad slice,
    # and the kernel never emits a 1-lane masked store / 1-lane output DMA.
    y = jnp.dot(hs, wout, precision=lax.Precision.HIGHEST) + bout
    y = y.reshape(T, NP, -1)[:, :N, :]
    return y, h_n[None, :N, :], c_n[None, :N, :]


def reference_forward(x, h0, c0, p):
    """Pure-JAX reference reproducing the torch module (eval mode), full f32 precision."""
    hp = lax.Precision.HIGHEST
    pre = jax.nn.relu(jnp.einsum("tnd,dh->tnh", x, p["w1"], precision=hp) + p["b1"][0])
    H = h0.shape[-1]

    def step(carry, xt):
        h, c = carry
        gates = (jnp.dot(xt, p["wih"], precision=hp) + p["bih"][0]
                 + jnp.dot(h, p["whh"], precision=hp) + p["bhh"][0])
        i = jax.nn.sigmoid(gates[:, 0 * H:1 * H])
        f = jax.nn.sigmoid(gates[:, 1 * H:2 * H])
        g = jnp.tanh(gates[:, 2 * H:3 * H])
        o = jax.nn.sigmoid(gates[:, 3 * H:4 * H])
        c = f * c + i * g
        h = o * jnp.tanh(c)
        y = jnp.dot(h, p["wout"], precision=hp) + p["bout"][0]
        return (h, c), y

    (h_n, c_n), ys = lax.scan(step, (h0[0], c0[0]), pre)
    return ys, h_n[None], c_n[None]


def init_params(key, input_dim, hidden_dim, output_dim):
    """Deterministic init mirroring the nn.Module parameter shapes (pre-transposed)."""
    ks = jax.random.split(key, 8)

    def uni(k, shape, fan_in):
        b = 1.0 / math.sqrt(fan_in)
        return jax.random.uniform(k, shape, jnp.float32, -b, b)

    return {
        # nn.Linear(input_dim, hidden_dim): weight (H, Din) -> stored (Din, H)
        "w1":   uni(ks[0], (input_dim, hidden_dim), input_dim),
        "b1":   uni(ks[1], (1, hidden_dim), input_dim),
        # nn.LSTM(hidden_dim, hidden_dim): weight_ih_l0 (4H, H) -> stored (H, 4H)
        "wih":  uni(ks[2], (hidden_dim, 4 * hidden_dim), hidden_dim),
        "bih":  uni(ks[3], (1, 4 * hidden_dim), hidden_dim),
        "whh":  uni(ks[4], (hidden_dim, 4 * hidden_dim), hidden_dim),
        "bhh":  uni(ks[5], (1, 4 * hidden_dim), hidden_dim),
        # nn.Linear(hidden_dim, output_dim): weight (Dout, H) -> stored (H, Dout)
        "wout": uni(ks[6], (hidden_dim, output_dim), hidden_dim),
        "bout": uni(ks[7], (1, output_dim), hidden_dim),
    }


if __name__ == "__main__":
    batch_size, seq_length, input_dim, hidden_dim, output_dim = 12, 5, 6, 8, 1

    key = jax.random.PRNGKey(0)
    k_param, k_x = jax.random.split(key)
    params = init_params(k_param, input_dim, hidden_dim, output_dim)
    packed = pack_params(params)                       # done once, not per call

    # inputs: (batch_size, seq_length, input_dim); nn.LSTM treats dim0 as time, dim1 as batch
    x = jax.random.normal(k_x, (batch_size, seq_length, input_dim), jnp.float32)
    # init_hiddenlstm_state(): zeros (num_layers, seq_length, hidden_dim)
    h0 = jnp.zeros((1, seq_length, hidden_dim), jnp.float32)
    c0 = jnp.zeros((1, seq_length, hidden_dim), jnp.float32)

    y, h_n, c_n = jax.block_until_ready(
        lstm_forward(x, h0, c0, packed, params["wout"], params["bout"]))

    # sanity check against pure-JAX reference
    y_ref, h_ref, c_ref = reference_forward(x, h0, c0, params)
    assert y.shape == (batch_size, seq_length, output_dim)
    assert h_n.shape == (1, seq_length, hidden_dim)
    assert c_n.shape == (1, seq_length, hidden_dim)
    assert jnp.allclose(y, y_ref, atol=1e-4, rtol=1e-4)
    assert jnp.allclose(h_n, h_ref, atol=1e-4, rtol=1e-4)
    assert jnp.allclose(c_n, c_ref, atol=1e-4, rtol=1e-4)

    print("KERNEL_OK")
</pallas_src>

<mosaic_0001>
module attributes {stable_mosaic.version = 11 : i64} {
  func.func @lstm_kernel(%arg0: memref<96x6xf32, #tpu.memory_space<vmem>>, %arg1: memref<8x8xf32, #tpu.memory_space<vmem>>, %arg2: memref<8x8xf32, #tpu.memory_space<vmem>>, %arg3: memref<24x32xf32, #tpu.memory_space<vmem>>, %arg4: memref<96x8xf32, #tpu.memory_space<vmem>>, %arg5: memref<8x8xf32, #tpu.memory_space<vmem>>, %arg6: memref<8x8xf32, #tpu.memory_space<vmem>>, %arg7: memref<96x32xf32, #tpu.memory_space<vmem>>) attributes {dimension_semantics = [], scalar_prefetch = 0 : i64, scratch_operands = 1 : i64, tpu.core_type = #tpu.core_type<tc>} {
    %c0 = arith.constant 0 : index
    %c0_0 = arith.constant 0 : index
    %0 = vector.load %arg3[%c0, %c0_0] : memref<24x32xf32, #tpu.memory_space<vmem>>, vector<24x32xf32>
    %1 = vector.extract_strided_slice %0 {offsets = [0, 0], sizes = [6, 8], strides = [1, 1]} : vector<24x32xf32> to vector<6x8xf32>
    %2 = vector.extract_strided_slice %0 {offsets = [6, 0], sizes = [1, 8], strides = [1, 1]} : vector<24x32xf32> to vector<1x8xf32>
    %3 = vector.extract_strided_slice %0 {offsets = [7, 0], sizes = [1, 32], strides = [1, 1]} : vector<24x32xf32> to vector<1x32xf32>
    %4 = vector.extract_strided_slice %0 {offsets = [8, 0], sizes = [8, 32], strides = [1, 1]} : vector<24x32xf32> to vector<8x32xf32>
    %5 = vector.extract_strided_slice %0 {offsets = [16, 0], sizes = [8, 32], strides = [1, 1]} : vector<24x32xf32> to vector<8x32xf32>
    %c0_1 = arith.constant 0 : index
    %c0_2 = arith.constant 0 : index
    %6 = vector.load %arg0[%c0_1, %c0_2] : memref<96x6xf32, #tpu.memory_space<vmem>>, vector<96x6xf32>
    %cst = arith.constant dense<0.000000e+00> : vector<96x8xf32>
    %7 = tpu.matmul %6, %1, %cst {dimension_numbers = #tpu.dot_dimension_numbers<[1], [0], [0], [1], [0, 0, 1, 1], [], []>, precision = #tpu.contract_precision<fp32>} : vector<96x6xf32>, vector<6x8xf32>, vector<96x8xf32> -> vector<96x8xf32>
    %8 = vector.broadcast %2 : vector<1x8xf32> to vector<96x8xf32>
    %9 = arith.addf %7, %8 : vector<96x8xf32>
    %cst_3 = arith.constant 0.000000e+00 : f32
    %10 = vector.broadcast %cst_3 : f32 to vector<96x8xf32>
    %11 = arith.maximumf %9, %10 : vector<96x8xf32>
    %cst_4 = arith.constant dense<0.000000e+00> : vector<96x32xf32>
    %12 = tpu.matmul %11, %4, %cst_4 {dimension_numbers = #tpu.dot_dimension_numbers<[1], [0], [0], [1], [0, 0, 1, 1], [], []>, precision = #tpu.contract_precision<fp32>} : vector<96x8xf32>, vector<8x32xf32>, vector<96x32xf32> -> vector<96x32xf32>
    %13 = vector.broadcast %3 : vector<1x32xf32> to vector<96x32xf32>
    %14 = arith.addf %12, %13 : vector<96x32xf32>
    %c0_5 = arith.constant 0 : index
    %c0_6 = arith.constant 0 : index
    %15 = vector.load %arg7[%c0_5, %c0_6] : memref<96x32xf32, #tpu.memory_space<vmem>>, vector<96x32xf32>
    tpu.vector_store %arg7[%c0_5, %c0_6], %14 {strides = array<i32>} : memref<96x32xf32, #tpu.memory_space<vmem>>, vector<96x32xf32>,
    %16 = vector.extract_strided_slice %5 {offsets = [0, 0], sizes = [1, 32], strides = [1, 1]} : vector<8x32xf32> to vector<1x32xf32>
    %17 = vector.shape_cast %16 : vector<1x32xf32> to vector<1x32xf32>
    %18 = vector.broadcast %17 : vector<1x32xf32> to vector<8x32xf32>
    %19 = vector.extract_strided_slice %5 {offsets = [1, 0], sizes = [1, 32], strides = [1, 1]} : vector<8x32xf32> to vector<1x32xf32>
    %20 = vector.shape_cast %19 : vector<1x32xf32> to vector<1x32xf32>
    %21 = vector.broadcast %20 : vector<1x32xf32> to vector<8x32xf32>
    %22 = vector.extract_strided_slice %5 {offsets = [2, 0], sizes = [1, 32], strides = [1, 1]} : vector<8x32xf32> to vector<1x32xf32>
    %23 = vector.shape_cast %22 : vector<1x32xf32> to vector<1x32xf32>
    %24 = vector.broadcast %23 : vector<1x32xf32> to vector<8x32xf32>
    %25 = vector.extract_strided_slice %5 {offsets = [3, 0], sizes = [1, 32], strides = [1, 1]} : vector<8x32xf32> to vector<1x32xf32>
    %26 = vector.shape_cast %25 : vector<1x32xf32> to vector<1x32xf32>
    %27 = vector.broadcast %26 : vector<1x32xf32> to vector<8x32xf32>
    %28 = vector.extract_strided_slice %5 {offsets = [4, 0], sizes = [1, 32], strides = [1, 1]} : vector<8x32xf32> to vector<1x32xf32>
    %29 = vector.shape_cast %28 : vector<1x32xf32> to vector<1x32xf32>
    %30 = vector.broadcast %29 : vector<1x32xf32> to vector<8x32xf32>
    %31 = vector.extract_strided_slice %5 {offsets = [5, 0], sizes = [1, 32], strides = [1, 1]} : vector<8x32xf32> to vector<1x32xf32>
    %32 = vector.shape_cast %31 : vector<1x32xf32> to vector<1x32xf32>
    %33 = vector.broadcast %32 : vector<1x32xf32> to vector<8x32xf32>
    %34 = vector.extract_strided_slice %5 {offsets = [6, 0], sizes = [1, 32], strides = [1, 1]} : vector<8x32xf32> to vector<1x32xf32>
    %35 = vector.shape_cast %34 : vector<1x32xf32> to vector<1x32xf32>
    %36 = vector.broadcast %35 : vector<1x32xf32> to vector<8x32xf32>
    %37 = vector.extract_strided_slice %5 {offsets = [7, 0], sizes = [1, 32], strides = [1, 1]} : vector<8x32xf32> to vector<1x32xf32>
    %38 = vector.shape_cast %37 : vector<1x32xf32> to vector<1x32xf32>
    %39 = vector.broadcast %38 : vector<1x32xf32> to vector<8x32xf32>
    %c0_7 = arith.constant 0 : index
    %c0_8 = arith.constant 0 : index
    %40 = vector.load %arg1[%c0_7, %c0_8] : memref<8x8xf32, #tpu.memory_space<vmem>>, vector<8x8xf32>
    %c0_9 = arith.constant 0 : index
    %c0_10 = arith.constant 0 : index
    %41 = vector.load %arg2[%c0_9, %c0_10] : memref<8x8xf32, #tpu.memory_space<vmem>>, vector<8x8xf32>
    %c0_11 = arith.constant 0 : index
    %c0_12 = arith.constant 0 : index
    %42 = vector.load %arg7[%c0_11, %c0_12] : memref<96x32xf32, #tpu.memory_space<vmem>>, vector<8x32xf32>
    %43 = vector.extract_strided_slice %40 {offsets = [0, 0], sizes = [8, 1], strides = [1, 1]} : vector<8x8xf32> to vector<8x1xf32>
    %44 = vector.broadcast %43 : vector<8x1xf32> to vector<8x32xf32>
    %45 = arith.mulf %44, %18 : vector<8x32xf32>
    %46 = vector.extract_strided_slice %40 {offsets = [0, 1], sizes = [8, 1], strides = [1, 1]} : vector<8x8xf32> to vector<8x1xf32>
    %47 = vector.broadcast %46 : vector<8x1xf32> to vector<8x32xf32>
    %48 = arith.mulf %47, %21 : vector<8x32xf32>
    %49 = vector.extract_strided_slice %40 {offsets = [0, 2], sizes = [8, 1], strides = [1, 1]} : vector<8x8xf32> to vector<8x1xf32>
    %50 = vector.broadcast %49 : vector<8x1xf32> to vector<8x32xf32>
    %51 = arith.mulf %50, %24 : vector<8x32xf32>
    %52 = vector.extract_strided_slice %40 {offsets = [0, 3], sizes = [8, 1], strides = [1, 1]} : vector<8x8xf32> to vector<8x1xf32>
    %53 = vector.broadcast %52 : vector<8x1xf32> to vector<8x32xf32>
    %54 = arith.mulf %53, %27 : vector<8x32xf32>
    %55 = vector.extract_strided_slice %40 {offsets = [0, 4], sizes = [8, 1], strides = [1, 1]} : vector<8x8xf32> to vector<8x1xf32>
    %56 = vector.broadcast %55 : vector<8x1xf32> to vector<8x32xf32>
    %57 = arith.mulf %56, %30 : vector<8x32xf32>
    %58 = vector.extract_strided_slice %40 {offsets = [0, 5], sizes = [8, 1], strides = [1, 1]} : vector<8x8xf32> to vector<8x1xf32>
    %59 = vector.broadcast %58 : vector<8x1xf32> to vector<8x32xf32>
    %60 = arith.mulf %59, %33 : vector<8x32xf32>
    %61 = vector.extract_strided_slice %40 {offsets = [0, 6], sizes = [8, 1], strides = [1, 1]} : vector<8x8xf32> to vector<8x1xf32>
    %62 = vector.broadcast %61 : vector<8x1xf32> to vector<8x32xf32>
    %63 = arith.mulf %62, %36 : vector<8x32xf32>
    %64 = vector.extract_strided_slice %40 {offsets = [0, 7], sizes = [8, 1], strides = [1, 1]} : vector<8x8xf32> to vector<8x1xf32>
    %65 = vector.broadcast %64 : vector<8x1xf32> to vector<8x32xf32>
    %66 = arith.mulf %65, %39 : vector<8x32xf32>
    %67 = arith.addf %42, %45 : vector<8x32xf32>
    %68 = arith.addf %48, %51 : vector<8x32xf32>
    %69 = arith.addf %54, %57 : vector<8x32xf32>
    %70 = arith.addf %60, %63 : vector<8x32xf32>
    %71 = arith.addf %67, %68 : vector<8x32xf32>
    %72 = arith.addf %69, %70 : vector<8x32xf32>
    %73 = arith.addf %71, %72 : vector<8x32xf32>
    %74 = arith.addf %73, %66 : vector<8x32xf32>
    %75 = math.tanh %74 : vector<8x32xf32>
    %76 = vector.extract_strided_slice %75 {offsets = [0, 0], sizes = [8, 8], strides = [1, 1]} : vector<8x32xf32> to vector<8x8xf32>
    %cst_13 = arith.constant 1.000000e+00 : f32
    %77 = vector.broadcast %cst_13 : f32 to vector<8x8xf32>
    %78 = arith.addf %76, %77 : vector<8x8xf32>
    %cst_14 = arith.constant 5.000000e-01 : f32
    %79 = vector.broadcast %cst_14 : f32 to vector<8x8xf32>
    %80 = arith.mulf %79, %78 : vector<8x8xf32>
    %81 = vector.extract_strided_slice %75 {offsets = [0, 8], sizes = [8, 8], strides = [1, 1]} : vector<8x32xf32> to vector<8x8xf32>
    %cst_15 = arith.constant 1.000000e+00 : f32
    %82 = vector.broadcast %cst_15 : f32 to vector<8x8xf32>
    %83 = arith.addf %81, %82 : vector<8x8xf32>
    %cst_16 = arith.constant 5.000000e-01 : f32
    %84 = vector.broadcast %cst_16 : f32 to vector<8x8xf32>
    %85 = arith.mulf %84, %83 : vector<8x8xf32>
    %86 = vector.extract_strided_slice %75 {offsets = [0, 16], sizes = [8, 8], strides = [1, 1]} : vector<8x32xf32> to vector<8x8xf32>
    %87 = vector.extract_strided_slice %75 {offsets = [0, 24], sizes = [8, 8], strides = [1, 1]} : vector<8x32xf32> to vector<8x8xf32>
    %cst_17 = arith.constant 1.000000e+00 : f32
    %88 = vector.broadcast %cst_17 : f32 to vector<8x8xf32>
    %89 = arith.addf %87, %88 : vector<8x8xf32>
    %cst_18 = arith.constant 5.000000e-01 : f32
    %90 = vector.broadcast %cst_18 : f32 to vector<8x8xf32>
    %91 = arith.mulf %90, %89 : vector<8x8xf32>
    %92 = arith.mulf %85, %41 : vector<8x8xf32>
    %93 = arith.mulf %80, %86 : vector<8x8xf32>
    %94 = arith.addf %92, %93 : vector<8x8xf32>
    %95 = math.tanh %94 : vector<8x8xf32>
    %96 = arith.mulf %91, %95 : vector<8x8xf32>
    %c0_19 = arith.constant 0 : index
    %c0_20 = arith.constant 0 : index
    %97 = vector.load %arg4[%c0_19, %c0_20] : memref<96x8xf32, #tpu.memory_space<vmem>>, vector<8x8xf32>
    tpu.vector_store %arg4[%c0_19, %c0_20], %96 {strides = array<i32>} : memref<96x8xf32, #tpu.memory_space<vmem>>, vector<8x8xf32>,
    %c8 = arith.constant 8 : index
    %c0_21 = arith.constant 0 : index
    %98 = vector.load %arg7[%c8, %c0_21] : memref<96x32xf32, #tpu.memory_space<vmem>>, vector<8x32xf32>
    %99 = vector.extract_strided_slice %96 {offsets = [0, 0], sizes = [8, 1], strides = [1, 1]} : vector<8x8xf32> to vector<8x1xf32>
    %100 = vector.broadcast %99 : vector<8x1xf32> to vector<8x32xf32>
    %101 = arith.mulf %100, %18 : vector<8x32xf32>
    %102 = vector.extract_strided_slice %96 {offsets = [0, 1], sizes = [8, 1], strides = [1, 1]} : vector<8x8xf32> to vector<8x1xf32>
    %103 = vector.broadcast %102 : vector<8x1xf32> to vector<8x32xf32>
    %104 = arith.mulf %103, %21 : vector<8x32xf32>
    %105 = vector.extract_strided_slice %96 {offsets = [0, 2], sizes = [8, 1], strides = [1, 1]} : vector<8x8xf32> to vector<8x1xf32>
    %106 = vector.broadcast %105 : vector<8x1xf32> to vector<8x32xf32>
    %107 = arith.mulf %106, %24 : vector<8x32xf32>
    %108 = vector.extract_strided_slice %96 {offsets = [0, 3], sizes = [8, 1], strides = [1, 1]} : vector<8x8xf32> to vector<8x1xf32>
    %109 = vector.broadcast %108 : vector<8x1xf32> to vector<8x32xf32>
    %110 = arith.mulf %109, %27 : vector<8x32xf32>
    %111 = vector.extract_strided_slice %96 {offsets = [0, 4], sizes = [8, 1], strides = [1, 1]} : vector<8x8xf32> to vector<8x1xf32>
    %112 = vector.broadcast %111 : vector<8x1xf32> to vector<8x32xf32>
    %113 = arith.mulf %112, %30 : vector<8x32xf32>
    %114 = vector.extract_strided_slice %96 {offsets = [0, 5], sizes = [8, 1], strides = [1, 1]} : vector<8x8xf32> to vector<8x1xf32>
    %115 = vector.broadcast %114 : vector<8x1xf32> to vector<8x32xf32>
    %116 = arith.mulf %115, %33 : vector<8x32xf32>
    %117 = vector.extract_strided_slice %96 {offsets = [0, 6], sizes = [8, 1], strides = [1, 1]} : vector<8x8xf32> to vector<8x1xf32>
    %118 = vector.broadcast %117 : vector<8x1xf32> to vector<8x32xf32>
    %119 = arith.mulf %118, %36 : vector<8x32xf32>
    %120 = vector.extract_strided_slice %96 {offsets = [0, 7], sizes = [8, 1], strides = [1, 1]} : vector<8x8xf32> to vector<8x1xf32>
    %121 = vector.broadcast %120 : vector<8x1xf32> to vector<8x32xf32>
    %122 = arith.mulf %121, %39 : vector<8x32xf32>
    %123 = arith.addf %98, %101 : vector<8x32xf32>
    %124 = arith.addf %104, %107 : vector<8x32xf32>
    %125 = arith.addf %110, %113 : vector<8x32xf32>
    %126 = arith.addf %116, %119 : vector<8x32xf32>
    %127 = arith.addf %123, %124 : vector<8x32xf32>
    %128 = arith.addf %125, %126 : vector<8x32xf32>
    %129 = arith.addf %127, %128 : vector<8x32xf32>
    %130 = arith.addf %129, %122 : vector<8x32xf32>
    %131 = math.tanh %130 : vector<8x32xf32>
    %132 = vector.extract_strided_slice %131 {offsets = [0, 0], sizes = [8, 8], strides = [1, 1]} : vector<8x32xf32> to vector<8x8xf32>
    %cst_22 = arith.constant 1.000000e+00 : f32
    %133 = vector.broadcast %cst_22 : f32 to vector<8x8xf32>
    %134 = arith.addf %132, %133 : vector<8x8xf32>
    %cst_23 = arith.constant 5.000000e-01 : f32
    %135 = vector.broadcast %cst_23 : f32 to vector<8x8xf32>
    %136 = arith.mulf %135, %134 : vector<8x8xf32>
    %137 = vector.extract_strided_slice %131 {offsets = [0, 8], sizes = [8, 8], strides = [1, 1]} : vector<8x32xf32> to vector<8x8xf32>
    %cst_24 = arith.constant 1.000000e+00 : f32
    %138 = vector.broadcast %cst_24 : f32 to vector<8x8xf32>
    %139 = arith.addf %137, %138 : vector<8x8xf32>
    %cst_25 = arith.constant 5.000000e-01 : f32
    %140 = vector.broadcast %cst_25 : f32 to vector<8x8xf32>
    %141 = arith.mulf %140, %139 : vector<8x8xf32>
    %142 = vector.extract_strided_slice %131 {offsets = [0, 16], sizes = [8, 8], strides = [1, 1]} : vector<8x32xf32> to vector<8x8xf32>
    %143 = vector.extract_strided_slice %131 {offsets = [0, 24], sizes = [8, 8], strides = [1, 1]} : vector<8x32xf32> to vector<8x8xf32>
    %cst_26 = arith.constant 1.000000e+00 : f32
    %144 = vector.broadcast %cst_26 : f32 to vector<8x8xf32>
    %145 = arith.addf %143, %144 : vector<8x8xf32>
    %cst_27 = arith.constant 5.000000e-01 : f32
    %146 = vector.broadcast %cst_27 : f32 to vector<8x8xf32>
    %147 = arith.mulf %146, %145 : vector<8x8xf32>
    %148 = arith.mulf %141, %94 : vector<8x8xf32>
    %149 = arith.mulf %136, %142 : vector<8x8xf32>
    %150 = arith.addf %148, %149 : vector<8x8xf32>
    %151 = math.tanh %150 : vector<8x8xf32>
    %152 = arith.mulf %147, %151 : vector<8x8xf32>
    %c8_28 = arith.constant 8 : index
    %c0_29 = arith.constant 0 : index
    %153 = vector.load %arg4[%c8_28, %c0_29] : memref<96x8xf32, #tpu.memory_space<vmem>>, vector<8x8xf32>
    tpu.vector_store %arg4[%c8_28, %c0_29], %152 {strides = array<i32>} : memref<96x8xf32, #tpu.memory_space<vmem>>, vector<8x8xf32>,
    %c16 = arith.constant 16 : index
    %c0_30 = arith.constant 0 : index
    %154 = vector.load %arg7[%c16, %c0_30] : memref<96x32xf32, #tpu.memory_space<vmem>>, vector<8x32xf32>
    %155 = vector.extract_strided_slice %152 {offsets = [0, 0], sizes = [8, 1], strides = [1, 1]} : vector<8x8xf32> to vector<8x1xf32>
    %156 = vector.broadcast %155 : vector<8x1xf32> to vector<8x32xf32>
    %157 = arith.mulf %156, %18 : vector<8x32xf32>
    %158 = vector.extract_strided_slice %152 {offsets = [0, 1], sizes = [8, 1], strides = [1, 1]} : vector<8x8xf32> to vector<8x1xf32>
    %159 = vector.broadcast %158 : vector<8x1xf32> to vector<8x32xf32>
    %160 = arith.mulf %159, %21 : vector<8x32xf32>
    %161 = vector.extract_strided_slice %152 {offsets = [0, 2], sizes = [8, 1], strides = [1, 1]} : vector<8x8xf32> to vector<8x1xf32>
    %162 = vector.broadcast %161 : vector<8x1xf32> to vector<8x32xf32>
    %163 = arith.mulf %162, %24 : vector<8x32xf32>
    %164 = vector.extract_strided_slice %152 {offsets = [0, 3], sizes = [8, 1], strides = [1, 1]} : vector<8x8xf32> to vector<8x1xf32>
    %165 = vector.broadcast %164 : vector<8x1xf32> to vector<8x32xf32>
    %166 = arith.mulf %165, %27 : vector<8x32xf32>
    %167 = vector.extract_strided_slice %152 {offsets = [0, 4], sizes = [8, 1], strides = [1, 1]} : vector<8x8xf32> to vector<8x1xf32>
    %168 = vector.broadcast %167 : vector<8x1xf32> to vector<8x32xf32>
    %169 = arith.mulf %168, %30 : vector<8x32xf32>
    %170 = vector.extract_strided_slice %152 {offsets = [0, 5], sizes = [8, 1], strides = [1, 1]} : vector<8x8xf32> to vector<8x1xf32>
    %171 = vector.broadcast %170 : vector<8x1xf32> to vector<8x32xf32>
    %172 = arith.mulf %171, %33 : vector<8x32xf32>
    %173 = vector.extract_strided_slice %152 {offsets = [0, 6], sizes = [8, 1], strides = [1, 1]} : vector<8x8xf32> to vector<8x1xf32>
    %174 = vector.broadcast %173 : vector<8x1xf32> to vector<8x32xf32>
    %175 = arith.mulf %174, %36 : vector<8x32xf32>
    %176 = vector.extract_strided_slice %152 {offsets = [0, 7], sizes = [8, 1], strides = [1, 1]} : vector<8x8xf32> to vector<8x1xf32>
    %177 = vector.broadcast %176 : vector<8x1xf32> to vector<8x32xf32>
    %178 = arith.mulf %177, %39 : vector<8x32xf32>
    %179 = arith.addf %154, %157 : vector<8x32xf32>
    %180 = arith.addf %160, %163 : vector<8x32xf32>
    %181 = arith.addf %166, %169 : vector<8x32xf32>
    %182 = arith.addf %172, %175 : vector<8x32xf32>
    %183 = arith.addf %179, %180 : vector<8x32xf32>
    %184 = arith.addf %181, %182 : vector<8x32xf32>
    %185 = arith.addf %183, %184 : vector<8x32xf32>
    %186 = arith.addf %185, %178 : vector<8x32xf32>
    %187 = math.tanh %186 : vector<8x32xf32>
    %188 = vector.extract_strided_slice %187 {offsets = [0, 0], sizes = [8, 8], strides = [1, 1]} : vector<8x32xf32> to vector<8x8xf32>
    %cst_31 = arith.constant 1.000000e+00 : f32
    %189 = vector.broadcast %cst_31 : f32 to vector<8x8xf32>
    %190 = arith.addf %188, %189 : vector<8x8xf32>
    %cst_32 = arith.constant 5.000000e-01 : f32
    %191 = vector.broadcast %cst_32 : f32 to vector<8x8xf32>
    %192 = arith.mulf %191, %190 : vector<8x8xf32>
    %193 = vector.extract_strided_slice %187 {offsets = [0, 8], sizes = [8, 8], strides = [1, 1]} : vector<8x32xf32> to vector<8x8xf32>
    %cst_33 = arith.constant 1.000000e+00 : f32
    %194 = vector.broadcast %cst_33 : f32 to vector<8x8xf32>
    %195 = arith.addf %193, %194 : vector<8x8xf32>
    %cst_34 = arith.constant 5.000000e-01 : f32
    %196 = vector.broadcast %cst_34 : f32 to vector<8x8xf32>
    %197 = arith.mulf %196, %195 : vector<8x8xf32>
    %198 = vector.extract_strided_slice %187 {offsets = [0, 16], sizes = [8, 8], strides = [1, 1]} : vector<8x32xf32> to vector<8x8xf32>
    %199 = vector.extract_strided_slice %187 {offsets = [0, 24], sizes = [8, 8], strides = [1, 1]} : vector<8x32xf32> to vector<8x8xf32>
    %cst_35 = arith.constant 1.000000e+00 : f32
    %200 = vector.broadcast %cst_35 : f32 to vector<8x8xf32>
    %201 = arith.addf %199, %200 : vector<8x8xf32>
    %cst_36 = arith.constant 5.000000e-01 : f32
    %202 = vector.broadcast %cst_36 : f32 to vector<8x8xf32>
    %203 = arith.mulf %202, %201 : vector<8x8xf32>
    %204 = arith.mulf %197, %150 : vector<8x8xf32>
    %205 = arith.mulf %192, %198 : vector<8x8xf32>
    %206 = arith.addf %204, %205 : vector<8x8xf32>
    %207 = math.tanh %206 : vector<8x8xf32>
    %208 = arith.mulf %203, %207 : vector<8x8xf32>
    %c16_37 = arith.constant 16 : index
    %c0_38 = arith.constant 0 : index
    %209 = vector.load %arg4[%c16_37, %c0_38] : memref<96x8xf32, #tpu.memory_space<vmem>>, vector<8x8xf32>
    tpu.vector_store %arg4[%c16_37, %c0_38], %208 {strides = array<i32>} : memref<96x8xf32, #tpu.memory_space<vmem>>, vector<8x8xf32>,
    %c24 = arith.constant 24 : index
    %c0_39 = arith.constant 0 : index
    %210 = vector.load %arg7[%c24, %c0_39] : memref<96x32xf32, #tpu.memory_space<vmem>>, vector<8x32xf32>
    %211 = vector.extract_strided_slice %208 {offsets = [0, 0], sizes = [8, 1], strides = [1, 1]} : vector<8x8xf32> to vector<8x1xf32>
    %212 = vector.broadcast %211 : vector<8x1xf32> to vector<8x32xf32>
    %213 = arith.mulf %212, %18 : vector<8x32xf32>
    %214 = vector.extract_strided_slice %208 {offsets = [0, 1], sizes = [8, 1], strides = [1, 1]} : vector<8x8xf32> to vector<8x1xf32>
    %215 = vector.broadcast %214 : vector<8x1xf32> to vector<8x32xf32>
    %216 = arith.mulf %215, %21 : vector<8x32xf32>
    %217 = vector.extract_strided_slice %208 {offsets = [0, 2], sizes = [8, 1], strides = [1, 1]} : vector<8x8xf32> to vector<8x1xf32>
    %218 = vector.broadcast %217 : vector<8x1xf32> to vector<8x32xf32>
    %219 = arith.mulf %218, %24 : vector<8x32xf32>
    %220 = vector.extract_strided_slice %208 {offsets = [0, 3], sizes = [8, 1], strides = [1, 1]} : vector<8x8xf32> to vector<8x1xf32>
    %221 = vector.broadcast %220 : vector<8x1xf32> to vector<8x32xf32>
    %222 = arith.mulf %221, %27 : vector<8x32xf32>
    %223 = vector.extract_strided_slice %208 {offsets = [0, 4], sizes = [8, 1], strides = [1, 1]} : vector<8x8xf32> to vector<8x1xf32>
    %224 = vector.broadcast %223 : vector<8x1xf32> to vector<8x32xf32>
    %225 = arith.mulf %224, %30 : vector<8x32xf32>
    %226 = vector.extract_strided_slice %208 {offsets = [0, 5], sizes = [8, 1], strides = [1, 1]} : vector<8x8xf32> to vector<8x1xf32>
    %227 = vector.broadcast %226 : vector<8x1xf32> to vector<8x32xf32>
    %228 = arith.mulf %227, %33 : vector<8x32xf32>
    %229 = vector.extract_strided_slice %208 {offsets = [0, 6], sizes = [8, 1], strides = [1, 1]} : vector<8x8xf32> to vector<8x1xf32>
    %230 = vector.broadcast %229 : vector<8x1xf32> to vector<8x32xf32>
    %231 = arith.mulf %230, %36 : vector<8x32xf32>
    %232 = vector.extract_strided_slice %208 {offsets = [0, 7], sizes = [8, 1], strides = [1, 1]} : vector<8x8xf32> to vector<8x1xf32>
    %233 = vector.broadcast %232 : vector<8x1xf32> to vector<8x32xf32>
    %234 = arith.mulf %233, %39 : vector<8x32xf32>
    %235 = arith.addf %210, %213 : vector<8x32xf32>
    %236 = arith.addf %216, %219 : vector<8x32xf32>
    %237 = arith.addf %222, %225 : vector<8x32xf32>
    %238 = arith.addf %228, %231 : vector<8x32xf32>
    %239 = arith.addf %235, %236 : vector<8x32xf32>
    %240 = arith.addf %237, %238 : vector<8x32xf32>
    %241 = arith.addf %239, %240 : vector<8x32xf32>
    %242 = arith.addf %241, %234 : vector<8x32xf32>
    %243 = math.tanh %242 : vector<8x32xf32>
    %244 = vector.extract_strided_slice %243 {offsets = [0, 0], sizes = [8, 8], strides = [1, 1]} : vector<8x32xf32> to vector<8x8xf32>
    %cst_40 = arith.constant 1.000000e+00 : f32
    %245 = vector.broadcast %cst_40 : f32 to vector<8x8xf32>
    %246 = arith.addf %244, %245 : vector<8x8xf32>
    %cst_41 = arith.constant 5.000000e-01 : f32
    %247 = vector.broadcast %cst_41 : f32 to vector<8x8xf32>
    %248 = arith.mulf %247, %246 : vector<8x8xf32>
    %249 = vector.extract_strided_slice %243 {offsets = [0, 8], sizes = [8, 8], strides = [1, 1]} : vector<8x32xf32> to vector<8x8xf32>
    %cst_42 = arith.constant 1.000000e+00 : f32
    %250 = vector.broadcast %cst_42 : f32 to vector<8x8xf32>
    %251 = arith.addf %249, %250 : vector<8x8xf32>
    %cst_43 = arith.constant 5.000000e-01 : f32
    %252 = vector.broadcast %cst_43 : f32 to vector<8x8xf32>
    %253 = arith.mulf %252, %251 : vector<8x8xf32>
    %254 = vector.extract_strided_slice %243 {offsets = [0, 16], sizes = [8, 8], strides = [1, 1]} : vector<8x32xf32> to vector<8x8xf32>
    %255 = vector.extract_strided_slice %243 {offsets = [0, 24], sizes = [8, 8], strides = [1, 1]} : vector<8x32xf32> to vector<8x8xf32>
    %cst_44 = arith.constant 1.000000e+00 : f32
    %256 = vector.broadcast %cst_44 : f32 to vector<8x8xf32>
    %257 = arith.addf %255, %256 : vector<8x8xf32>
    %cst_45 = arith.constant 5.000000e-01 : f32
    %258 = vector.broadcast %cst_45 : f32 to vector<8x8xf32>
    %259 = arith.mulf %258, %257 : vector<8x8xf32>
    %260 = arith.mulf %253, %206 : vector<8x8xf32>
    %261 = arith.mulf %248, %254 : vector<8x8xf32>
    %262 = arith.addf %260, %261 : vector<8x8xf32>
    %263 = math.tanh %262 : vector<8x8xf32>
    %264 = arith.mulf %259, %263 : vector<8x8xf32>
    %c24_46 = arith.constant 24 : index
    %c0_47 = arith.constant 0 : index
    %265 = vector.load %arg4[%c24_46, %c0_47] : memref<96x8xf32, #tpu.memory_space<vmem>>, vector<8x8xf32>
    tpu.vector_store %arg4[%c24_46, %c0_47], %264 {strides = array<i32>} : memref<96x8xf32, #tpu.memory_space<vmem>>, vector<8x8xf32>,
    %c32 = arith.constant 32 : index
    %c0_48 = arith.constant 0 : index
    %266 = vector.load %arg7[%c32, %c0_48] : memref<96x32xf32, #tpu.memory_space<vmem>>, vector<8x32xf32>
    %267 = vector.extract_strided_slice %264 {offsets = [0, 0], sizes = [8, 1], strides = [1, 1]} : vector<8x8xf32> to vector<8x1xf32>
    %268 = vector.broadcast %267 : vector<8x1xf32> to vector<8x32xf32>
    %269 = arith.mulf %268, %18 : vector<8x32xf32>
    %270 = vector.extract_strided_slice %264 {offsets = [0, 1], sizes = [8, 1], strides = [1, 1]} : vector<8x8xf32> to vector<8x1xf32>
    %271 = vector.broadcast %270 : vector<8x1xf32> to vector<8x32xf32>
    %272 = arith.mulf %271, %21 : vector<8x32xf32>
    %273 = vector.extract_strided_slice %264 {offsets = [0, 2], sizes = [8, 1], strides = [1, 1]} : vector<8x8xf32> to vector<8x1xf32>
    %274 = vector.broadcast %273 : vector<8x1xf32> to vector<8x32xf32>
    %275 = arith.mulf %274, %24 : vector<8x32xf32>
    %276 = vector.extract_strided_slice %264 {offsets = [0, 3], sizes = [8, 1], strides = [1, 1]} : vector<8x8xf32> to vector<8x1xf32>
    %277 = vector.broadcast %276 : vector<8x1xf32> to vector<8x32xf32>
    %278 = arith.mulf %277, %27 : vector<8x32xf32>
    %279 = vector.extract_strided_slice %264 {offsets = [0, 4], sizes = [8, 1], strides = [1, 1]} : vector<8x8xf32> to vector<8x1xf32>
    %280 = vector.broadcast %279 : vector<8x1xf32> to vector<8x32xf32>
    %281 = arith.mulf %280, %30 : vector<8x32xf32>
    %282 = vector.extract_strided_slice %264 {offsets = [0, 5], sizes = [8, 1], strides = [1, 1]} : vector<8x8xf32> to vector<8x1xf32>
    %283 = vector.broadcast %282 : vector<8x1xf32> to vector<8x32xf32>
    %284 = arith.mulf %283, %33 : vector<8x32xf32>
    %285 = vector.extract_strided_slice %264 {offsets = [0, 6], sizes = [8, 1], strides = [1, 1]} : vector<8x8xf32> to vector<8x1xf32>
    %286 = vector.broadcast %285 : vector<8x1xf32> to vector<8x32xf32>
    %287 = arith.mulf %286, %36 : vector<8x32xf32>
    %288 = vector.extract_strided_slice %264 {offsets = [0, 7], sizes = [8, 1], strides = [1, 1]} : vector<8x8xf32> to vector<8x1xf32>
    %289 = vector.broadcast %288 : vector<8x1xf32> to vector<8x32xf32>
    %290 = arith.mulf %289, %39 : vector<8x32xf32>
    %291 = arith.addf %266, %269 : vector<8x32xf32>
    %292 = arith.addf %272, %275 : vector<8x32xf32>
    %293 = arith.addf %278, %281 : vector<8x32xf32>
    %294 = arith.addf %284, %287 : vector<8x32xf32>
    %295 = arith.addf %291, %292 : vector<8x32xf32>
    %296 = arith.addf %293, %294 : vector<8x32xf32>
    %297 = arith.addf %295, %296 : vector<8x32xf32>
    %298 = arith.addf %297, %290 : vector<8x32xf32>
    %299 = math.tanh %298 : vector<8x32xf32>
    %300 = vector.extract_strided_slice %299 {offsets = [0, 0], sizes = [8, 8], strides = [1, 1]} : vector<8x32xf32> to vector<8x8xf32>
    %cst_49 = arith.constant 1.000000e+00 : f32
    %301 = vector.broadcast %cst_49 : f32 to vector<8x8xf32>
    %302 = arith.addf %300, %301 : vector<8x8xf32>
    %cst_50 = arith.constant 5.000000e-01 : f32
    %303 = vector.broadcast %cst_50 : f32 to vector<8x8xf32>
    %304 = arith.mulf %303, %302 : vector<8x8xf32>
    %305 = vector.extract_strided_slice %299 {offsets = [0, 8], sizes = [8, 8], strides = [1, 1]} : vector<8x32xf32> to vector<8x8xf32>
    %cst_51 = arith.constant 1.000000e+00 : f32
    %306 = vector.broadcast %cst_51 : f32 to vector<8x8xf32>
    %307 = arith.addf %305, %306 : vector<8x8xf32>
    %cst_52 = arith.constant 5.000000e-01 : f32
    %308 = vector.broadcast %cst_52 : f32 to vector<8x8xf32>
    %309 = arith.mulf %308, %307 : vector<8x8xf32>
    %310 = vector.extract_strided_slice %299 {offsets = [0, 16], sizes = [8, 8], strides = [1, 1]} : vector<8x32xf32> to vector<8x8xf32>
    %311 = vector.extract_strided_slice %299 {offsets = [0, 24], sizes = [8, 8], strides = [1, 1]} : vector<8x32xf32> to vector<8x8xf32>
    %cst_53 = arith.constant 1.000000e+00 : f32
    %312 = vector.broadcast %cst_53 : f32 to vector<8x8xf32>
    %313 = arith.addf %311, %312 : vector<8x8xf32>
    %cst_54 = arith.constant 5.000000e-01 : f32
    %314 = vector.broadcast %cst_54 : f32 to vector<8x8xf32>
    %315 = arith.mulf %314, %313 : vector<8x8xf32>
    %316 = arith.mulf %309, %262 : vector<8x8xf32>
    %317 = arith.mulf %304, %310 : vector<8x8xf32>
    %318 = arith.addf %316, %317 : vector<8x8xf32>
    %319 = math.tanh %318 : vector<8x8xf32>
    %320 = arith.mulf %315, %319 : vector<8x8xf32>
    %c32_55 = arith.constant 32 : index
    %c0_56 = arith.constant 0 : index
    %321 = vector.load %arg4[%c32_55, %c0_56] : memref<96x8xf32, #tpu.memory_space<vmem>>, vector<8x8xf32>
    tpu.vector_store %arg4[%c32_55, %c0_56], %320 {strides = array<i32>} : memref<96x8xf32, #tpu.memory_space<vmem>>, vector<8x8xf32>,
    %c40 = arith.constant 40 : index
    %c0_57 = arith.constant 0 : index
    %322 = vector.load %arg7[%c40, %c0_57] : memref<96x32xf32, #tpu.memory_space<vmem>>, vector<8x32xf32>
    %323 = vector.extract_strided_slice %320 {offsets = [0, 0], sizes = [8, 1], strides = [1, 1]} : vector<8x8xf32> to vector<8x1xf32>
    %324 = vector.broadcast %323 : vector<8x1xf32> to vector<8x32xf32>
    %325 = arith.mulf %324, %18 : vector<8x32xf32>
    %326 = vector.extract_strided_slice %320 {offsets = [0, 1], sizes = [8, 1], strides = [1, 1]} : vector<8x8xf32> to vector<8x1xf32>
    %327 = vector.broadcast %326 : vector<8x1xf32> to vector<8x32xf32>
    %328 = arith.mulf %327, %21 : vector<8x32xf32>
    %329 = vector.extract_strided_slice %320 {offsets = [0, 2], sizes = [8, 1], strides = [1, 1]} : vector<8x8xf32> to vector<8x1xf32>
    %330 = vector.broadcast %329 : vector<8x1xf32> to vector<8x32xf32>
    %331 = arith.mulf %330, %24 : vector<8x32xf32>
    %332 = vector.extract_strided_slice %320 {offsets = [0, 3], sizes = [8, 1], strides = [1, 1]} : vector<8x8xf32> to vector<8x1xf32>
    %333 = vector.broadcast %332 : vector<8x1xf32> to vector<8x32xf32>
    %334 = arith.mulf %333, %27 : vector<8x32xf32>
    %335 = vector.extract_strided_slice %320 {offsets = [0, 4], sizes = [8, 1], strides = [1, 1]} : vector<8x8xf32> to vector<8x1xf32>
    %336 = vector.broadcast %335 : vector<8x1xf32> to vector<8x32xf32>
    %337 = arith.mulf %336, %30 : vector<8x32xf32>
    %338 = vector.extract_strided_slice %320 {offsets = [0, 5], sizes = [8, 1], strides = [1, 1]} : vector<8x8xf32> to vector<8x1xf32>
    %339 = vector.broadcast %338 : vector<8x1xf32> to vector<8x32xf32>
    %340 = arith.mulf %339, %33 : vector<8x32xf32>
    %341 = vector.extract_strided_slice %320 {offsets = [0, 6], sizes = [8, 1], strides = [1, 1]} : vector<8x8xf32> to vector<8x1xf32>
    %342 = vector.broadcast %341 : vector<8x1xf32> to vector<8x32xf32>
    %343 = arith.mulf %342, %36 : vector<8x32xf32>
    %344 = vector.extract_strided_slice %320 {offsets = [0, 7], sizes = [8, 1], strides = [1, 1]} : vector<8x8xf32> to vector<8x1xf32>
    %345 = vector.broadcast %344 : vector<8x1xf32> to vector<8x32xf32>
    %346 = arith.mulf %345, %39 : vector<8x32xf32>
    %347 = arith.addf %322, %325 : vector<8x32xf32>
    %348 = arith.addf %328, %331 : vector<8x32xf32>
    %349 = arith.addf %334, %337 : vector<8x32xf32>
    %350 = arith.addf %340, %343 : vector<8x32xf32>
    %351 = arith.addf %347, %348 : vector<8x32xf32>
    %352 = arith.addf %349, %350 : vector<8x32xf32>
    %353 = arith.addf %351, %352 : vector<8x32xf32>
    %354 = arith.addf %353, %346 : vector<8x32xf32>
    %355 = math.tanh %354 : vector<8x32xf32>
    %356 = vector.extract_strided_slice %355 {offsets = [0, 0], sizes = [8, 8], strides = [1, 1]} : vector<8x32xf32> to vector<8x8xf32>
    %cst_58 = arith.constant 1.000000e+00 : f32
    %357 = vector.broadcast %cst_58 : f32 to vector<8x8xf32>
    %358 = arith.addf %356, %357 : vector<8x8xf32>
    %cst_59 = arith.constant 5.000000e-01 : f32
    %359 = vector.broadcast %cst_59 : f32 to vector<8x8xf32>
    %360 = arith.mulf %359, %358 : vector<8x8xf32>
    %361 = vector.extract_strided_slice %355 {offsets = [0, 8], sizes = [8, 8], strides = [1, 1]} : vector<8x32xf32> to vector<8x8xf32>
    %cst_60 = arith.constant 1.000000e+00 : f32
    %362 = vector.broadcast %cst_60 : f32 to vector<8x8xf32>
    %363 = arith.addf %361, %362 : vector<8x8xf32>
    %cst_61 = arith.constant 5.000000e-01 : f32
    %364 = vector.broadcast %cst_61 : f32 to vector<8x8xf32>
    %365 = arith.mulf %364, %363 : vector<8x8xf32>
    %366 = vector.extract_strided_slice %355 {offsets = [0, 16], sizes = [8, 8], strides = [1, 1]} : vector<8x32xf32> to vector<8x8xf32>
    %367 = vector.extract_strided_slice %355 {offsets = [0, 24], sizes = [8, 8], strides = [1, 1]} : vector<8x32xf32> to vector<8x8xf32>
    %cst_62 = arith.constant 1.000000e+00 : f32
    %368 = vector.broadcast %cst_62 : f32 to vector<8x8xf32>
    %369 = arith.addf %367, %368 : vector<8x8xf32>
    %cst_63 = arith.constant 5.000000e-01 : f32
    %370 = vector.broadcast %cst_63 : f32 to vector<8x8xf32>
    %371 = arith.mulf %370, %369 : vector<8x8xf32>
    %372 = arith.mulf %365, %318 : vector<8x8xf32>
    %373 = arith.mulf %360, %366 : vector<8x8xf32>
    %374 = arith.addf %372, %373 : vector<8x8xf32>
    %375 = math.tanh %374 : vector<8x8xf32>
    %376 = arith.mulf %371, %375 : vector<8x8xf32>
    %c40_64 = arith.constant 40 : index
    %c0_65 = arith.constant 0 : index
    %377 = vector.load %arg4[%c40_64, %c0_65] : memref<96x8xf32, #tpu.memory_space<vmem>>, vector<8x8xf32>
    tpu.vector_store %arg4[%c40_64, %c0_65], %376 {strides = array<i32>} : memref<96x8xf32, #tpu.memory_space<vmem>>, vector<8x8xf32>,
    %c48 = arith.constant 48 : index
    %c0_66 = arith.constant 0 : index
    %378 = vector.load %arg7[%c48, %c0_66] : memref<96x32xf32, #tpu.memory_space<vmem>>, vector<8x32xf32>
    %379 = vector.extract_strided_slice %376 {offsets = [0, 0], sizes = [8, 1], strides = [1, 1]} : vector<8x8xf32> to vector<8x1xf32>
    %380 = vector.broadcast %379 : vector<8x1xf32> to vector<8x32xf32>
    %381 = arith.mulf %380, %18 : vector<8x32xf32>
    %382 = vector.extract_strided_slice %376 {offsets = [0, 1], sizes = [8, 1], strides = [1, 1]} : vector<8x8xf32> to vector<8x1xf32>
    %383 = vector.broadcast %382 : vector<8x1xf32> to vector<8x32xf32>
    %384 = arith.mulf %383, %21 : vector<8x32xf32>
    %385 = vector.extract_strided_slice %376 {offsets = [0, 2], sizes = [8, 1], strides = [1, 1]} : vector<8x8xf32> to vector<8x1xf32>
    %386 = vector.broadcast %385 : vector<8x1xf32> to vector<8x32xf32>
    %387 = arith.mulf %386, %24 : vector<8x32xf32>
    %388 = vector.extract_strided_slice %376 {offsets = [0, 3], sizes = [8, 1], strides = [1, 1]} : vector<8x8xf32> to vector<8x1xf32>
    %389 = vector.broadcast %388 : vector<8x1xf32> to vector<8x32xf32>
    %390 = arith.mulf %389, %27 : vector<8x32xf32>
    %391 = vector.extract_strided_slice %376 {offsets = [0, 4], sizes = [8, 1], strides = [1, 1]} : vector<8x8xf32> to vector<8x1xf32>
    %392 = vector.broadcast %391 : vector<8x1xf32> to vector<8x32xf32>
    %393 = arith.mulf %392, %30 : vector<8x32xf32>
    %394 = vector.extract_strided_slice %376 {offsets = [0, 5], sizes = [8, 1], strides = [1, 1]} : vector<8x8xf32> to vector<8x1xf32>
    %395 = vector.broadcast %394 : vector<8x1xf32> to vector<8x32xf32>
    %396 = arith.mulf %395, %33 : vector<8x32xf32>
    %397 = vector.extract_strided_slice %376 {offsets = [0, 6], sizes = [8, 1], strides = [1, 1]} : vector<8x8xf32> to vector<8x1xf32>
    %398 = vector.broadcast %397 : vector<8x1xf32> to vector<8x32xf32>
    %399 = arith.mulf %398, %36 : vector<8x32xf32>
    %400 = vector.extract_strided_slice %376 {offsets = [0, 7], sizes = [8, 1], strides = [1, 1]} : vector<8x8xf32> to vector<8x1xf32>
    %401 = vector.broadcast %400 : vector<8x1xf32> to vector<8x32xf32>
    %402 = arith.mulf %401, %39 : vector<8x32xf32>
    %403 = arith.addf %378, %381 : vector<8x32xf32>
    %404 = arith.addf %384, %387 : vector<8x32xf32>
    %405 = arith.addf %390, %393 : vector<8x32xf32>
    %406 = arith.addf %396, %399 : vector<8x32xf32>
    %407 = arith.addf %403, %404 : vector<8x32xf32>
    %408 = arith.addf %405, %406 : vector<8x32xf32>
    %409 = arith.addf %407, %408 : vector<8x32xf32>
    %410 = arith.addf %409, %402 : vector<8x32xf32>
    %411 = math.tanh %410 : vector<8x32xf32>
    %412 = vector.extract_strided_slice %411 {offsets = [0, 0], sizes = [8, 8], strides = [1, 1]} : vector<8x32xf32> to vector<8x8xf32>
    %cst_67 = arith.constant 1.000000e+00 : f32
    %413 = vector.broadcast %cst_67 : f32 to vector<8x8xf32>
    %414 = arith.addf %412, %413 : vector<8x8xf32>
    %cst_68 = arith.constant 5.000000e-01 : f32
    %415 = vector.broadcast %cst_68 : f32 to vector<8x8xf32>
    %416 = arith.mulf %415, %414 : vector<8x8xf32>
    %417 = vector.extract_strided_slice %411 {offsets = [0, 8], sizes = [8, 8], strides = [1, 1]} : vector<8x32xf32> to vector<8x8xf32>
    %cst_69 = arith.constant 1.000000e+00 : f32
    %418 = vector.broadcast %cst_69 : f32 to vector<8x8xf32>
    %419 = arith.addf %417, %418 : vector<8x8xf32>
    %cst_70 = arith.constant 5.000000e-01 : f32
    %420 = vector.broadcast %cst_70 : f32 to vector<8x8xf32>
    %421 = arith.mulf %420, %419 : vector<8x8xf32>
    %422 = vector.extract_strided_slice %411 {offsets = [0, 16], sizes = [8, 8], strides = [1, 1]} : vector<8x32xf32> to vector<8x8xf32>
    %423 = vector.extract_strided_slice %411 {offsets = [0, 24], sizes = [8, 8], strides = [1, 1]} : vector<8x32xf32> to vector<8x8xf32>
    %cst_71 = arith.constant 1.000000e+00 : f32
    %424 = vector.broadcast %cst_71 : f32 to vector<8x8xf32>
    %425 = arith.addf %423, %424 : vector<8x8xf32>
    %cst_72 = arith.constant 5.000000e-01 : f32
    %426 = vector.broadcast %cst_72 : f32 to vector<8x8xf32>
    %427 = arith.mulf %426, %425 : vector<8x8xf32>
    %428 = arith.mulf %421, %374 : vector<8x8xf32>
    %429 = arith.mulf %416, %422 : vector<8x8xf32>
    %430 = arith.addf %428, %429 : vector<8x8xf32>
    %431 = math.tanh %430 : vector<8x8xf32>
    %432 = arith.mulf %427, %431 : vector<8x8xf32>
    %c48_73 = arith.constant 48 : index
    %c0_74 = arith.constant 0 : index
    %433 = vector.load %arg4[%c48_73, %c0_74] : memref<96x8xf32, #tpu.memory_space<vmem>>, vector<8x8xf32>
    tpu.vector_store %arg4[%c48_73, %c0_74], %432 {strides = array<i32>} : memref<96x8xf32, #tpu.memory_space<vmem>>, vector<8x8xf32>,
    %c56 = arith.constant 56 : index
    %c0_75 = arith.constant 0 : index
    %434 = vector.load %arg7[%c56, %c0_75] : memref<96x32xf32, #tpu.memory_space<vmem>>, vector<8x32xf32>
    %435 = vector.extract_strided_slice %432 {offsets = [0, 0], sizes = [8, 1], strides = [1, 1]} : vector<8x8xf32> to vector<8x1xf32>
    %436 = vector.broadcast %435 : vector<8x1xf32> to vector<8x32xf32>
    %437 = arith.mulf %436, %18 : vector<8x32xf32>
    %438 = vector.extract_strided_slice %432 {offsets = [0, 1], sizes = [8, 1], strides = [1, 1]} : vector<8x8xf32> to vector<8x1xf32>
    %439 = vector.broadcast %438 : vector<8x1xf32> to vector<8x32xf32>
    %440 = arith.mulf %439, %21 : vector<8x32xf32>
    %441 = vector.extract_strided_slice %432 {offsets = [0, 2], sizes = [8, 1], strides = [1, 1]} : vector<8x8xf32> to vector<8x1xf32>
    %442 = vector.broadcast %441 : vector<8x1xf32> to vector<8x32xf32>
    %443 = arith.mulf %442, %24 : vector<8x32xf32>
    %444 = vector.extract_strided_slice %432 {offsets = [0, 3], sizes = [8, 1], strides = [1, 1]} : vector<8x8xf32> to vector<8x1xf32>
    %445 = vector.broadcast %444 : vector<8x1xf32> to vector<8x32xf32>
    %446 = arith.mulf %445, %27 : vector<8x32xf32>
    %447 = vector.extract_strided_slice %432 {offsets = [0, 4], sizes = [8, 1], strides = [1, 1]} : vector<8x8xf32> to vector<8x1xf32>
    %448 = vector.broadcast %447 : vector<8x1xf32> to vector<8x32xf32>
    %449 = arith.mulf %448, %30 : vector<8x32xf32>
    %450 = vector.extract_strided_slice %432 {offsets = [0, 5], sizes = [8, 1], strides = [1, 1]} : vector<8x8xf32> to vector<8x1xf32>
    %451 = vector.broadcast %450 : vector<8x1xf32> to vector<8x32xf32>
    %452 = arith.mulf %451, %33 : vector<8x32xf32>
    %453 = vector.extract_strided_slice %432 {offsets = [0, 6], sizes = [8, 1], strides = [1, 1]} : vector<8x8xf32> to vector<8x1xf32>
    %454 = vector.broadcast %453 : vector<8x1xf32> to vector<8x32xf32>
    %455 = arith.mulf %454, %36 : vector<8x32xf32>
    %456 = vector.extract_strided_slice %432 {offsets = [0, 7], sizes = [8, 1], strides = [1, 1]} : vector<8x8xf32> to vector<8x1xf32>
    %457 = vector.broadcast %456 : vector<8x1xf32> to vector<8x32xf32>
    %458 = arith.mulf %457, %39 : vector<8x32xf32>
    %459 = arith.addf %434, %437 : vector<8x32xf32>
    %460 = arith.addf %440, %443 : vector<8x32xf32>
    %461 = arith.addf %446, %449 : vector<8x32xf32>
    %462 = arith.addf %452, %455 : vector<8x32xf32>
    %463 = arith.addf %459, %460 : vector<8x32xf32>
    %464 = arith.addf %461, %462 : vector<8x32xf32>
    %465 = arith.addf %463, %464 : vector<8x32xf32>
    %466 = arith.addf %465, %458 : vector<8x32xf32>
    %467 = math.tanh %466 : vector<8x32xf32>
    %468 = vector.extract_strided_slice %467 {offsets = [0, 0], sizes = [8, 8], strides = [1, 1]} : vector<8x32xf32> to vector<8x8xf32>
    %cst_76 = arith.constant 1.000000e+00 : f32
    %469 = vector.broadcast %cst_76 : f32 to vector<8x8xf32>
    %470 = arith.addf %468, %469 : vector<8x8xf32>
    %cst_77 = arith.constant 5.000000e-01 : f32
    %471 = vector.broadcast %cst_77 : f32 to vector<8x8xf32>
    %472 = arith.mulf %471, %470 : vector<8x8xf32>
    %473 = vector.extract_strided_slice %467 {offsets = [0, 8], sizes = [8, 8], strides = [1, 1]} : vector<8x32xf32> to vector<8x8xf32>
    %cst_78 = arith.constant 1.000000e+00 : f32
    %474 = vector.broadcast %cst_78 : f32 to vector<8x8xf32>
    %475 = arith.addf %473, %474 : vector<8x8xf32>
    %cst_79 = arith.constant 5.000000e-01 : f32
    %476 = vector.broadcast %cst_79 : f32 to vector<8x8xf32>
    %477 = arith.mulf %476, %475 : vector<8x8xf32>
    %478 = vector.extract_strided_slice %467 {offsets = [0, 16], sizes = [8, 8], strides = [1, 1]} : vector<8x32xf32> to vector<8x8xf32>
    %479 = vector.extract_strided_slice %467 {offsets = [0, 24], sizes = [8, 8], strides = [1, 1]} : vector<8x32xf32> to vector<8x8xf32>
    %cst_80 = arith.constant 1.000000e+00 : f32
    %480 = vector.broadcast %cst_80 : f32 to vector<8x8xf32>
    %481 = arith.addf %479, %480 : vector<8x8xf32>
    %cst_81 = arith.constant 5.000000e-01 : f32
    %482 = vector.broadcast %cst_81 : f32 to vector<8x8xf32>
    %483 = arith.mulf %482, %481 : vector<8x8xf32>
    %484 = arith.mulf %477, %430 : vector<8x8xf32>
    %485 = arith.mulf %472, %478 : vector<8x8xf32>
    %486 = arith.addf %484, %485 : vector<8x8xf32>
    %487 = math.tanh %486 : vector<8x8xf32>
    %488 = arith.mulf %483, %487 : vector<8x8xf32>
    %c56_82 = arith.constant 56 : index
    %c0_83 = arith.constant 0 : index
    %489 = vector.load %arg4[%c56_82, %c0_83] : memref<96x8xf32, #tpu.memory_space<vmem>>, vector<8x8xf32>
    tpu.vector_store %arg4[%c56_82, %c0_83], %488 {strides = array<i32>} : memref<96x8xf32, #tpu.memory_space<vmem>>, vector<8x8xf32>,
    %c64 = arith.constant 64 : index
    %c0_84 = arith.constant 0 : index
    %490 = vector.load %arg7[%c64, %c0_84] : memref<96x32xf32, #tpu.memory_space<vmem>>, vector<8x32xf32>
    %491 = vector.extract_strided_slice %488 {offsets = [0, 0], sizes = [8, 1], strides = [1, 1]} : vector<8x8xf32> to vector<8x1xf32>
    %492 = vector.broadcast %491 : vector<8x1xf32> to vector<8x32xf32>
    %493 = arith.mulf %492, %18 : vector<8x32xf32>
    %494 = vector.extract_strided_slice %488 {offsets = [0, 1], sizes = [8, 1], strides = [1, 1]} : vector<8x8xf32> to vector<8x1xf32>
    %495 = vector.broadcast %494 : vector<8x1xf32> to vector<8x32xf32>
    %496 = arith.mulf %495, %21 : vector<8x32xf32>
    %497 = vector.extract_strided_slice %488 {offsets = [0, 2], sizes = [8, 1], strides = [1, 1]} : vector<8x8xf32> to vector<8x1xf32>
    %498 = vector.broadcast %497 : vector<8x1xf32> to vector<8x32xf32>
    %499 = arith.mulf %498, %24 : vector<8x32xf32>
    %500 = vector.extract_strided_slice %488 {offsets = [0, 3], sizes = [8, 1], strides = [1, 1]} : vector<8x8xf32> to vector<8x1xf32>
    %501 = vector.broadcast %500 : vector<8x1xf32> to vector<8x32xf32>
    %502 = arith.mulf %501, %27 : vector<8x32xf32>
    %503 = vector.extract_strided_slice %488 {offsets = [0, 4], sizes = [8, 1], strides = [1, 1]} : vector<8x8xf32> to vector<8x1xf32>
    %504 = vector.broadcast %503 : vector<8x1xf32> to vector<8x32xf32>
    %505 = arith.mulf %504, %30 : vector<8x32xf32>
    %506 = vector.extract_strided_slice %488 {offsets = [0, 5], sizes = [8, 1], strides = [1, 1]} : vector<8x8xf32> to vector<8x1xf32>
    %507 = vector.broadcast %506 : vector<8x1xf32> to vector<8x32xf32>
    %508 = arith.mulf %507, %33 : vector<8x32xf32>
    %509 = vector.extract_strided_slice %488 {offsets = [0, 6], sizes = [8, 1], strides = [1, 1]} : vector<8x8xf32> to vector<8x1xf32>
    %510 = vector.broadcast %509 : vector<8x1xf32> to vector<8x32xf32>
    %511 = arith.mulf %510, %36 : vector<8x32xf32>
    %512 = vector.extract_strided_slice %488 {offsets = [0, 7], sizes = [8, 1], strides = [1, 1]} : vector<8x8xf32> to vector<8x1xf32>
    %513 = vector.broadcast %512 : vector<8x1xf32> to vector<8x32xf32>
    %514 = arith.mulf %513, %39 : vector<8x32xf32>
    %515 = arith.addf %490, %493 : vector<8x32xf32>
    %516 = arith.addf %496, %499 : vector<8x32xf32>
    %517 = arith.addf %502, %505 : vector<8x32xf32>
    %518 = arith.addf %508, %511 : vector<8x32xf32>
    %519 = arith.addf %515, %516 : vector<8x32xf32>
    %520 = arith.addf %517, %518 : vector<8x32xf32>
    %521 = arith.addf %519, %520 : vector<8x32xf32>
    %522 = arith.addf %521, %514 : vector<8x32xf32>
    %523 = math.tanh %522 : vector<8x32xf32>
    %524 = vector.extract_strided_slice %523 {offsets = [0, 0], sizes = [8, 8], strides = [1, 1]} : vector<8x32xf32> to vector<8x8xf32>
    %cst_85 = arith.constant 1.000000e+00 : f32
    %525 = vector.broadcast %cst_85 : f32 to vector<8x8xf32>
    %526 = arith.addf %524, %525 : vector<8x8xf32>
    %cst_86 = arith.constant 5.000000e-01 : f32
    %527 = vector.broadcast %cst_86 : f32 to vector<8x8xf32>
    %528 = arith.mulf %527, %526 : vector<8x8xf32>
    %529 = vector.extract_strided_slice %523 {offsets = [0, 8], sizes = [8, 8], strides = [1, 1]} : vector<8x32xf32> to vector<8x8xf32>
    %cst_87 = arith.constant 1.000000e+00 : f32
    %530 = vector.broadcast %cst_87 : f32 to vector<8x8xf32>
    %531 = arith.addf %529, %530 : vector<8x8xf32>
    %cst_88 = arith.constant 5.000000e-01 : f32
    %532 = vector.broadcast %cst_88 : f32 to vector<8x8xf32>
    %533 = arith.mulf %532, %531 : vector<8x8xf32>
    %534 = vector.extract_strided_slice %523 {offsets = [0, 16], sizes = [8, 8], strides = [1, 1]} : vector<8x32xf32> to vector<8x8xf32>
    %535 = vector.extract_strided_slice %523 {offsets = [0, 24], sizes = [8, 8], strides = [1, 1]} : vector<8x32xf32> to vector<8x8xf32>
    %cst_89 = arith.constant 1.000000e+00 : f32
    %536 = vector.broadcast %cst_89 : f32 to vector<8x8xf32>
    %537 = arith.addf %535, %536 : vector<8x8xf32>
    %cst_90 = arith.constant 5.000000e-01 : f32
    %538 = vector.broadcast %cst_90 : f32 to vector<8x8xf32>
    %539 = arith.mulf %538, %537 : vector<8x8xf32>
    %540 = arith.mulf %533, %486 : vector<8x8xf32>
    %541 = arith.mulf %528, %534 : vector<8x8xf32>
    %542 = arith.addf %540, %541 : vector<8x8xf32>
    %543 = math.tanh %542 : vector<8x8xf32>
    %544 = arith.mulf %539, %543 : vector<8x8xf32>
    %c64_91 = arith.constant 64 : index
    %c0_92 = arith.constant 0 : index
    %545 = vector.load %arg4[%c64_91, %c0_92] : memref<96x8xf32, #tpu.memory_space<vmem>>, vector<8x8xf32>
    tpu.vector_store %arg4[%c64_91, %c0_92], %544 {strides = array<i32>} : memref<96x8xf32, #tpu.memory_space<vmem>>, vector<8x8xf32>,
    %c72 = arith.constant 72 : index
    %c0_93 = arith.constant 0 : index
    %546 = vector.load %arg7[%c72, %c0_93] : memref<96x32xf32, #tpu.memory_space<vmem>>, vector<8x32xf32>
    %547 = vector.extract_strided_slice %544 {offsets = [0, 0], sizes = [8, 1], strides = [1, 1]} : vector<8x8xf32> to vector<8x1xf32>
    %548 = vector.broadcast %547 : vector<8x1xf32> to vector<8x32xf32>
    %549 = arith.mulf %548, %18 : vector<8x32xf32>
    %550 = vector.extract_strided_slice %544 {offsets = [0, 1], sizes = [8, 1], strides = [1, 1]} : vector<8x8xf32> to vector<8x1xf32>
    %551 = vector.broadcast %550 : vector<8x1xf32> to vector<8x32xf32>
    %552 = arith.mulf %551, %21 : vector<8x32xf32>
    %553 = vector.extract_strided_slice %544 {offsets = [0, 2], sizes = [8, 1], strides = [1, 1]} : vector<8x8xf32> to vector<8x1xf32>
    %554 = vector.broadcast %553 : vector<8x1xf32> to vector<8x32xf32>
    %555 = arith.mulf %554, %24 : vector<8x32xf32>
    %556 = vector.extract_strided_slice %544 {offsets = [0, 3], sizes = [8, 1], strides = [1, 1]} : vector<8x8xf32> to vector<8x1xf32>
    %557 = vector.broadcast %556 : vector<8x1xf32> to vector<8x32xf32>
    %558 = arith.mulf %557, %27 : vector<8x32xf32>
    %559 = vector.extract_strided_slice %544 {offsets = [0, 4], sizes = [8, 1], strides = [1, 1]} : vector<8x8xf32> to vector<8x1xf32>
    %560 = vector.broadcast %559 : vector<8x1xf32> to vector<8x32xf32>
    %561 = arith.mulf %560, %30 : vector<8x32xf32>
    %562 = vector.extract_strided_slice %544 {offsets = [0, 5], sizes = [8, 1], strides = [1, 1]} : vector<8x8xf32> to vector<8x1xf32>
    %563 = vector.broadcast %562 : vector<8x1xf32> to vector<8x32xf32>
    %564 = arith.mulf %563, %33 : vector<8x32xf32>
    %565 = vector.extract_strided_slice %544 {offsets = [0, 6], sizes = [8, 1], strides = [1, 1]} : vector<8x8xf32> to vector<8x1xf32>
    %566 = vector.broadcast %565 : vector<8x1xf32> to vector<8x32xf32>
    %567 = arith.mulf %566, %36 : vector<8x32xf32>
    %568 = vector.extract_strided_slice %544 {offsets = [0, 7], sizes = [8, 1], strides = [1, 1]} : vector<8x8xf32> to vector<8x1xf32>
    %569 = vector.broadcast %568 : vector<8x1xf32> to vector<8x32xf32>
    %570 = arith.mulf %569, %39 : vector<8x32xf32>
    %571 = arith.addf %546, %549 : vector<8x32xf32>
    %572 = arith.addf %552, %555 : vector<8x32xf32>
    %573 = arith.addf %558, %561 : vector<8x32xf32>
    %574 = arith.addf %564, %567 : vector<8x32xf32>
    %575 = arith.addf %571, %572 : vector<8x32xf32>
    %576 = arith.addf %573, %574 : vector<8x32xf32>
    %577 = arith.addf %575, %576 : vector<8x32xf32>
    %578 = arith.addf %577, %570 : vector<8x32xf32>
    %579 = math.tanh %578 : vector<8x32xf32>
    %580 = vector.extract_strided_slice %579 {offsets = [0, 0], sizes = [8, 8], strides = [1, 1]} : vector<8x32xf32> to vector<8x8xf32>
    %cst_94 = arith.constant 1.000000e+00 : f32
    %581 = vector.broadcast %cst_94 : f32 to vector<8x8xf32>
    %582 = arith.addf %580, %581 : vector<8x8xf32>
    %cst_95 = arith.constant 5.000000e-01 : f32
    %583 = vector.broadcast %cst_95 : f32 to vector<8x8xf32>
    %584 = arith.mulf %583, %582 : vector<8x8xf32>
    %585 = vector.extract_strided_slice %579 {offsets = [0, 8], sizes = [8, 8], strides = [1, 1]} : vector<8x32xf32> to vector<8x8xf32>
    %cst_96 = arith.constant 1.000000e+00 : f32
    %586 = vector.broadcast %cst_96 : f32 to vector<8x8xf32>
    %587 = arith.addf %585, %586 : vector<8x8xf32>
    %cst_97 = arith.constant 5.000000e-01 : f32
    %588 = vector.broadcast %cst_97 : f32 to vector<8x8xf32>
    %589 = arith.mulf %588, %587 : vector<8x8xf32>
    %590 = vector.extract_strided_slice %579 {offsets = [0, 16], sizes = [8, 8], strides = [1, 1]} : vector<8x32xf32> to vector<8x8xf32>
    %591 = vector.extract_strided_slice %579 {offsets = [0, 24], sizes = [8, 8], strides = [1, 1]} : vector<8x32xf32> to vector<8x8xf32>
    %cst_98 = arith.constant 1.000000e+00 : f32
    %592 = vector.broadcast %cst_98 : f32 to vector<8x8xf32>
    %593 = arith.addf %591, %592 : vector<8x8xf32>
    %cst_99 = arith.constant 5.000000e-01 : f32
    %594 = vector.broadcast %cst_99 : f32 to vector<8x8xf32>
    %595 = arith.mulf %594, %593 : vector<8x8xf32>
    %596 = arith.mulf %589, %542 : vector<8x8xf32>
    %597 = arith.mulf %584, %590 : vector<8x8xf32>
    %598 = arith.addf %596, %597 : vector<8x8xf32>
    %599 = math.tanh %598 : vector<8x8xf32>
    %600 = arith.mulf %595, %599 : vector<8x8xf32>
    %c72_100 = arith.constant 72 : index
    %c0_101 = arith.constant 0 : index
    %601 = vector.load %arg4[%c72_100, %c0_101] : memref<96x8xf32, #tpu.memory_space<vmem>>, vector<8x8xf32>
    tpu.vector_store %arg4[%c72_100, %c0_101], %600 {strides = array<i32>} : memref<96x8xf32, #tpu.memory_space<vmem>>, vector<8x8xf32>,
    %c80 = arith.constant 80 : index
    %c0_102 = arith.constant 0 : index
    %602 = vector.load %arg7[%c80, %c0_102] : memref<96x32xf32, #tpu.memory_space<vmem>>, vector<8x32xf32>
    %603 = vector.extract_strided_slice %600 {offsets = [0, 0], sizes = [8, 1], strides = [1, 1]} : vector<8x8xf32> to vector<8x1xf32>
    %604 = vector.broadcast %603 : vector<8x1xf32> to vector<8x32xf32>
    %605 = arith.mulf %604, %18 : vector<8x32xf32>
    %606 = vector.extract_strided_slice %600 {offsets = [0, 1], sizes = [8, 1], strides = [1, 1]} : vector<8x8xf32> to vector<8x1xf32>
    %607 = vector.broadcast %606 : vector<8x1xf32> to vector<8x32xf32>
    %608 = arith.mulf %607, %21 : vector<8x32xf32>
    %609 = vector.extract_strided_slice %600 {offsets = [0, 2], sizes = [8, 1], strides = [1, 1]} : vector<8x8xf32> to vector<8x1xf32>
    %610 = vector.broadcast %609 : vector<8x1xf32> to vector<8x32xf32>
    %611 = arith.mulf %610, %24 : vector<8x32xf32>
    %612 = vector.extract_strided_slice %600 {offsets = [0, 3], sizes = [8, 1], strides = [1, 1]} : vector<8x8xf32> to vector<8x1xf32>
    %613 = vector.broadcast %612 : vector<8x1xf32> to vector<8x32xf32>
    %614 = arith.mulf %613, %27 : vector<8x32xf32>
    %615 = vector.extract_strided_slice %600 {offsets = [0, 4], sizes = [8, 1], strides = [1, 1]} : vector<8x8xf32> to vector<8x1xf32>
    %616 = vector.broadcast %615 : vector<8x1xf32> to vector<8x32xf32>
    %617 = arith.mulf %616, %30 : vector<8x32xf32>
    %618 = vector.extract_strided_slice %600 {offsets = [0, 5], sizes = [8, 1], strides = [1, 1]} : vector<8x8xf32> to vector<8x1xf32>
    %619 = vector.broadcast %618 : vector<8x1xf32> to vector<8x32xf32>
    %620 = arith.mulf %619, %33 : vector<8x32xf32>
    %621 = vector.extract_strided_slice %600 {offsets = [0, 6], sizes = [8, 1], strides = [1, 1]} : vector<8x8xf32> to vector<8x1xf32>
    %622 = vector.broadcast %621 : vector<8x1xf32> to vector<8x32xf32>
    %623 = arith.mulf %622, %36 : vector<8x32xf32>
    %624 = vector.extract_strided_slice %600 {offsets = [0, 7], sizes = [8, 1], strides = [1, 1]} : vector<8x8xf32> to vector<8x1xf32>
    %625 = vector.broadcast %624 : vector<8x1xf32> to vector<8x32xf32>
    %626 = arith.mulf %625, %39 : vector<8x32xf32>
    %627 = arith.addf %602, %605 : vector<8x32xf32>
    %628 = arith.addf %608, %611 : vector<8x32xf32>
    %629 = arith.addf %614, %617 : vector<8x32xf32>
    %630 = arith.addf %620, %623 : vector<8x32xf32>
    %631 = arith.addf %627, %628 : vector<8x32xf32>
    %632 = arith.addf %629, %630 : vector<8x32xf32>
    %633 = arith.addf %631, %632 : vector<8x32xf32>
    %634 = arith.addf %633, %626 : vector<8x32xf32>
    %635 = math.tanh %634 : vector<8x32xf32>
    %636 = vector.extract_strided_slice %635 {offsets = [0, 0], sizes = [8, 8], strides = [1, 1]} : vector<8x32xf32> to vector<8x8xf32>
    %cst_103 = arith.constant 1.000000e+00 : f32
    %637 = vector.broadcast %cst_103 : f32 to vector<8x8xf32>
    %638 = arith.addf %636, %637 : vector<8x8xf32>
    %cst_104 = arith.constant 5.000000e-01 : f32
    %639 = vector.broadcast %cst_104 : f32 to vector<8x8xf32>
    %640 = arith.mulf %639, %638 : vector<8x8xf32>
    %641 = vector.extract_strided_slice %635 {offsets = [0, 8], sizes = [8, 8], strides = [1, 1]} : vector<8x32xf32> to vector<8x8xf32>
    %cst_105 = arith.constant 1.000000e+00 : f32
    %642 = vector.broadcast %cst_105 : f32 to vector<8x8xf32>
    %643 = arith.addf %641, %642 : vector<8x8xf32>
    %cst_106 = arith.constant 5.000000e-01 : f32
    %644 = vector.broadcast %cst_106 : f32 to vector<8x8xf32>
    %645 = arith.mulf %644, %643 : vector<8x8xf32>
    %646 = vector.extract_strided_slice %635 {offsets = [0, 16], sizes = [8, 8], strides = [1, 1]} : vector<8x32xf32> to vector<8x8xf32>
    %647 = vector.extract_strided_slice %635 {offsets = [0, 24], sizes = [8, 8], strides = [1, 1]} : vector<8x32xf32> to vector<8x8xf32>
    %cst_107 = arith.constant 1.000000e+00 : f32
    %648 = vector.broadcast %cst_107 : f32 to vector<8x8xf32>
    %649 = arith.addf %647, %648 : vector<8x8xf32>
    %cst_108 = arith.constant 5.000000e-01 : f32
    %650 = vector.broadcast %cst_108 : f32 to vector<8x8xf32>
    %651 = arith.mulf %650, %649 : vector<8x8xf32>
    %652 = arith.mulf %645, %598 : vector<8x8xf32>
    %653 = arith.mulf %640, %646 : vector<8x8xf32>
    %654 = arith.addf %652, %653 : vector<8x8xf32>
    %655 = math.tanh %654 : vector<8x8xf32>
    %656 = arith.mulf %651, %655 : vector<8x8xf32>
    %c80_109 = arith.constant 80 : index
    %c0_110 = arith.constant 0 : index
    %657 = vector.load %arg4[%c80_109, %c0_110] : memref<96x8xf32, #tpu.memory_space<vmem>>, vector<8x8xf32>
    tpu.vector_store %arg4[%c80_109, %c0_110], %656 {strides = array<i32>} : memref<96x8xf32, #tpu.memory_space<vmem>>, vector<8x8xf32>,
    %c88 = arith.constant 88 : index
    %c0_111 = arith.constant 0 : index
    %658 = vector.load %arg7[%c88, %c0_111] : memref<96x32xf32, #tpu.memory_space<vmem>>, vector<8x32xf32>
    %659 = vector.extract_strided_slice %656 {offsets = [0, 0], sizes = [8, 1], strides = [1, 1]} : vector<8x8xf32> to vector<8x1xf32>
    %660 = vector.broadcast %659 : vector<8x1xf32> to vector<8x32xf32>
    %661 = arith.mulf %660, %18 : vector<8x32xf32>
    %662 = vector.extract_strided_slice %656 {offsets = [0, 1], sizes = [8, 1], strides = [1, 1]} : vector<8x8xf32> to vector<8x1xf32>
    %663 = vector.broadcast %662 : vector<8x1xf32> to vector<8x32xf32>
    %664 = arith.mulf %663, %21 : vector<8x32xf32>
    %665 = vector.extract_strided_slice %656 {offsets = [0, 2], sizes = [8, 1], strides = [1, 1]} : vector<8x8xf32> to vector<8x1xf32>
    %666 = vector.broadcast %665 : vector<8x1xf32> to vector<8x32xf32>
    %667 = arith.mulf %666, %24 : vector<8x32xf32>
    %668 = vector.extract_strided_slice %656 {offsets = [0, 3], sizes = [8, 1], strides = [1, 1]} : vector<8x8xf32> to vector<8x1xf32>
    %669 = vector.broadcast %668 : vector<8x1xf32> to vector<8x32xf32>
    %670 = arith.mulf %669, %27 : vector<8x32xf32>
    %671 = vector.extract_strided_slice %656 {offsets = [0, 4], sizes = [8, 1], strides = [1, 1]} : vector<8x8xf32> to vector<8x1xf32>
    %672 = vector.broadcast %671 : vector<8x1xf32> to vector<8x32xf32>
    %673 = arith.mulf %672, %30 : vector<8x32xf32>
    %674 = vector.extract_strided_slice %656 {offsets = [0, 5], sizes = [8, 1], strides = [1, 1]} : vector<8x8xf32> to vector<8x1xf32>
    %675 = vector.broadcast %674 : vector<8x1xf32> to vector<8x32xf32>
    %676 = arith.mulf %675, %33 : vector<8x32xf32>
    %677 = vector.extract_strided_slice %656 {offsets = [0, 6], sizes = [8, 1], strides = [1, 1]} : vector<8x8xf32> to vector<8x1xf32>
    %678 = vector.broadcast %677 : vector<8x1xf32> to vector<8x32xf32>
    %679 = arith.mulf %678, %36 : vector<8x32xf32>
    %680 = vector.extract_strided_slice %656 {offsets = [0, 7], sizes = [8, 1], strides = [1, 1]} : vector<8x8xf32> to vector<8x1xf32>
    %681 = vector.broadcast %680 : vector<8x1xf32> to vector<8x32xf32>
    %682 = arith.mulf %681, %39 : vector<8x32xf32>
    %683 = arith.addf %658, %661 : vector<8x32xf32>
    %684 = arith.addf %664, %667 : vector<8x32xf32>
    %685 = arith.addf %670, %673 : vector<8x32xf32>
    %686 = arith.addf %676, %679 : vector<8x32xf32>
    %687 = arith.addf %683, %684 : vector<8x32xf32>
    %688 = arith.addf %685, %686 : vector<8x32xf32>
    %689 = arith.addf %687, %688 : vector<8x32xf32>
    %690 = arith.addf %689, %682 : vector<8x32xf32>
    %691 = math.tanh %690 : vector<8x32xf32>
    %692 = vector.extract_strided_slice %691 {offsets = [0, 0], sizes = [8, 8], strides = [1, 1]} : vector<8x32xf32> to vector<8x8xf32>
    %cst_112 = arith.constant 1.000000e+00 : f32
    %693 = vector.broadcast %cst_112 : f32 to vector<8x8xf32>
    %694 = arith.addf %692, %693 : vector<8x8xf32>
    %cst_113 = arith.constant 5.000000e-01 : f32
    %695 = vector.broadcast %cst_113 : f32 to vector<8x8xf32>
    %696 = arith.mulf %695, %694 : vector<8x8xf32>
    %697 = vector.extract_strided_slice %691 {offsets = [0, 8], sizes = [8, 8], strides = [1, 1]} : vector<8x32xf32> to vector<8x8xf32>
    %cst_114 = arith.constant 1.000000e+00 : f32
    %698 = vector.broadcast %cst_114 : f32 to vector<8x8xf32>
    %699 = arith.addf %697, %698 : vector<8x8xf32>
    %cst_115 = arith.constant 5.000000e-01 : f32
    %700 = vector.broadcast %cst_115 : f32 to vector<8x8xf32>
    %701 = arith.mulf %700, %699 : vector<8x8xf32>
    %702 = vector.extract_strided_slice %691 {offsets = [0, 16], sizes = [8, 8], strides = [1, 1]} : vector<8x32xf32> to vector<8x8xf32>
    %703 = vector.extract_strided_slice %691 {offsets = [0, 24], sizes = [8, 8], strides = [1, 1]} : vector<8x32xf32> to vector<8x8xf32>
    %cst_116 = arith.constant 1.000000e+00 : f32
    %704 = vector.broadcast %cst_116 : f32 to vector<8x8xf32>
    %705 = arith.addf %703, %704 : vector<8x8xf32>
    %cst_117 = arith.constant 5.000000e-01 : f32
    %706 = vector.broadcast %cst_117 : f32 to vector<8x8xf32>
    %707 = arith.mulf %706, %705 : vector<8x8xf32>
    %708 = arith.mulf %701, %654 : vector<8x8xf32>
    %709 = arith.mulf %696, %702 : vector<8x8xf32>
    %710 = arith.addf %708, %709 : vector<8x8xf32>
    %711 = math.tanh %710 : vector<8x8xf32>
    %712 = arith.mulf %707, %711 : vector<8x8xf32>
    %c88_118 = arith.constant 88 : index
    %c0_119 = arith.constant 0 : index
    %713 = vector.load %arg4[%c88_118, %c0_119] : memref<96x8xf32, #tpu.memory_space<vmem>>, vector<8x8xf32>
    tpu.vector_store %arg4[%c88_118, %c0_119], %712 {strides = array<i32>} : memref<96x8xf32, #tpu.memory_space<vmem>>, vector<8x8xf32>,
    %c0_120 = arith.constant 0 : index
    %c0_121 = arith.constant 0 : index
    %714 = vector.load %arg5[%c0_120, %c0_121] : memref<8x8xf32, #tpu.memory_space<vmem>>, vector<8x8xf32>
    tpu.vector_store %arg5[%c0_120, %c0_121], %712 {strides = array<i32>} : memref<8x8xf32, #tpu.memory_space<vmem>>, vector<8x8xf32>,
    %c0_122 = arith.constant 0 : index
    %c0_123 = arith.constant 0 : index
    %715 = vector.load %arg6[%c0_122, %c0_123] : memref<8x8xf32, #tpu.memory_space<vmem>>, vector<8x8xf32>
    tpu.vector_store %arg6[%c0_122, %c0_123], %710 {strides = array<i32>} : memref<8x8xf32, #tpu.memory_space<vmem>>, vector<8x8xf32>,
    return
  }
}

</mosaic_0001>

<bundles_post_ra>
// kernel: lstm_forward.1
= control target key start
LH: loop header
LB: loop body
LE: loop exit
PB: predicated region body
PF: predicated region fallthrough
CT: control target
= control target key end

     0   :  { %v35_v0 = vlaneseq  ;;  %vm76_vm0 = vcmask 1045504   ;;  %vm39_vm1 = vcmask 48128   ;;  %vm1015_vm2 = vcmask 64512   ;;  %s3643_s27 = smov 8   ;;  %s3647_s29 = smov 16   ;;  %s4636_s3 = inlined_call_operand.vmem [shape: f32[24,32], index: 3, kind: input, shape index: {}]   ;;  %s4637_s0 = inlined_call_operand.vmem [shape: f32[96,6], index: 0, kind: input, shape index: {}]   ;;  %s4638_s1 = inlined_call_operand.vmem [shape: f32[8,8], index: 1, kind: input, shape index: {}]   ;;  %s4639_s2 = inlined_call_operand.vmem [shape: f32[8,8], index: 2, kind: input, shape index: {}]   ;;  %s4640_s4 = inlined_call_operand.vmem [shape: f32[96,8], index: 4, kind: output, shape index: {0}]   ;;  %s4641_s6 = inlined_call_operand.vmem [shape: f32[8,8], index: 6, kind: output, shape index: {2}]   ;;  %s4642_s5 = inlined_call_operand.vmem [shape: f32[8,8], index: 5, kind: output, shape index: {1}]  }
   0x1   :  { %v3694_v1 = vld [vmem:[%s4636_s3] sm:$0xff]  ;;  %v24_v7 = vld [vmem:[%s4637_s0 + $0x8] sm:$0xff]  ;;  %v25_v8 = vld [vmem:[%s4637_s0 + $0x10] sm:$0xff]  ;;  %vm1971_vm3 = vcmask 261120   ;;  %s3654_s30 = smov 104   ;;  %s3655_s7 = smov 120  }
   0x2   :  { %v23_v2 = vld [vmem:[%s4637_s0] sm:$0xff]  ;;  %v3699_v3 = vshrl.u32 %v35_v0, 7  ;;  %v78_v4 = vsel %vm76_vm0, %v3694_v1, 0  ;;  %v44_v12 = vsel %vm39_vm1, %v24_v7, 0  ;;  %v47_v13 = vsel %vm39_vm1, %v25_v8, 0  ;;  %v26_v14 = vld [vmem:[%s4637_s0 + $0x18] sm:$0xff] }
   0x3   :  { %v41_v5 = vsel %vm39_vm1, %v23_v2, 0  ;;  %v3703_v6 = vand.u32 4294901760, %v78_v4  ;;  %v27_v15 = vld [vmem:[%s4637_s0 + $0x20] sm:$0xff]  ;;  %v28_v18 = vld [vmem:[%s4637_s0 + $0x28] sm:$0xff]  ;;  %v29_v19 = vld [vmem:[%s4637_s0 + $0x30] sm:$0xff]  ;;  %v3741_v20 = vand.u32 4294901760, %v44_v12 }
   0x4   :  { %v1013_v9 = vsub.s32 7, %v3699_v3  ;;  %v3712_v10 = vand.u32 4294901760, %v41_v5  ;;  %v3743_v21 = vand.u32 4294901760, %v47_v13  ;;  %v50_v22 = vsel %vm39_vm1, %v26_v14, 0  ;;  %v30_v40 = vld [vmem:[%s4637_s0 + $0x38] sm:$0xff]  ;;  %v31_v41 = vld [vmem:[%s4637_s0 + $0x40] sm:$0xff] }
   0x5   :  { %3085 = vmatprep.subr.mxu0 %v3703_v6  ;;  %v3733_v17 = vsub.f32 %v78_v4, %v3703_v6  ;;  %v53_v23 = vsel %vm39_vm1, %v27_v15, 0  ;;  %v3751_v26 = vand.u32 4294901760, %v50_v22  ;;  %v3756_v28 = vsub.f32 %v44_v12, %v3741_v20  ;;  %v32_v54 = vld [vmem:[%s4637_s0 + $0x48] sm:$0xff]  ;;  %v33_v55 = vld [vmem:[%s4637_s0 + $0x50] sm:$0xff]  ;;  %v34_v0 = vld [vmem:[%s4637_s0 + $0x58] sm:$0xff] }
   0x6   :  { %v3718_v11 = vrot.slane %v3694_v1, %v1013_v9  ;;  %3086 = vmatpush3.msra.mxu0 %v3703_v6  ;;  %v3730_v16 = vsub.f32 %v41_v5, %v3712_v10  ;;  %v3753_v27 = vand.u32 4294901760, %v53_v23  ;;  %v3759_v29 = vsub.f32 %v47_v13, %v3743_v21 }
   0x7   :  { %v3749_v25 = vand.u32 4294901760, %v3733_v17  ;;  %v56_v30 = vsel %vm39_vm1, %v28_v18, 0  ;;  %v59_v31 = vsel %vm39_vm1, %v29_v19, 0  ;;  %v3769_v34 = vsub.f32 %v50_v22, %v3751_v26 }
   0x8   :  { %v148_v24 = vand.u32 4294901760, %v3730_v16  ;;  %v3772_v35 = vsub.f32 %v53_v23, %v3753_v27  ;;  %v158_v36 = vand.u32 4294901760, %v3756_v28  ;;  %v168_v37 = vand.u32 4294901760, %v3759_v29 }
   0x9   :  { %v270_v33 = vsub.f32 %v3733_v17, %v3749_v25  ;;  %v3776_v38 = vand.u32 4294901760, %v56_v30  ;;  %v3778_v39 = vand.u32 4294901760, %v59_v31  ;;  %v178_v44 = vand.u32 4294901760, %v3769_v34 }
   0xa   :  { %v149_v32 = vsub.f32 %v3730_v16, %v148_v24  ;;  %v188_v45 = vand.u32 4294901760, %v3772_v35  ;;  %v159_v46 = vsub.f32 %v3756_v28, %v158_v36  ;;  %v169_v47 = vsub.f32 %v3759_v29, %v168_v37 }
   0xb   :  { %v271_v43 = vand.u32 4294901760, %v270_v33  ;;  %v3795_v48 = vsub.f32 %v56_v30, %v3776_v38  ;;  %v3798_v49 = vsub.f32 %v59_v31, %v3778_v39  ;;  %v179_v50 = vsub.f32 %v3769_v34, %v178_v44 }
   0xc   :  { %v150_v42 = vand.u32 4294901760, %v149_v32  ;;  %v189_v51 = vsub.f32 %v3772_v35, %v188_v45  ;;  %v62_v52 = vsel %vm39_vm1, %v30_v40, 0  ;;  %v65_v53 = vsel %vm39_vm1, %v31_v41, 0 }
   0xd   :  { %3105 = vmatprep.subr.mxu0 %v271_v43  ;;  %v160_v56 = vand.u32 4294901760, %v159_v46  ;;  %v170_v57 = vand.u32 4294901760, %v169_v47  ;;  %v198_v58 = vand.u32 4294901760, %v3795_v48  ;;  %v208_v59 = vand.u32 4294901760, %v3798_v49 }
   0xe   :  { %3087 = vmatprep.mubr.f32.mxu0 %v150_v42  ;;  %v180_v60 = vand.u32 4294901760, %v179_v50  ;;  %v190_v61 = vand.u32 4294901760, %v189_v51  ;;  %v3816_v62 = vand.u32 4294901760, %v62_v52  ;;  %v3818_v63 = vand.u32 4294901760, %v65_v53 }
   0xf   :  { %3088 = vmatmul.mubr.f32.vlgmr.msra.gmra.mrb[0].mxu0 %v160_v56  ;;  %v199_v2 = vsub.f32 %v3795_v48, %v198_v58  ;;  %v209_v4 = vsub.f32 %v3798_v49, %v208_v59  ;;  %v68_v5 = vsel %vm39_vm1, %v32_v54, 0  ;;  %v71_v7 = vsel %vm39_vm1, %v33_v55, 0 }
  0x10   :  { %3106 = vmatpush3.msra.mxu0 %v271_v43  ;;  %3090 = vmatprep.mubr.f32.mxu0 %v170_v57  ;;  %v3832_v8 = vsub.f32 %v62_v52, %v3816_v62  ;;  %v3835_v12 = vsub.f32 %v65_v53, %v3818_v63  ;;  %v3837_v13 = vand.u32 4294901760, %v68_v5  ;;  %v3839_v14 = vand.u32 4294901760, %v71_v7 }
  0x11   :  { %v74_v15 = vsel %vm39_vm1, %v34_v0, 0  ;;  %3125 = vmatprep.subr.mxu0 %v3733_v17  ;;  %v200_v30 = vand.u32 4294901760, %v199_v2  ;;  %v210_v31 = vand.u32 4294901760, %v209_v4 }
  0x12   :  { %v218_v18 = vand.u32 4294901760, %v3832_v8  ;;  %v228_v19 = vand.u32 4294901760, %v3835_v12  ;;  %v3846_v22 = vsub.f32 %v68_v5, %v3837_v13  ;;  %v3849_v23 = vsub.f32 %v71_v7, %v3839_v14 }
  0x13   :  { %3091 = vmatmul.mubr.f32.gmra.mrb[2].mxu0 %v180_v60  ;;  %v3851_v32 = vand.u32 4294901760, %v74_v15 }
  0x14   :  { %3093 = vmatprep.mubr.f32.mxu0 %v190_v61  ;;  %v219_v33 = vsub.f32 %v3832_v8, %v218_v18  ;;  %v229_v40 = vsub.f32 %v3835_v12, %v228_v19  ;;  %v238_v41 = vand.u32 4294901760, %v3846_v22  ;;  %v248_v42 = vand.u32 4294901760, %v3849_v23 }
  0x15   :  { %v257_v43 = vsub.f32 %v74_v15, %v3851_v32 }
  0x16   :  { %v220_v46 = vand.u32 4294901760, %v219_v33  ;;  %v239_v47 = vsub.f32 %v3846_v22, %v238_v41  ;;  %v230_v51 = vand.u32 4294901760, %v229_v40  ;;  %v249_v52 = vsub.f32 %v3849_v23, %v248_v42 }
  0x17   :  { %3094 = vmatmul.mubr.f32.gmra.mrb[4].mxu0 %v200_v30  ;;  %v258_v50 = vand.u32 4294901760, %v257_v43 }
  0x18   :  { %3096 = vmatprep.mubr.f32.mxu0 %v210_v31  ;;  %v240_v53 = vand.u32 4294901760, %v239_v47  ;;  %v250_v55 = vand.u32 4294901760, %v249_v52 }
  0x19   :  { %v259_v54 = vsub.f32 %v257_v43, %v258_v50 }
  0x1b   :  { %3097 = vmatmul.mubr.f32.gmra.mrb[6].mxu0 %v220_v46  ;;  %v260_v56 = vand.u32 4294901760, %v259_v54 }
  0x1c   :  { %3099 = vmatprep.mubr.f32.mxu0 %v230_v51 }
  0x1f   :  { %3100 = vmatmul.mubr.f32.gmra.mrb[8].mxu0 %v240_v53 }
  0x20   :  { %3102 = vmatprep.mubr.f32.mxu0 %v250_v55 }
  0x23   :  { %3103 = vmatmul.mubr.f32.gmra.mrb[10].mxu0 %v260_v56 }
  0x24   :  { %3107 = vmatprep.mubr.f32.mxu0 %v3712_v10 }
  0x27   :  { %3108 = vmatmul.mubr.f32.vlgmr.msra.gmra.mrb[0].mxu0 %v3741_v20 }
  0x28   :  { %3126 = vmatpush3.msra.mxu0 %v3733_v17  ;;  %3110 = vmatprep.mubr.f32.mxu0 %v3743_v21 }
  0x29   :  { %3145 = vmatprep.subr.mxu0 %v3703_v6 }
  0x2b   :  { %3111 = vmatmul.mubr.f32.gmra.mrb[2].mxu0 %v3751_v26 }
  0x2c   :  { %3113 = vmatprep.mubr.f32.mxu0 %v3753_v27 }
  0x2f   :  { %3114 = vmatmul.mubr.f32.gmra.mrb[4].mxu0 %v3776_v38 }
  0x30   :  { %3116 = vmatprep.mubr.f32.mxu0 %v3778_v39 }
  0x33   :  { %3117 = vmatmul.mubr.f32.gmra.mrb[6].mxu0 %v3816_v62 }
  0x34   :  { %3119 = vmatprep.mubr.f32.mxu0 %v3818_v63 }
  0x37   :  { %3120 = vmatmul.mubr.f32.gmra.mrb[8].mxu0 %v3837_v13 }
  0x38   :  { %3122 = vmatprep.mubr.f32.mxu0 %v3839_v14 }
  0x3b   :  { %3123 = vmatmul.mubr.f32.gmra.mrb[10].mxu0 %v3851_v32 }
  0x3c   :  { %3127 = vmatprep.mubr.f32.mxu0 %v3730_v16 }
  0x3f   :  { %3128 = vmatmul.mubr.f32.vlgmr.msra.gmra.mrb[0].mxu0 %v3756_v28 }
  0x40   :  { %3146 = vmatpush3.msra.mxu0 %v3703_v6  ;;  %3130 = vmatprep.mubr.f32.mxu0 %v3759_v29 }
  0x41   :  { %3165 = vmatprep.subr.mxu0 %v3749_v25 }
  0x43   :  { %3131 = vmatmul.mubr.f32.gmra.mrb[2].mxu0 %v3769_v34 }
  0x44   :  { %3133 = vmatprep.mubr.f32.mxu0 %v3772_v35 }
  0x47   :  { %3134 = vmatmul.mubr.f32.gmra.mrb[4].mxu0 %v3795_v48 }
  0x48   :  { %3136 = vmatprep.mubr.f32.mxu0 %v3798_v49 }
  0x4b   :  { %3137 = vmatmul.mubr.f32.gmra.mrb[6].mxu0 %v3832_v8 }
  0x4c   :  { %3139 = vmatprep.mubr.f32.mxu0 %v3835_v12 }
  0x4f   :  { %3140 = vmatmul.mubr.f32.gmra.mrb[8].mxu0 %v3846_v22 }
  0x50   :  { %3142 = vmatprep.mubr.f32.mxu0 %v3849_v23 }
  0x53   :  { %3143 = vmatmul.mubr.f32.gmra.mrb[10].mxu0 %v257_v43 }
  0x54   :  { %3147 = vmatprep.mubr.f32.mxu0 %v148_v24  ;;  %v37_v24 = vsub.s32 6, %v3699_v3 }
  0x57   :  { %3148 = vmatmul.mubr.f32.vlgmr.msra.gmra.mrb[0].mxu0 %v158_v36 }
  0x58   :  { %3166 = vmatpush3.msra.mxu0 %v3749_v25  ;;  %3150 = vmatprep.mubr.f32.mxu0 %v168_v37  ;;  %v3958_v25 = vrot.slane %v3694_v1, %v37_v24 }
  0x59   :  { %3185 = vmatprep.subr.mxu0 %v3703_v6 }
  0x5b   :  { %3151 = vmatmul.mubr.f32.gmra.mrb[2].mxu0 %v178_v44 }
  0x5c   :  { %3153 = vmatprep.mubr.f32.mxu0 %v188_v45 }
  0x5f   :  { %3154 = vmatmul.mubr.f32.gmra.mrb[4].mxu0 %v198_v58 }
  0x60   :  { %3156 = vmatprep.mubr.f32.mxu0 %v208_v59 }
  0x63   :  { %3157 = vmatmul.mubr.f32.gmra.mrb[6].mxu0 %v218_v18 }
  0x64   :  { %3159 = vmatprep.mubr.f32.mxu0 %v228_v19 }
  0x67   :  { %3160 = vmatmul.mubr.f32.gmra.mrb[8].mxu0 %v238_v41 }
  0x68   :  { %3162 = vmatprep.mubr.f32.mxu0 %v248_v42 }
  0x6b   :  { %3163 = vmatmul.mubr.f32.gmra.mrb[10].mxu0 %v258_v50 }
  0x6c   :  { %3167 = vmatprep.mubr.f32.mxu0 %v3712_v10 }
  0x6f   :  { %3168 = vmatmul.mubr.f32.vlgmr.msra.gmra.mrb[0].mxu0 %v3741_v20 }
  0x70   :  { %3186 = vmatpush3.msra.mxu0 %v3703_v6  ;;  %3170 = vmatprep.mubr.f32.mxu0 %v3743_v21  ;;  %v21_v6 = vld [vmem:[%s4636_s3 + $0x8] sm:$0xff] }
  0x73   :  { %3171 = vmatmul.mubr.f32.gmra.mrb[2].mxu0 %v3751_v26 }
  0x74   :  { %3173 = vmatprep.mubr.f32.mxu0 %v3753_v27 }
  0x77   :  { %3174 = vmatmul.mubr.f32.gmra.mrb[4].mxu0 %v3776_v38 }
  0x78   :  { %3176 = vmatprep.mubr.f32.mxu0 %v3778_v39 }
  0x7b   :  { %3177 = vmatmul.mubr.f32.gmra.mrb[6].mxu0 %v3816_v62 }
  0x7c   :  { %3179 = vmatprep.mubr.f32.mxu0 %v3818_v63 }
  0x7f   :  { %3180 = vmatmul.mubr.f32.gmra.mrb[8].mxu0 %v3837_v13 }
  0x80   :  { %3182 = vmatprep.mubr.f32.mxu0 %v3839_v14 }
  0x83   :  { %3183 = vmatmul.mubr.f32.gmra.mrb[10].mxu0 %v3851_v32 }
  0x84   :  { %3187 = vmatprep.mubr.f32.mxu0 %v3712_v10  ;;  %v3939_v10 = vand.u32 4294901760, %v21_v6 }
  0x86   :  { %3205 = vmatprep.subr.mxu1 %v3939_v10  ;;  %v3944_v16 = vsub.f32 %v21_v6, %v3939_v10 }
  0x87   :  { %3188 = vmatmul.mubr.f32.vlgmr.msra.gmra.mrb[0].mxu0 %v3741_v20  ;;  %3206 = vmatpush3.msra.mxu1 %v3939_v10 }
  0x88   :  { %3190 = vmatprep.mubr.f32.mxu0 %v3743_v21  ;;  %v3947_v17 = vand.u32 4294901760, %v3944_v16 }
  0x8a   :  { %v1242_v20 = vsub.f32 %v3944_v16, %v3947_v17 }
  0x8b   :  { %3191 = vmatmul.mubr.f32.gmra.mrb[2].mxu0 %v3751_v26 }
  0x8c   :  { %3193 = vmatprep.mubr.f32.mxu0 %v3753_v27  ;;  %v3951_v21 = vand.u32 4294901760, %v1242_v20 }
  0x8e   :  { %3225 = vmatprep.subr.mxu1 %v3951_v21 }
  0x8f   :  { %3194 = vmatmul.mubr.f32.gmra.mrb[4].mxu0 %v3776_v38 }
  0x90   :  { %3196 = vmatprep.mubr.f32.mxu0 %v3778_v39 }
  0x93   :  { %3197 = vmatmul.mubr.f32.gmra.mrb[6].mxu0 %v3816_v62 }
  0x94   :  { %3199 = vmatprep.mubr.f32.mxu0 %v3818_v63 }
  0x97   :  { %3200 = vmatmul.mubr.f32.gmra.mrb[8].mxu0 %v3837_v13 }
  0x98   :  { %3202 = vmatprep.mubr.f32.mxu0 %v3839_v14 }
  0x9b   :  { %3203 = vmatmul.mubr.f32.gmra.mrb[10].mxu0 %v3851_v32 }
 0x15a   :  { %v3189_v26 = vpop.f32.mrb[0].mxu0 }
 0x15b   :  { %v3325_v27 = vadd.f32 %v3189_v26, %v3958_v25  ;;  %v929_v28 = vpop.f32.mrb[1].mxu0 }
 0x15c   :  { %v3326_v29 = vadd.f32 %v929_v28, %v3958_v25 }
 0x15d   :  { %v1000_v34 = vmax.f32 %v3325_v27, 0.0 }
 0x15e   :  { %v999_v35 = vmax.f32 %v3326_v29, 0.0  ;;  %v3192_v36 = vpop.f32.mrb[2].mxu0 }
 0x15f   :  { %v1020_v37 = vsel %vm1015_vm2, %v1000_v34, 0  ;;  %v3327_v38 = vadd.f32 %v3192_v36, %v3958_v25  ;;  %v941_v39 = vpop.f32.mrb[3].mxu0 }
 0x160   :  { %v3964_v44 = vand.u32 4294901760, %v1020_v37  ;;  %v1017_v1 = vsel %vm1015_vm2, %v999_v35, 0  ;;  %v3328_v45 = vadd.f32 %v941_v39, %v3958_v25 }
 0x161   :  { %v3968_v48 = vand.u32 4294901760, %v1017_v1  ;;  %v1002_v49 = vmax.f32 %v3327_v38, 0.0 }
 0x162   :  { %v3971_v57 = vsub.f32 %v1020_v37, %v3964_v44  ;;  %v1001_v58 = vmax.f32 %v3328_v45, 0.0  ;;  %v3195_v59 = vpop.f32.mrb[4].mxu0 }
 0x163   :  { %v3974_v60 = vsub.f32 %v1017_v1, %v3968_v48  ;;  %v1026_v61 = vsel %vm1015_vm2, %v1002_v49, 0  ;;  %v3329_v62 = vadd.f32 %v3195_v59, %v3958_v25  ;;  %v953_v63 = vpop.f32.mrb[5].mxu0 }
 0x164   :  { %v3978_v0 = vand.u32 4294901760, %v1026_v61  ;;  %v1023_v2 = vsel %vm1015_vm2, %v1001_v58, 0  ;;  %v3330_v4 = vadd.f32 %v953_v63, %v3958_v25  ;;  %v1130_v5 = vand.u32 4294901760, %v3971_v57 }
 0x165   :  { %v3983_v7 = vand.u32 4294901760, %v1023_v2  ;;  %v1004_v8 = vmax.f32 %v3329_v62, 0.0  ;;  %v1120_v12 = vand.u32 4294901760, %v3974_v60 }
 0x166   :  { %v3987_v13 = vsub.f32 %v1026_v61, %v3978_v0  ;;  %v1003_v14 = vmax.f32 %v3330_v4, 0.0  ;;  %v3198_v15 = vpop.f32.mrb[6].mxu0  ;;  %v1131_v18 = vsub.f32 %v3971_v57, %v1130_v5 }
 0x167   :  { %v3993_v19 = vsub.f32 %v1023_v2, %v3983_v7  ;;  %v1032_v22 = vsel %vm1015_vm2, %v1004_v8, 0  ;;  %v3331_v23 = vadd.f32 %v3198_v15, %v3958_v25  ;;  %v965_v30 = vpop.f32.mrb[7].mxu0  ;;  %v1121_v31 = vsub.f32 %v3974_v60, %v1120_v12 }
 0x168   :  { %v4000_v32 = vand.u32 4294901760, %v1032_v22  ;;  %v1029_v33 = vsel %vm1015_vm2, %v1003_v14, 0  ;;  %v3332_v40 = vadd.f32 %v965_v30, %v3958_v25  ;;  %v1132_v52 = vand.u32 4294901760, %v1131_v18 }
 0x169   :  { %v4004_v41 = vand.u32 4294901760, %v1029_v33  ;;  %v1006_v42 = vmax.f32 %v3331_v23, 0.0  ;;  %v1122_v43 = vand.u32 4294901760, %v1121_v31  ;;  %v1140_v46 = vand.u32 4294901760, %v3993_v19 }
 0x16a   :  { %v4008_v47 = vsub.f32 %v1032_v22, %v4000_v32  ;;  %v1005_v50 = vmax.f32 %v3332_v40, 0.0  ;;  %v3201_v51 = vpop.f32.mrb[8].mxu0  ;;  %v1150_v53 = vand.u32 4294901760, %v3987_v13 }
 0x16b   :  { %v4012_v54 = vsub.f32 %v1029_v33, %v4004_v41  ;;  %v1038_v55 = vsel %vm1015_vm2, %v1006_v42, 0  ;;  %v3333_v56 = vadd.f32 %v3201_v51, %v3958_v25  ;;  %v977_v6 = vpop.f32.mrb[9].mxu0  ;;  %3207 = vmatprep.mubr.f32.mxu1 %v1122_v43  ;;  %v1141_v20 = vsub.f32 %v3993_v19, %v1140_v46 }
 0x16c   :  { %v4019_v26 = vand.u32 4294901760, %v1038_v55  ;;  %v1035_v27 = vsel %vm1015_vm2, %v1005_v50, 0  ;;  %v3334_v28 = vadd.f32 %v977_v6, %v3958_v25  ;;  %3208 = vmatmul.mubr.f32.vlgmr.msra.gmra.mrb[0].mxu1 %v1132_v52  ;;  %v1151_v29 = vsub.f32 %v3987_v13, %v1150_v53 }
 0x16d   :  { %v4026_v34 = vand.u32 4294901760, %v1035_v27  ;;  %v1008_v35 = vmax.f32 %v3333_v56, 0.0  ;;  %3226 = vmatpush3.msra.mxu1 %v3951_v21  ;;  %v1142_v36 = vand.u32 4294901760, %v1141_v20  ;;  %v1160_v37 = vand.u32 4294901760, %v4012_v54 }
 0x16e   :  { %v4031_v38 = vsub.f32 %v1038_v55, %v4019_v26  ;;  %v1007_v39 = vmax.f32 %v3334_v28, 0.0  ;;  %v3204_v1 = vpop.f32.mrb[10].mxu0  ;;  %v1152_v45 = vand.u32 4294901760, %v1151_v29  ;;  %v1170_v49 = vand.u32 4294901760, %v4008_v47  ;;  %3245 = vmatprep.subr.mxu1 %v3944_v16 }
 0x16f   :  { %v4036_v58 = vsub.f32 %v1035_v27, %v4026_v34  ;;  %v1044_v59 = vsel %vm1015_vm2, %v1008_v35, 0  ;;  %v3335_v21 = vadd.f32 %v3204_v1, %v3958_v25  ;;  %v989_v61 = vpop.f32.mrb[11].mxu0  ;;  %3210 = vmatprep.mubr.f32.mxu1 %v1142_v36  ;;  %v1161_v62 = vsub.f32 %v4012_v54, %v1160_v37 }
 0x170   :  { %v4043_v63 = vand.u32 4294901760, %v1044_v59  ;;  %v1041_v2 = vsel %vm1015_vm2, %v1007_v39, 0  ;;  %v3336_v4 = vadd.f32 %v989_v61, %v3958_v25  ;;  %3211 = vmatmul.mubr.f32.gmra.mrb[2].mxu1 %v1152_v45  ;;  %v1171_v8 = vsub.f32 %v4008_v47, %v1170_v49 }
 0x171   :  { %v4050_v14 = vand.u32 4294901760, %v1041_v2  ;;  %v1010_v15 = vmax.f32 %v3335_v21, 0.0  ;;  %v1162_v18 = vand.u32 4294901760, %v1161_v62  ;;  %v1180_v22 = vand.u32 4294901760, %v4036_v58 }
 0x172   :  { %v4054_v23 = vsub.f32 %v1044_v59, %v4043_v63  ;;  %v1009_v30 = vmax.f32 %v3336_v4, 0.0  ;;  %v1172_v31 = vand.u32 4294901760, %v1171_v8  ;;  %v1190_v33 = vand.u32 4294901760, %v4031_v38  ;;  %v2016_v59 = vld [vmem:[%s4638_s1] sm:$0xff] }
 0x173   :  { %v4058_v25 = vsub.f32 %v1041_v2, %v4050_v14  ;;  %v1050_v40 = vsel %vm1015_vm2, %v1010_v15, 0  ;;  %3213 = vmatprep.mubr.f32.mxu1 %v1162_v18  ;;  %v1181_v42 = vsub.f32 %v4036_v58, %v1180_v22  ;;  %v3635_v45 = vmov 2  }
 0x174   :  { %v4064_v43 = vand.u32 4294901760, %v1050_v40  ;;  %v1047_v50 = vsel %vm1015_vm2, %v1009_v30, 0  ;;  %3214 = vmatmul.mubr.f32.gmra.mrb[4].mxu1 %v1172_v31  ;;  %v1191_v51 = vsub.f32 %v4031_v38, %v1190_v33  ;;  %v1210_v52 = vand.u32 4294901760, %v4054_v23  ;;  %3492 = vset.pattern.permute.xlu1 %v3635_v45 }
 0x175   :  { %v4071_v55 = vand.u32 4294901760, %v1047_v50  ;;  %v1182_v56 = vand.u32 4294901760, %v1181_v42  ;;  %v1200_v6 = vand.u32 4294901760, %v4058_v25  ;;  %v3636_v21 = vmov 0   ;;  %2031 = vperm.xlu1 %3492, %v2016_v59  }
 0x176   :  { %v4075_v20 = vsub.f32 %v1050_v40, %v4064_v43  ;;  %v1192_v27 = vand.u32 4294901760, %v1191_v51  ;;  %v1211_v28 = vsub.f32 %v4054_v23, %v1210_v52  ;;  %3490 = vset.pattern.permute.xlu0 %v3636_v21  ;;  %v3637_v15 = vmov 3  }
 0x177   :  { %v4081_v29 = vsub.f32 %v1047_v50, %v4071_v55  ;;  %3216 = vmatprep.mubr.f32.mxu1 %v1182_v56  ;;  %v1201_v35 = vsub.f32 %v4058_v25, %v1200_v6  ;;  %2021 = vperm.xlu0 %3490, %v2016_v59   ;;  %v3638_v18 = vmov 1   ;;  %v3639_v30 = vmov 4  }
 0x178   :  { %3217 = vmatmul.mubr.f32.gmra.mrb[6].mxu1 %v1192_v27  ;;  %v1230_v36 = vand.u32 4294901760, %v4075_v20  ;;  %v1212_v61 = vand.u32 4294901760, %v1211_v28  ;;  %v3640_v31 = vmov 5   ;;  %v3641_v40 = vmov 6  }
 0x179   :  { %v1202_v39 = vand.u32 4294901760, %v1201_v35  ;;  %v1220_v1 = vand.u32 4294901760, %v4081_v29  ;;  %3493 = vset.pattern.permute.xlu1 %v3637_v15  ;;  %v3642_v42 = vmov 7  }
 0x17a   :  { %v1231_v62 = vsub.f32 %v4075_v20, %v1230_v36  ;;  %2036 = vperm.xlu1 %3493, %v2016_v59  }
 0x17b   :  { %3219 = vmatprep.mubr.f32.mxu1 %v1202_v39  ;;  %v1221_v2 = vsub.f32 %v4081_v29, %v1220_v1  ;;  %3491 = vset.pattern.permute.xlu0 %v3638_v18 }
 0x17c   :  { %3220 = vmatmul.mubr.f32.gmra.mrb[8].mxu1 %v1212_v61  ;;  %v1232_v8 = vand.u32 4294901760, %v1231_v62  ;;  %2026 = vperm.xlu0 %3491, %v2016_v59  }
 0x17d   :  { %v1222_v4 = vand.u32 4294901760, %v1221_v2 }
 0x17e   :  { %3494 = vset.pattern.permute.xlu1 %v3639_v30 }
 0x17f   :  { %3222 = vmatprep.mubr.f32.mxu1 %v1222_v4  ;;  %2041 = vperm.xlu1 %3494, %v2016_v59  }
 0x180   :  { %3223 = vmatmul.mubr.f32.gmra.mrb[10].mxu1 %v1232_v8  ;;  %3495 = vset.pattern.permute.xlu0 %v3640_v31 }
 0x181   :  { %3227 = vmatprep.mubr.f32.mxu1 %v3968_v48  ;;  %2046 = vperm.xlu0 %3495, %v2016_v59  }
 0x183   :  { %3496 = vset.pattern.permute.xlu1 %v3641_v40 }
 0x184   :  { %3228 = vmatmul.mubr.f32.vlgmr.msra.gmra.mrb[0].mxu1 %v3964_v44  ;;  %2051 = vperm.xlu1 %3496, %v2016_v59  }
 0x185   :  { %3246 = vmatpush3.msra.mxu1 %v3944_v16  ;;  %3230 = vmatprep.mubr.f32.mxu1 %v3983_v7  ;;  %v2017_v16 = vld [vmem:[%s4639_s2] sm:$0xff] }
 0x186   :  { %3265 = vmatprep.subr.mxu1 %v3939_v10 }
 0x188   :  { %3231 = vmatmul.mubr.f32.gmra.mrb[2].mxu1 %v3978_v0  ;;  %3497 = vset.pattern.permute.xlu1 %v3642_v42 }
 0x189   :  { %3233 = vmatprep.mubr.f32.mxu1 %v4004_v41  ;;  %2056 = vperm.xlu1 %3497, %v2016_v59  }
 0x18c   :  { %3234 = vmatmul.mubr.f32.gmra.mrb[4].mxu1 %v4000_v32 }
 0x18d   :  { %3236 = vmatprep.mubr.f32.mxu1 %v4026_v34  ;;  %2072 = vrot.lane.b32.xlu1 %v2017_v16, %s3643_s27 }
 0x190   :  { %3237 = vmatmul.mubr.f32.gmra.mrb[6].mxu1 %v4019_v26 }
 0x191   :  { %3239 = vmatprep.mubr.f32.mxu1 %v4050_v14 }
 0x194   :  { %3240 = vmatmul.mubr.f32.gmra.mrb[8].mxu1 %v4043_v63 }
 0x195   :  { %3242 = vmatprep.mubr.f32.mxu1 %v4071_v55 }
 0x198   :  { %3243 = vmatmul.mubr.f32.gmra.mrb[10].mxu1 %v4064_v43 }
 0x199   :  { %3247 = vmatprep.mubr.f32.mxu1 %v3974_v60 }
 0x19c   :  { %3248 = vmatmul.mubr.f32.vlgmr.msra.gmra.mrb[0].mxu1 %v3971_v57 }
 0x19d   :  { %3266 = vmatpush3.msra.mxu1 %v3939_v10  ;;  %3250 = vmatprep.mubr.f32.mxu1 %v3993_v19 }
 0x19e   :  { %3285 = vmatprep.subr.mxu1 %v3947_v17 }
 0x1a0   :  { %3251 = vmatmul.mubr.f32.gmra.mrb[2].mxu1 %v3987_v13  ;;  %v1994_v13 = vsub.s32 2, %v3699_v3 }
 0x1a1   :  { %3253 = vmatprep.mubr.f32.mxu1 %v4012_v54 }
 0x1a4   :  { %3254 = vmatmul.mubr.f32.gmra.mrb[4].mxu1 %v4008_v47 }
 0x1a5   :  { %3256 = vmatprep.mubr.f32.mxu1 %v4036_v58 }
 0x1a8   :  { %3257 = vmatmul.mubr.f32.gmra.mrb[6].mxu1 %v4031_v38 }
 0x1a9   :  { %3259 = vmatprep.mubr.f32.mxu1 %v4058_v25 }
 0x1ac   :  { %3260 = vmatmul.mubr.f32.gmra.mrb[8].mxu1 %v4054_v23 }
 0x1ad   :  { %3262 = vmatprep.mubr.f32.mxu1 %v4081_v29 }
 0x1b0   :  { %3263 = vmatmul.mubr.f32.gmra.mrb[10].mxu1 %v4075_v20 }
 0x1b1   :  { %3267 = vmatprep.mubr.f32.mxu1 %v1120_v12  ;;  %v1990_v12 = vsub.s32 1, %v3699_v3 }
 0x1b4   :  { %3268 = vmatmul.mubr.f32.vlgmr.msra.gmra.mrb[0].mxu1 %v1130_v5  ;;  %v2006_v5 = vsub.s32 5, %v3699_v3 }
 0x1b5   :  { %3286 = vmatpush3.msra.mxu1 %v3947_v17  ;;  %3270 = vmatprep.mubr.f32.mxu1 %v1140_v46 }
 0x1b6   :  { %3305 = vmatprep.subr.mxu1 %v3939_v10 }
 0x1b8   :  { %3271 = vmatmul.mubr.f32.gmra.mrb[2].mxu1 %v1150_v53 }
 0x1b9   :  { %3273 = vmatprep.mubr.f32.mxu1 %v1160_v37 }
 0x1bc   :  { %3274 = vmatmul.mubr.f32.gmra.mrb[4].mxu1 %v1170_v49 }
 0x1bd   :  { %3276 = vmatprep.mubr.f32.mxu1 %v1180_v22 }
 0x1c0   :  { %3277 = vmatmul.mubr.f32.gmra.mrb[6].mxu1 %v1190_v33 }
 0x1c1   :  { %3279 = vmatprep.mubr.f32.mxu1 %v1200_v6 }
 0x1c4   :  { %3280 = vmatmul.mubr.f32.gmra.mrb[8].mxu1 %v1210_v52 }
 0x1c5   :  { %3282 = vmatprep.mubr.f32.mxu1 %v1220_v1 }
 0x1c8   :  { %3283 = vmatmul.mubr.f32.gmra.mrb[10].mxu1 %v1230_v36 }
 0x1c9   :  { %3287 = vmatprep.mubr.f32.mxu1 %v3968_v48 }
 0x1cc   :  { %3288 = vmatmul.mubr.f32.vlgmr.msra.gmra.mrb[0].mxu1 %v3964_v44 }
 0x1cd   :  { %3306 = vmatpush3.msra.mxu1 %v3939_v10  ;;  %3290 = vmatprep.mubr.f32.mxu1 %v3983_v7 }
 0x1d0   :  { %3291 = vmatmul.mubr.f32.gmra.mrb[2].mxu1 %v3978_v0 }
 0x1d1   :  { %3293 = vmatprep.mubr.f32.mxu1 %v4004_v41 }
 0x1d4   :  { %3294 = vmatmul.mubr.f32.gmra.mrb[4].mxu1 %v4000_v32 }
 0x1d5   :  { %3296 = vmatprep.mubr.f32.mxu1 %v4026_v34 }
 0x1d8   :  { %3297 = vmatmul.mubr.f32.gmra.mrb[6].mxu1 %v4019_v26 }
 0x1d9   :  { %3299 = vmatprep.mubr.f32.mxu1 %v4050_v14 }
 0x1dc   :  { %3300 = vmatmul.mubr.f32.gmra.mrb[8].mxu1 %v4043_v63 }
 0x1dd   :  { %3302 = vmatprep.mubr.f32.mxu1 %v4071_v55 }
 0x1e0   :  { %3303 = vmatmul.mubr.f32.gmra.mrb[10].mxu1 %v4064_v43 }
 0x1e1   :  { %3307 = vmatprep.mubr.f32.mxu1 %v3968_v48  ;;  %v1998_v48 = vsub.s32 3, %v3699_v3 }
 0x1e4   :  { %3308 = vmatmul.mubr.f32.vlgmr.msra.gmra.mrb[0].mxu1 %v3964_v44 }
 0x1e5   :  { %3310 = vmatprep.mubr.f32.mxu1 %v3983_v7  ;;  %v22_v7 = vld [vmem:[%s4636_s3 + $0x10] sm:$0xff]  ;;  %s3644_s3 = smov 112  }
 0x1e6   :  { %v4194_v54 = vrot.slane %v22_v7, %v2006_v5  ;;  %v4202_v49 = vrot.slane %v22_v7, %v1990_v12  ;;  %v4204_v58 = vrot.slane %v22_v7, %v1994_v13  ;;  %v4221_v56 = vrot.slane %v22_v7, %v1013_v9 }
 0x1e7   :  { %v3646_v13 = vmov 24  }
 0x1e8   :  { %3311 = vmatmul.mubr.f32.gmra.mrb[2].mxu1 %v3978_v0  ;;  %v2002_v0 = vsub.s32 4, %v3699_v3  ;;  %3498 = vset.pattern.permute.xlu0 %v3646_v13 }
 0x1e9   :  { %3313 = vmatprep.mubr.f32.mxu1 %v4004_v41  ;;  %v4189_v41 = vrot.slane %v22_v7, %v1998_v48 }
 0x1ea   :  { %v4192_v53 = vrot.slane %v22_v7, %v2002_v0 }
 0x1ec   :  { %3314 = vmatmul.mubr.f32.gmra.mrb[4].mxu1 %v4000_v32  ;;  %v1986_v32 = vsub.s32 0, %v3699_v3 }
 0x1ed   :  { %3316 = vmatprep.mubr.f32.mxu1 %v4026_v34 }
 0x1f0   :  { %3317 = vmatmul.mubr.f32.gmra.mrb[6].mxu1 %v4019_v26  ;;  %v4198_v26 = vrot.slane %v22_v7, %v37_v24 }
 0x1f1   :  { %3319 = vmatprep.mubr.f32.mxu1 %v4050_v14  ;;  %v4207_v14 = vrot.slane %v22_v7, %v1986_v32 }
 0x1f4   :  { %3320 = vmatmul.mubr.f32.gmra.mrb[8].mxu1 %v4043_v63  ;;  %v2032_v10 = vpop.permute.xlu1 %2031 }
 0x1f5   :  { %3322 = vmatprep.mubr.f32.mxu1 %v4071_v55  ;;  %v2034_v51 = vmul.f32 %v2032_v10, %v4204_v58 }
 0x1f6   :  { %v2022_v17 = vpop.permute.xlu0 %2021 }
 0x1f7   :  { %v2024_v27 = vmul.f32 %v2022_v17, %v4207_v14 }
 0x1f8   :  { %3323 = vmatmul.mubr.f32.gmra.mrb[10].mxu1 %v4064_v43 }
 0x1f9   :  { %v2037_v44 = vpop.permute.xlu1 %2036 }
 0x1fa   :  { %v2039_v22 = vmul.f32 %v2037_v44, %v4189_v41 }
 0x1fb   :  { %v2027_v57 = vpop.permute.xlu0 %2026 }
 0x1fc   :  { %v2029_v52 = vmul.f32 %v2027_v57, %v4202_v49 }
 0x1fe   :  { %v2042_v60 = vpop.permute.xlu1 %2041  ;;  %v2061_v1 = vadd.f32 %v2034_v51, %v2029_v52 }
 0x1ff   :  { %v2044_v33 = vmul.f32 %v2042_v60, %v4192_v53 }
 0x200   :  { %v2047_v38 = vpop.permute.xlu0 %2046 }
 0x201   :  { %v2049_v43 = vmul.f32 %v2047_v38, %v4194_v54  ;;  %v2062_v28 = vadd.f32 %v2044_v33, %v2039_v22  ;;  %v3651_v38 = vmov 30   ;;  %v3653_v22 = vmov 31  }
 0x203   :  { %v2052_v37 = vpop.permute.xlu1 %2051 }
 0x204   :  { %v2054_v25 = vmul.f32 %v2052_v37, %v4198_v26  ;;  %v3650_v37 = vmov 28  }
 0x206   :  { %v2063_v29 = vadd.f32 %v2054_v25, %v2049_v43 }
 0x208   :  { %v2057_v36 = vpop.permute.xlu1 %2056  ;;  %v2065_v21 = vadd.f32 %v2063_v29, %v2062_v28 }
 0x209   :  { %v2059_v62 = vmul.f32 %v2057_v36, %v4221_v56 }
 0x20c   :  { %v2073_v0 = vpop.permute.xlu1 %2072 }
 0x2b7   :  { %v3309_v19 = vpop.f32.mrb[0].mxu1 }
 0x2b8   :  { %v3337_v46 = vadd.f32 %v3309_v19, %v3718_v11  ;;  %v1901_v47 = vpop.f32.mrb[1].mxu1 }
 0x2b9   :  { %v3338_v34 = vadd.f32 %v1901_v47, %v3718_v11  ;;  %v3648_v47 = vmov 26  }
 0x2ba   :  { %1973 = vst.msk [vmem:[#allocation2 + $0x8] sm:$0xff] %vm1971_vm3, %v3337_v46 }
 0x2bb   :  { %1972 = vst.msk [vmem:[#allocation2] sm:$0xff] %vm1971_vm3, %v3338_v34  ;;  %v3312_v63 = vpop.f32.mrb[2].mxu1  ;;  %v3649_v34 = vmov 27  }
 0x2bc   :  { %v3339_v24 = vadd.f32 %v3312_v63, %v3718_v11  ;;  %v1913_v23 = vpop.f32.mrb[3].mxu1  ;;  %v3652_v63 = vmov 29  }
 0x2bd   :  { %v3340_v50 = vadd.f32 %v1913_v23, %v3718_v11 }
 0x2be   :  { %1975 = vst.msk [vmem:[#allocation2 + $0x18] sm:$0xff] %vm1971_vm3, %v3339_v24 }
 0x2bf   :  { %1974 = vst.msk [vmem:[#allocation2 + $0x10] sm:$0xff] %vm1971_vm3, %v3340_v50  ;;  %v3315_v55 = vpop.f32.mrb[4].mxu1 }
 0x2c0   :  { %v3341_v6 = vadd.f32 %v3315_v55, %v3718_v11  ;;  %v1925_v20 = vpop.f32.mrb[5].mxu1 }
 0x2c1   :  { %v3342_v35 = vadd.f32 %v1925_v20, %v3718_v11  ;;  %v2097_v36 = vld [vmem:[#allocation2 + $0x8] sm:$0xff] }
 0x2c2   :  { %1977 = vst.msk [vmem:[#allocation2 + $0x28] sm:$0xff] %vm1971_vm3, %v3341_v6  ;;  %v2018_v39 = vld [vmem:[#allocation2] sm:$0xff] }
 0x2c3   :  { %1976 = vst.msk [vmem:[#allocation2 + $0x20] sm:$0xff] %vm1971_vm3, %v3342_v35  ;;  %v3318_v45 = vpop.f32.mrb[6].mxu1  ;;  %v2060_v3 = vadd.f32 %v2024_v27, %v2018_v39 }
 0x2c4   :  { %v3343_v9 = vadd.f32 %v3318_v45, %v3718_v11  ;;  %v1937_v59 = vpop.f32.mrb[7].mxu1 }
 0x2c5   :  { %v3344_v61 = vadd.f32 %v1937_v59, %v3718_v11  ;;  %v2064_v2 = vadd.f32 %v2061_v1, %v2060_v3 }
 0x2c6   :  { %1979 = vst.msk [vmem:[#allocation2 + $0x38] sm:$0xff] %vm1971_vm3, %v3343_v9 }
 0x2c7   :  { %1978 = vst.msk [vmem:[#allocation2 + $0x30] sm:$0xff] %vm1971_vm3, %v3344_v61  ;;  %v2066_v4 = vadd.f32 %v2065_v21, %v2064_v2  ;;  %v3321_v8 = vpop.f32.mrb[8].mxu1 }
 0x2c8   :  { %v3345_v15 = vadd.f32 %v3321_v8, %v3718_v11  ;;  %v1949_v18 = vpop.f32.mrb[9].mxu1 }
 0x2c9   :  { %v2067_v30 = vadd.f32 %v2066_v4, %v2059_v62  ;;  %v3346_v31 = vadd.f32 %v1949_v18, %v3718_v11 }
 0x2ca   :  { %1981 = vst.msk [vmem:[#allocation2 + $0x48] sm:$0xff] %vm1971_vm3, %v3345_v15 }
 0x2cb   :  { %3587 = vtanh.f32 %v2067_v30  ;;  %1980 = vst.msk [vmem:[#allocation2 + $0x40] sm:$0xff] %vm1971_vm3, %v3346_v31  ;;  %v3324_v40 = vpop.f32.mrb[10].mxu1 }
 0x2cc   :  { %v3347_v42 = vadd.f32 %v3324_v40, %v3718_v11  ;;  %v1961_v16 = vpop.f32.mrb[11].mxu1 }
 0x2cd   :  { %v3348_v10 = vadd.f32 %v1961_v16, %v3718_v11  ;;  %v3645_v11 = vmov 25  }
 0x2ce   :  { %1983 = vst.msk [vmem:[#allocation2 + $0x58] sm:$0xff] %vm1971_vm3, %v3347_v42  ;;  %3499 = vset.pattern.permute.xlu1 %v3645_v11 }
 0x2cf   :  { %1982 = vst.msk [vmem:[#allocation2 + $0x50] sm:$0xff] %vm1971_vm3, %v3348_v10 }
 0x2d5   :  { %v3588_v17 = vpop.eup %3587 }
 0x2d6   :  { %2077 = vrot.lane.b32.xlu0 %v3588_v17, %s3644_s3  ;;  %v2069_v44 = vadd.f32 1.0, %v3588_v17 }
 0x2d8   :  { %v2070_v48 = vmul.f32 0.5, %v2069_v44 }
 0x2da   :  { %v2075_v5 = vmul.f32 %v2073_v0, %v2070_v48 }
 0x348   :  { %v2078_v57 = vpop.permute.xlu0 %2077 }
 0x349   :  { %v2080_v60 = vmul.f32 %v2078_v57, %v2070_v48 }
 0x34b   :  { %2082 = vrot.lane.b32.xlu0 %v2080_v60, %s3643_s27 }
 0x3bd   :  { %v2083_v7 = vpop.permute.xlu0 %2082 }
 0x3be   :  { %v4243_v12 = vadd.f32 %v2083_v7, %v2075_v5 }
 0x3c0   :  { %3589 = vtanh.f32 %v4243_v12 }
 0x3ca   :  { %v3590_v19 = vpop.eup %3589 }
 0x3cb   :  { %2088 = vrot.lane.b32.xlu1 %v3590_v19, %s3647_s29 }
 0x43d   :  { %v2089_v32 = vpop.permute.xlu1 %2088 }
 0x43e   :  { %v4249_v46 = vmul.f32 %v2089_v32, %v2070_v48 }
 0x440   :  { %2104 = vperm.xlu1 %3499, %v4249_v46   ;;  %2099 = vperm.xlu0 %3498, %v4249_v46  }
 0x444   :  { %3500 = vset.pattern.permute.xlu1 %v3648_v47  ;;  %3501 = vset.pattern.permute.xlu0 %v3649_v34 }
 0x445   :  { %2109 = vperm.xlu1 %3500, %v4249_v46   ;;  %2114 = vperm.xlu0 %3501, %v4249_v46  }
 0x449   :  { %3502 = vset.pattern.permute.xlu1 %v3650_v37  ;;  %3504 = vset.pattern.permute.xlu0 %v3651_v38 }
 0x44a   :  { %2119 = vperm.xlu1 %3502, %v4249_v46   ;;  %2129 = vperm.xlu0 %3504, %v4249_v46  }
 0x44e   :  { %3503 = vset.pattern.permute.xlu1 %v3652_v63  ;;  %3506 = vset.pattern.permute.xlu0 %v3646_v13 }
 0x44f   :  { %2124 = vperm.xlu1 %3503, %v4249_v46  }
 0x453   :  { %3505 = vset.pattern.permute.xlu1 %v3653_v22 }
 0x454   :  { %2134 = vperm.xlu1 %3505, %v4249_v46  }
 0x458   :  { %3507 = vset.pattern.permute.xlu1 %v3645_v11 }
 0x4bf   :  { %v2105_v24 = vpop.permute.xlu1 %2104  ;;  %v2100_v23 = vpop.permute.xlu0 %2099 }
 0x4c0   :  { %v2107_v52 = vmul.f32 %v2105_v24, %v4202_v49  ;;  %v2102_v55 = vmul.f32 %v2100_v23, %v4207_v14 }
 0x4c2   :  { %v2138_v39 = vadd.f32 %v2102_v55, %v2097_v36 }
 0x4c4   :  { %v2110_v33 = vpop.permute.xlu1 %2109  ;;  %v2115_v25 = vpop.permute.xlu0 %2114 }
 0x4c5   :  { %v2112_v50 = vmul.f32 %v2110_v33, %v4204_v58  ;;  %v2117_v28 = vmul.f32 %v2115_v25, %v4189_v41 }
 0x4c7   :  { %v2139_v27 = vadd.f32 %v2112_v50, %v2107_v52 }
 0x4c9   :  { %v2120_v43 = vpop.permute.xlu1 %2119  ;;  %v2130_v51 = vpop.permute.xlu0 %2129  ;;  %v2142_v3 = vadd.f32 %v2139_v27, %v2138_v39 }
 0x4ca   :  { %v2122_v6 = vmul.f32 %v2120_v43, %v4192_v53  ;;  %v2132_v29 = vmul.f32 %v2130_v51, %v4198_v26  ;;  %v2171_v43 = vld [vmem:[#allocation2 + $0x10] sm:$0xff] }
 0x4cc   :  { %v2140_v1 = vadd.f32 %v2122_v6, %v2117_v28 }
 0x4ce   :  { %v2125_v20 = vpop.permute.xlu1 %2124 }
 0x4cf   :  { %v2127_v35 = vmul.f32 %v2125_v20, %v4194_v54 }
 0x4d1   :  { %v2141_v45 = vadd.f32 %v2132_v29, %v2127_v35 }
 0x4d3   :  { %v2143_v9 = vadd.f32 %v2141_v45, %v2140_v1  ;;  %v2135_v59 = vpop.permute.xlu1 %2134 }
 0x4d4   :  { %v2137_v21 = vmul.f32 %v2135_v59, %v4221_v56 }
 0x4d5   :  { %v2144_v61 = vadd.f32 %v2143_v9, %v2142_v3 }
 0x4d7   :  { %v2145_v62 = vadd.f32 %v2144_v61, %v2137_v21 }
 0x4d9   :  { %3591 = vtanh.f32 %v2145_v62 }
 0x4e3   :  { %v3592_v2 = vpop.eup %3591 }
 0x4e4   :  { %2151 = vrot.lane.b32.xlu1 %v3592_v2, %s3644_s3  ;;  %v2147_v4 = vadd.f32 1.0, %v3592_v2 }
 0x4e6   :  { %v2148_v8 = vmul.f32 0.5, %v2147_v4 }
 0x4e8   :  { %v2149_v30 = vmul.f32 %v2148_v8, %v4243_v12 }
 0x556   :  { %v2152_v15 = vpop.permute.xlu1 %2151 }
 0x557   :  { %v2154_v18 = vmul.f32 %v2152_v15, %v2148_v8 }
 0x559   :  { %2156 = vrot.lane.b32.xlu0 %v2154_v18, %s3643_s27 }
 0x5cb   :  { %v2157_v31 = vpop.permute.xlu0 %2156 }
 0x5cc   :  { %v2159_v40 = vadd.f32 %v2157_v31, %v2149_v30 }
 0x5ce   :  { %3593 = vtanh.f32 %v2159_v40 }
 0x5d8   :  { %v3594_v42 = vpop.eup %3593 }
 0x5d9   :  { %2162 = vrot.lane.b32.xlu1 %v3594_v42, %s3647_s29 }
 0x64b   :  { %v2163_v16 = vpop.permute.xlu1 %2162 }
 0x64c   :  { %v4279_v10 = vmul.f32 %v2163_v16, %v2148_v8 }
 0x64e   :  { %2178 = vperm.xlu1 %3507, %v4279_v10   ;;  %2173 = vperm.xlu0 %3506, %v4279_v10  }
 0x652   :  { %3508 = vset.pattern.permute.xlu1 %v3648_v47  ;;  %3509 = vset.pattern.permute.xlu0 %v3649_v34 }
 0x653   :  { %2183 = vperm.xlu1 %3508, %v4279_v10   ;;  %2188 = vperm.xlu0 %3509, %v4279_v10  }
 0x657   :  { %3510 = vset.pattern.permute.xlu1 %v3650_v37  ;;  %3512 = vset.pattern.permute.xlu0 %v3651_v38 }
 0x658   :  { %2193 = vperm.xlu1 %3510, %v4279_v10   ;;  %2203 = vperm.xlu0 %3512, %v4279_v10  }
 0x65c   :  { %3511 = vset.pattern.permute.xlu1 %v3652_v63  ;;  %3514 = vset.pattern.permute.xlu0 %v3646_v13 }
 0x65d   :  { %2198 = vperm.xlu1 %3511, %v4279_v10  }
 0x661   :  { %3513 = vset.pattern.permute.xlu1 %v3653_v22 }
 0x662   :  { %2208 = vperm.xlu1 %3513, %v4279_v10  }
 0x666   :  { %3515 = vset.pattern.permute.xlu1 %v3645_v11 }
 0x6cd   :  { %v2179_v17 = vpop.permute.xlu1 %2178  ;;  %v2174_v44 = vpop.permute.xlu0 %2173 }
 0x6ce   :  { %v2181_v7 = vmul.f32 %v2179_v17, %v4202_v49  ;;  %v2176_v12 = vmul.f32 %v2174_v44, %v4207_v14 }
 0x6d0   :  { %v2212_v50 = vadd.f32 %v2176_v12, %v2171_v43 }
 0x6d2   :  { %v2184_v48 = vpop.permute.xlu1 %2183  ;;  %v2189_v57 = vpop.permute.xlu0 %2188 }
 0x6d3   :  { %v2186_v0 = vmul.f32 %v2184_v48, %v4204_v58  ;;  %v2191_v23 = vmul.f32 %v2189_v57, %v4189_v41 }
 0x6d5   :  { %v2213_v24 = vadd.f32 %v2186_v0, %v2181_v7  ;;  %v2245_v0 = vld [vmem:[#allocation2 + $0x18] sm:$0xff] }
 0x6d7   :  { %v2194_v60 = vpop.permute.xlu1 %2193  ;;  %v2204_v5 = vpop.permute.xlu0 %2203  ;;  %v2216_v55 = vadd.f32 %v2213_v24, %v2212_v50 }
 0x6d8   :  { %v2196_v19 = vmul.f32 %v2194_v60, %v4192_v53  ;;  %v2206_v33 = vmul.f32 %v2204_v5, %v4198_v26 }
 0x6da   :  { %v2214_v51 = vadd.f32 %v2196_v19, %v2191_v23 }
 0x6dc   :  { %v2199_v32 = vpop.permute.xlu1 %2198 }
 0x6dd   :  { %v2201_v25 = vmul.f32 %v2199_v32, %v4194_v54 }
 0x6df   :  { %v2215_v52 = vadd.f32 %v2206_v33, %v2201_v25 }
 0x6e1   :  { %v2217_v6 = vadd.f32 %v2215_v52, %v2214_v51  ;;  %v2209_v20 = vpop.permute.xlu1 %2208 }
 0x6e2   :  { %v2211_v27 = vmul.f32 %v2209_v20, %v4221_v56 }
 0x6e3   :  { %v2218_v28 = vadd.f32 %v2217_v6, %v2216_v55 }
 0x6e5   :  { %v2219_v29 = vadd.f32 %v2218_v28, %v2211_v27 }
 0x6e7   :  { %3595 = vtanh.f32 %v2219_v29 }
 0x6f1   :  { %v3596_v35 = vpop.eup %3595 }
 0x6f2   :  { %2225 = vrot.lane.b32.xlu1 %v3596_v35, %s3644_s3  ;;  %v2221_v36 = vadd.f32 1.0, %v3596_v35 }
 0x6f4   :  { %v2222_v39 = vmul.f32 0.5, %v2221_v36 }
 0x6f6   :  { %v2223_v3 = vmul.f32 %v2222_v39, %v2159_v40 }
 0x764   :  { %v2226_v1 = vpop.permute.xlu1 %2225 }
 0x765   :  { %v2228_v45 = vmul.f32 %v2226_v1, %v2222_v39 }
 0x767   :  { %2230 = vrot.lane.b32.xlu0 %v2228_v45, %s3643_s27 }
 0x7d9   :  { %v2231_v9 = vpop.permute.xlu0 %2230 }
 0x7da   :  { %v2233_v59 = vadd.f32 %v2231_v9, %v2223_v3 }
 0x7dc   :  { %3597 = vtanh.f32 %v2233_v59 }
 0x7e6   :  { %v3598_v21 = vpop.eup %3597 }
 0x7e7   :  { %2236 = vrot.lane.b32.xlu1 %v3598_v21, %s3647_s29 }
 0x859   :  { %v2237_v61 = vpop.permute.xlu1 %2236 }
 0x85a   :  { %v4308_v62 = vmul.f32 %v2237_v61, %v2222_v39 }
 0x85c   :  { %2252 = vperm.xlu1 %3515, %v4308_v62   ;;  %2247 = vperm.xlu0 %3514, %v4308_v62  }
 0x860   :  { %3516 = vset.pattern.permute.xlu1 %v3648_v47  ;;  %3517 = vset.pattern.permute.xlu0 %v3649_v34 }
 0x861   :  { %2257 = vperm.xlu1 %3516, %v4308_v62   ;;  %2262 = vperm.xlu0 %3517, %v4308_v62  }
 0x865   :  { %3518 = vset.pattern.permute.xlu1 %v3650_v37  ;;  %3520 = vset.pattern.permute.xlu0 %v3651_v38 }
 0x866   :  { %2267 = vperm.xlu1 %3518, %v4308_v62   ;;  %2277 = vperm.xlu0 %3520, %v4308_v62  }
 0x86a   :  { %3519 = vset.pattern.permute.xlu1 %v3652_v63  ;;  %3522 = vset.pattern.permute.xlu0 %v3646_v13 }
 0x86b   :  { %2272 = vperm.xlu1 %3519, %v4308_v62  }
 0x86f   :  { %3521 = vset.pattern.permute.xlu1 %v3653_v22 }
 0x870   :  { %2282 = vperm.xlu1 %3521, %v4308_v62  }
 0x874   :  { %3523 = vset.pattern.permute.xlu1 %v3645_v11 }
 0x8db   :  { %v2253_v2 = vpop.permute.xlu1 %2252  ;;  %v2248_v4 = vpop.permute.xlu0 %2247 }
 0x8dc   :  { %v2255_v40 = vmul.f32 %v2253_v2, %v4202_v49  ;;  %v2250_v42 = vmul.f32 %v2248_v4, %v4207_v14 }
 0x8de   :  { %v2286_v5 = vadd.f32 %v2250_v42, %v2245_v0 }
 0x8e0   :  { %v2258_v8 = vpop.permute.xlu1 %2257  ;;  %v2263_v15 = vpop.permute.xlu0 %2262 }
 0x8e1   :  { %v2260_v30 = vmul.f32 %v2258_v8, %v4204_v58  ;;  %v2265_v48 = vmul.f32 %v2263_v15, %v4189_v41 }
 0x8e3   :  { %v2287_v44 = vadd.f32 %v2260_v30, %v2255_v40 }
 0x8e5   :  { %v2268_v18 = vpop.permute.xlu1 %2267  ;;  %v2278_v31 = vpop.permute.xlu0 %2277  ;;  %v2290_v19 = vadd.f32 %v2287_v44, %v2286_v5 }
 0x8e6   :  { %v2270_v16 = vmul.f32 %v2268_v18, %v4192_v53  ;;  %v2280_v57 = vmul.f32 %v2278_v31, %v4198_v26  ;;  %v2319_v31 = vld [vmem:[#allocation2 + $0x20] sm:$0xff] }
 0x8e8   :  { %v2288_v7 = vadd.f32 %v2270_v16, %v2265_v48 }
 0x8ea   :  { %v2273_v17 = vpop.permute.xlu1 %2272 }
 0x8eb   :  { %v2275_v60 = vmul.f32 %v2273_v17, %v4194_v54 }
 0x8ed   :  { %v2289_v12 = vadd.f32 %v2280_v57, %v2275_v60 }
 0x8ef   :  { %v2291_v32 = vadd.f32 %v2289_v12, %v2288_v7  ;;  %v2283_v24 = vpop.permute.xlu1 %2282 }
 0x8f0   :  { %v2285_v23 = vmul.f32 %v2283_v24, %v4221_v56 }
 0x8f1   :  { %v2292_v33 = vadd.f32 %v2291_v32, %v2290_v19 }
 0x8f3   :  { %v2293_v25 = vadd.f32 %v2292_v33, %v2285_v23 }
 0x8f5   :  { %3599 = vtanh.f32 %v2293_v25 }
 0x8ff   :  { %v3600_v43 = vpop.eup %3599 }
 0x900   :  { %2299 = vrot.lane.b32.xlu1 %v3600_v43, %s3644_s3  ;;  %v2295_v50 = vadd.f32 1.0, %v3600_v43 }
 0x902   :  { %v2296_v51 = vmul.f32 0.5, %v2295_v50 }
 0x904   :  { %v2297_v6 = vmul.f32 %v2296_v51, %v2233_v59 }
 0x972   :  { %v2300_v52 = vpop.permute.xlu1 %2299 }
 0x973   :  { %v2302_v55 = vmul.f32 %v2300_v52, %v2296_v51 }
 0x975   :  { %2304 = vrot.lane.b32.xlu0 %v2302_v55, %s3643_s27 }
 0x9e7   :  { %v2305_v20 = vpop.permute.xlu0 %2304 }
 0x9e8   :  { %v2307_v27 = vadd.f32 %v2305_v20, %v2297_v6 }
 0x9ea   :  { %3601 = vtanh.f32 %v2307_v27 }
 0x9f4   :  { %v3602_v28 = vpop.eup %3601 }
 0x9f5   :  { %2310 = vrot.lane.b32.xlu1 %v3602_v28, %s3647_s29 }
 0xa67   :  { %v2311_v29 = vpop.permute.xlu1 %2310 }
 0xa68   :  { %v4337_v35 = vmul.f32 %v2311_v29, %v2296_v51 }
 0xa6a   :  { %2326 = vperm.xlu1 %3523, %v4337_v35   ;;  %2321 = vperm.xlu0 %3522, %v4337_v35  }
 0xa6e   :  { %3524 = vset.pattern.permute.xlu1 %v3648_v47  ;;  %3525 = vset.pattern.permute.xlu0 %v3649_v34 }
 0xa6f   :  { %2331 = vperm.xlu1 %3524, %v4337_v35   ;;  %2336 = vperm.xlu0 %3525, %v4337_v35  }
 0xa73   :  { %3526 = vset.pattern.permute.xlu1 %v3650_v37  ;;  %3528 = vset.pattern.permute.xlu0 %v3651_v38 }
 0xa74   :  { %2341 = vperm.xlu1 %3526, %v4337_v35   ;;  %2351 = vperm.xlu0 %3528, %v4337_v35  }
 0xa78   :  { %3527 = vset.pattern.permute.xlu1 %v3652_v63  ;;  %3530 = vset.pattern.permute.xlu0 %v3646_v13 }
 0xa79   :  { %2346 = vperm.xlu1 %3527, %v4337_v35  }
 0xa7d   :  { %3529 = vset.pattern.permute.xlu1 %v3653_v22 }
 0xa7e   :  { %2356 = vperm.xlu1 %3529, %v4337_v35  }
 0xa82   :  { %3531 = vset.pattern.permute.xlu1 %v3645_v11 }
 0xae9   :  { %v2327_v36 = vpop.permute.xlu1 %2326  ;;  %v2322_v39 = vpop.permute.xlu0 %2321 }
 0xaea   :  { %v2329_v21 = vmul.f32 %v2327_v36, %v4202_v49  ;;  %v2324_v61 = vmul.f32 %v2322_v39, %v4207_v14 }
 0xaec   :  { %v2360_v40 = vadd.f32 %v2324_v61, %v2319_v31 }
 0xaee   :  { %v2332_v1 = vpop.permute.xlu1 %2331  ;;  %v2337_v45 = vpop.permute.xlu0 %2336 }
 0xaef   :  { %v2334_v9 = vmul.f32 %v2332_v1, %v4204_v58  ;;  %v2339_v15 = vmul.f32 %v2337_v45, %v4189_v41 }
 0xaf1   :  { %v2361_v8 = vadd.f32 %v2334_v9, %v2329_v21  ;;  %v2393_v21 = vld [vmem:[#allocation2 + $0x28] sm:$0xff] }
 0xaf3   :  { %v2342_v3 = vpop.permute.xlu1 %2341  ;;  %v2352_v59 = vpop.permute.xlu0 %2351  ;;  %v2364_v17 = vadd.f32 %v2361_v8, %v2360_v40 }
 0xaf4   :  { %v2344_v2 = vmul.f32 %v2342_v3, %v4192_v53  ;;  %v2354_v18 = vmul.f32 %v2352_v59, %v4198_v26 }
 0xaf6   :  { %v2362_v42 = vadd.f32 %v2344_v2, %v2339_v15 }
 0xaf8   :  { %v2347_v4 = vpop.permute.xlu1 %2346 }
 0xaf9   :  { %v2349_v30 = vmul.f32 %v2347_v4, %v4194_v54 }
 0xafb   :  { %v2363_v16 = vadd.f32 %v2354_v18, %v2349_v30 }
 0xafd   :  { %v2365_v44 = vadd.f32 %v2363_v16, %v2362_v42  ;;  %v2357_v48 = vpop.permute.xlu1 %2356 }
 0xafe   :  { %v2359_v57 = vmul.f32 %v2357_v48, %v4221_v56 }
 0xaff   :  { %v2366_v60 = vadd.f32 %v2365_v44, %v2364_v17 }
 0xb01   :  { %v2367_v0 = vadd.f32 %v2366_v60, %v2359_v57 }
 0xb03   :  { %3603 = vtanh.f32 %v2367_v0 }
 0xb0d   :  { %v3604_v5 = vpop.eup %3603 }
 0xb0e   :  { %2373 = vrot.lane.b32.xlu1 %v3604_v5, %s3644_s3  ;;  %v2369_v7 = vadd.f32 1.0, %v3604_v5 }
 0xb10   :  { %v2370_v12 = vmul.f32 0.5, %v2369_v7 }
 0xb12   :  { %v2371_v24 = vmul.f32 %v2370_v12, %v2307_v27 }
 0xb80   :  { %v2374_v19 = vpop.permute.xlu1 %2373 }
 0xb81   :  { %v2376_v32 = vmul.f32 %v2374_v19, %v2370_v12 }
 0xb83   :  { %2378 = vrot.lane.b32.xlu0 %v2376_v32, %s3643_s27 }
 0xbf5   :  { %v2379_v23 = vpop.permute.xlu0 %2378 }
 0xbf6   :  { %v2381_v33 = vadd.f32 %v2379_v23, %v2371_v24 }
 0xbf8   :  { %3605 = vtanh.f32 %v2381_v33 }
 0xc02   :  { %v3606_v25 = vpop.eup %3605 }
 0xc03   :  { %2384 = vrot.lane.b32.xlu1 %v3606_v25, %s3647_s29 }
 0xc75   :  { %v2385_v43 = vpop.permute.xlu1 %2384 }
 0xc76   :  { %v4366_v50 = vmul.f32 %v2385_v43, %v2370_v12 }
 0xc78   :  { %2400 = vperm.xlu1 %3531, %v4366_v50   ;;  %2395 = vperm.xlu0 %3530, %v4366_v50  }
 0xc7c   :  { %3532 = vset.pattern.permute.xlu1 %v3648_v47  ;;  %3533 = vset.pattern.permute.xlu0 %v3649_v34 }
 0xc7d   :  { %2405 = vperm.xlu1 %3532, %v4366_v50   ;;  %2410 = vperm.xlu0 %3533, %v4366_v50  }
 0xc81   :  { %3534 = vset.pattern.permute.xlu1 %v3650_v37  ;;  %3536 = vset.pattern.permute.xlu0 %v3651_v38 }
 0xc82   :  { %2415 = vperm.xlu1 %3534, %v4366_v50   ;;  %2425 = vperm.xlu0 %3536, %v4366_v50  }
 0xc86   :  { %3535 = vset.pattern.permute.xlu1 %v3652_v63  ;;  %3538 = vset.pattern.permute.xlu0 %v3646_v13 }
 0xc87   :  { %2420 = vperm.xlu1 %3535, %v4366_v50  }
 0xc8b   :  { %3537 = vset.pattern.permute.xlu1 %v3653_v22 }
 0xc8c   :  { %2430 = vperm.xlu1 %3537, %v4366_v50  }
 0xc90   :  { %3539 = vset.pattern.permute.xlu1 %v3645_v11 }
 0xcf7   :  { %v2401_v51 = vpop.permute.xlu1 %2400  ;;  %v2396_v52 = vpop.permute.xlu0 %2395 }
 0xcf8   :  { %v2403_v29 = vmul.f32 %v2401_v51, %v4202_v49  ;;  %v2398_v36 = vmul.f32 %v2396_v52, %v4207_v14 }
 0xcfa   :  { %v2434_v61 = vadd.f32 %v2398_v36, %v2393_v21  ;;  %v2467_v36 = vld [vmem:[#allocation2 + $0x30] sm:$0xff] }
 0xcfc   :  { %v2406_v55 = vpop.permute.xlu1 %2405  ;;  %v2411_v6 = vpop.permute.xlu0 %2410 }
 0xcfd   :  { %v2408_v27 = vmul.f32 %v2406_v55, %v4204_v58  ;;  %v2413_v3 = vmul.f32 %v2411_v6, %v4189_v41 }
 0xcff   :  { %v2435_v45 = vadd.f32 %v2408_v27, %v2403_v29 }
 0xd01   :  { %v2416_v20 = vpop.permute.xlu1 %2415  ;;  %v2426_v28 = vpop.permute.xlu0 %2425  ;;  %v2438_v8 = vadd.f32 %v2435_v45, %v2434_v61 }
 0xd02   :  { %v2418_v39 = vmul.f32 %v2416_v20, %v4192_v53  ;;  %v2428_v9 = vmul.f32 %v2426_v28, %v4198_v26 }
 0xd04   :  { %v2436_v2 = vadd.f32 %v2418_v39, %v2413_v3 }
 0xd06   :  { %v2421_v1 = vpop.permute.xlu1 %2420 }
 0xd07   :  { %v2423_v59 = vmul.f32 %v2421_v1, %v4194_v54 }
 0xd09   :  { %v2437_v4 = vadd.f32 %v2428_v9, %v2423_v59 }
 0xd0b   :  { %v2439_v15 = vadd.f32 %v2437_v4, %v2436_v2  ;;  %v2431_v18 = vpop.permute.xlu1 %2430 }
 0xd0c   :  { %v2433_v30 = vmul.f32 %v2431_v18, %v4221_v56 }
 0xd0d   :  { %v2440_v31 = vadd.f32 %v2439_v15, %v2438_v8 }
 0xd0f   :  { %v2441_v40 = vadd.f32 %v2440_v31, %v2433_v30 }
 0xd11   :  { %3607 = vtanh.f32 %v2441_v40 }
 0xd1b   :  { %v3608_v42 = vpop.eup %3607 }
 0xd1c   :  { %2447 = vrot.lane.b32.xlu1 %v3608_v42, %s3644_s3  ;;  %v2443_v16 = vadd.f32 1.0, %v3608_v42 }
 0xd1e   :  { %v2444_v17 = vmul.f32 0.5, %v2443_v16 }
 0xd20   :  { %v2445_v57 = vmul.f32 %v2444_v17, %v2381_v33 }
 0xd8e   :  { %v2448_v44 = vpop.permute.xlu1 %2447 }
 0xd8f   :  { %v2450_v48 = vmul.f32 %v2448_v44, %v2444_v17 }
 0xd91   :  { %2452 = vrot.lane.b32.xlu0 %v2450_v48, %s3643_s27 }
 0xe03   :  { %v2453_v60 = vpop.permute.xlu0 %2452 }
 0xe04   :  { %v2455_v0 = vadd.f32 %v2453_v60, %v2445_v57 }
 0xe06   :  { %3609 = vtanh.f32 %v2455_v0 }
 0xe10   :  { %v3610_v5 = vpop.eup %3609 }
 0xe11   :  { %2458 = vrot.lane.b32.xlu1 %v3610_v5, %s3647_s29 }
 0xe83   :  { %v2459_v7 = vpop.permute.xlu1 %2458 }
 0xe84   :  { %v4395_v12 = vmul.f32 %v2459_v7, %v2444_v17 }
 0xe86   :  { %2474 = vperm.xlu1 %3539, %v4395_v12   ;;  %2469 = vperm.xlu0 %3538, %v4395_v12  }
 0xe8a   :  { %3540 = vset.pattern.permute.xlu1 %v3648_v47  ;;  %3541 = vset.pattern.permute.xlu0 %v3649_v34 }
 0xe8b   :  { %2479 = vperm.xlu1 %3540, %v4395_v12   ;;  %2484 = vperm.xlu0 %3541, %v4395_v12  }
 0xe8f   :  { %3542 = vset.pattern.permute.xlu1 %v3650_v37  ;;  %3544 = vset.pattern.permute.xlu0 %v3651_v38 }
 0xe90   :  { %2489 = vperm.xlu1 %3542, %v4395_v12   ;;  %2499 = vperm.xlu0 %3544, %v4395_v12  }
 0xe94   :  { %3543 = vset.pattern.permute.xlu1 %v3652_v63  ;;  %3546 = vset.pattern.permute.xlu0 %v3646_v13 }
 0xe95   :  { %2494 = vperm.xlu1 %3543, %v4395_v12  }
 0xe99   :  { %3545 = vset.pattern.permute.xlu1 %v3653_v22 }
 0xe9a   :  { %2504 = vperm.xlu1 %3545, %v4395_v12  }
 0xe9e   :  { %3547 = vset.pattern.permute.xlu1 %v3645_v11 }
 0xf05   :  { %v2475_v19 = vpop.permute.xlu1 %2474  ;;  %v2470_v32 = vpop.permute.xlu0 %2469 }
 0xf06   :  { %v2477_v51 = vmul.f32 %v2475_v19, %v4202_v49  ;;  %v2472_v52 = vmul.f32 %v2470_v32, %v4207_v14 }
 0xf08   :  { %v2508_v39 = vadd.f32 %v2472_v52, %v2467_v36 }
 0xf0a   :  { %v2480_v24 = vpop.permute.xlu1 %2479  ;;  %v2485_v23 = vpop.permute.xlu0 %2484 }
 0xf0b   :  { %v2482_v25 = vmul.f32 %v2480_v24, %v4204_v58  ;;  %v2487_v27 = vmul.f32 %v2485_v23, %v4189_v41 }
 0xf0d   :  { %v2509_v20 = vadd.f32 %v2482_v25, %v2477_v51 }
 0xf0f   :  { %v2490_v33 = vpop.permute.xlu1 %2489  ;;  %v2500_v43 = vpop.permute.xlu0 %2499  ;;  %v2512_v3 = vadd.f32 %v2509_v20, %v2508_v39 }
 0xf10   :  { %v2492_v55 = vmul.f32 %v2490_v33, %v4192_v53  ;;  %v2502_v28 = vmul.f32 %v2500_v43, %v4198_v26 }
 0xf12   :  { %v2510_v1 = vadd.f32 %v2492_v55, %v2487_v27  ;;  %v2541_v55 = vld [vmem:[#allocation2 + $0x38] sm:$0xff] }
 0xf14   :  { %v2495_v6 = vpop.permute.xlu1 %2494 }
 0xf15   :  { %v2497_v29 = vmul.f32 %v2495_v6, %v4194_v54 }
 0xf17   :  { %v2511_v45 = vadd.f32 %v2502_v28, %v2497_v29 }
 0xf19   :  { %v2513_v9 = vadd.f32 %v2511_v45, %v2510_v1  ;;  %v2505_v59 = vpop.permute.xlu1 %2504 }
 0xf1a   :  { %v2507_v21 = vmul.f32 %v2505_v59, %v4221_v56 }
 0xf1b   :  { %v2514_v61 = vadd.f32 %v2513_v9, %v2512_v3 }
 0xf1d   :  { %v2515_v2 = vadd.f32 %v2514_v61, %v2507_v21 }
 0xf1f   :  { %3611 = vtanh.f32 %v2515_v2 }
 0xf29   :  { %v3612_v4 = vpop.eup %3611 }
 0xf2a   :  { %2521 = vrot.lane.b32.xlu1 %v3612_v4, %s3644_s3  ;;  %v2517_v8 = vadd.f32 1.0, %v3612_v4 }
 0xf2c   :  { %v2518_v15 = vmul.f32 0.5, %v2517_v8 }
 0xf2e   :  { %v2519_v31 = vmul.f32 %v2518_v15, %v2455_v0 }
 0xf9c   :  { %v2522_v18 = vpop.permute.xlu1 %2521 }
 0xf9d   :  { %v2524_v30 = vmul.f32 %v2522_v18, %v2518_v15 }
 0xf9f   :  { %2526 = vrot.lane.b32.xlu0 %v2524_v30, %s3643_s27 }
0x1011   :  { %v2527_v40 = vpop.permute.xlu0 %2526 }
0x1012   :  { %v2529_v42 = vadd.f32 %v2527_v40, %v2519_v31 }
0x1014   :  { %3613 = vtanh.f32 %v2529_v42 }
0x101e   :  { %v3614_v16 = vpop.eup %3613 }
0x101f   :  { %2532 = vrot.lane.b32.xlu1 %v3614_v16, %s3647_s29 }
0x1091   :  { %v2533_v17 = vpop.permute.xlu1 %2532 }
0x1092   :  { %v4424_v44 = vmul.f32 %v2533_v17, %v2518_v15 }
0x1094   :  { %2548 = vperm.xlu1 %3547, %v4424_v44   ;;  %2543 = vperm.xlu0 %3546, %v4424_v44  }
0x1098   :  { %3548 = vset.pattern.permute.xlu1 %v3648_v47  ;;  %3549 = vset.pattern.permute.xlu0 %v3649_v34 }
0x1099   :  { %2553 = vperm.xlu1 %3548, %v4424_v44   ;;  %2558 = vperm.xlu0 %3549, %v4424_v44  }
0x109d   :  { %3550 = vset.pattern.permute.xlu1 %v3650_v37  ;;  %3552 = vset.pattern.permute.xlu0 %v3651_v38 }
0x109e   :  { %2563 = vperm.xlu1 %3550, %v4424_v44   ;;  %2573 = vperm.xlu0 %3552, %v4424_v44  }
0x10a2   :  { %3551 = vset.pattern.permute.xlu1 %v3652_v63  ;;  %3554 = vset.pattern.permute.xlu0 %v3646_v13 }
0x10a3   :  { %2568 = vperm.xlu1 %3551, %v4424_v44  }
0x10a7   :  { %3553 = vset.pattern.permute.xlu1 %v3653_v22 }
0x10a8   :  { %2578 = vperm.xlu1 %3553, %v4424_v44  }
0x10ac   :  { %3555 = vset.pattern.permute.xlu1 %v3645_v11 }
0x1113   :  { %v2549_v48 = vpop.permute.xlu1 %2548  ;;  %v2544_v57 = vpop.permute.xlu0 %2543 }
0x1114   :  { %v2551_v32 = vmul.f32 %v2549_v48, %v4202_v49  ;;  %v2546_v24 = vmul.f32 %v2544_v57, %v4207_v14 }
0x1116   :  { %v2582_v6 = vadd.f32 %v2546_v24, %v2541_v55 }
0x1118   :  { %v2554_v60 = vpop.permute.xlu1 %2553  ;;  %v2559_v0 = vpop.permute.xlu0 %2558 }
0x1119   :  { %v2556_v7 = vmul.f32 %v2554_v60, %v4204_v58  ;;  %v2561_v43 = vmul.f32 %v2559_v0, %v4189_v41 }
0x111b   :  { %v2583_v25 = vadd.f32 %v2556_v7, %v2551_v32 }
0x111d   :  { %v2564_v5 = vpop.permute.xlu1 %2563  ;;  %v2574_v19 = vpop.permute.xlu0 %2573  ;;  %v2586_v28 = vadd.f32 %v2583_v25, %v2582_v6 }
0x111e   :  { %v2566_v23 = vmul.f32 %v2564_v5, %v4192_v53  ;;  %v2576_v51 = vmul.f32 %v2574_v19, %v4198_v26 }
0x1120   :  { %v2584_v20 = vadd.f32 %v2566_v23, %v2561_v43 }
0x1122   :  { %v2569_v33 = vpop.permute.xlu1 %2568 }
0x1123   :  { %v2571_v52 = vmul.f32 %v2569_v33, %v4194_v54  ;;  %v2615_v33 = vld [vmem:[#allocation2 + $0x40] sm:$0xff] }
0x1125   :  { %v2585_v27 = vadd.f32 %v2576_v51, %v2571_v52 }
0x1127   :  { %v2587_v29 = vadd.f32 %v2585_v27, %v2584_v20  ;;  %v2579_v36 = vpop.permute.xlu1 %2578 }
0x1128   :  { %v2581_v39 = vmul.f32 %v2579_v36, %v4221_v56 }
0x1129   :  { %v2588_v1 = vadd.f32 %v2587_v29, %v2586_v28 }
0x112b   :  { %v2589_v45 = vadd.f32 %v2588_v1, %v2581_v39 }
0x112d   :  { %3615 = vtanh.f32 %v2589_v45 }
0x1137   :  { %v3616_v3 = vpop.eup %3615 }
0x1138   :  { %2595 = vrot.lane.b32.xlu1 %v3616_v3, %s3644_s3  ;;  %v2591_v9 = vadd.f32 1.0, %v3616_v3 }
0x113a   :  { %v2592_v59 = vmul.f32 0.5, %v2591_v9 }
0x113c   :  { %v2593_v2 = vmul.f32 %v2592_v59, %v2529_v42 }
0x11aa   :  { %v2596_v21 = vpop.permute.xlu1 %2595 }
0x11ab   :  { %v2598_v61 = vmul.f32 %v2596_v21, %v2592_v59 }
0x11ad   :  { %2600 = vrot.lane.b32.xlu0 %v2598_v61, %s3643_s27 }
0x121f   :  { %v2601_v4 = vpop.permute.xlu0 %2600 }
0x1220   :  { %v2603_v8 = vadd.f32 %v2601_v4, %v2593_v2 }
0x1222   :  { %3617 = vtanh.f32 %v2603_v8 }
0x122c   :  { %v3618_v15 = vpop.eup %3617 }
0x122d   :  { %2606 = vrot.lane.b32.xlu1 %v3618_v15, %s3647_s29 }
0x129f   :  { %v2607_v18 = vpop.permute.xlu1 %2606 }
0x12a0   :  { %v4453_v30 = vmul.f32 %v2607_v18, %v2592_v59 }
0x12a2   :  { %2622 = vperm.xlu1 %3555, %v4453_v30   ;;  %2617 = vperm.xlu0 %3554, %v4453_v30  }
0x12a6   :  { %3556 = vset.pattern.permute.xlu1 %v3648_v47  ;;  %3557 = vset.pattern.permute.xlu0 %v3649_v34 }
0x12a7   :  { %2627 = vperm.xlu1 %3556, %v4453_v30   ;;  %2632 = vperm.xlu0 %3557, %v4453_v30  }
0x12ab   :  { %3558 = vset.pattern.permute.xlu1 %v3650_v37  ;;  %3560 = vset.pattern.permute.xlu0 %v3651_v38 }
0x12ac   :  { %2637 = vperm.xlu1 %3558, %v4453_v30   ;;  %2647 = vperm.xlu0 %3560, %v4453_v30  }
0x12b0   :  { %3559 = vset.pattern.permute.xlu1 %v3652_v63  ;;  %3562 = vset.pattern.permute.xlu0 %v3646_v13 }
0x12b1   :  { %2642 = vperm.xlu1 %3559, %v4453_v30  }
0x12b5   :  { %3561 = vset.pattern.permute.xlu1 %v3653_v22 }
0x12b6   :  { %2652 = vperm.xlu1 %3561, %v4453_v30  }
0x12ba   :  { %3563 = vset.pattern.permute.xlu1 %v3645_v11 }
0x1321   :  { %v2623_v31 = vpop.permute.xlu1 %2622  ;;  %v2618_v40 = vpop.permute.xlu0 %2617 }
0x1322   :  { %v2625_v60 = vmul.f32 %v2623_v31, %v4202_v49  ;;  %v2620_v0 = vmul.f32 %v2618_v40, %v4207_v14 }
0x1324   :  { %v2656_v25 = vadd.f32 %v2620_v0, %v2615_v33 }
0x1326   :  { %v2628_v42 = vpop.permute.xlu1 %2627  ;;  %v2633_v16 = vpop.permute.xlu0 %2632 }
0x1327   :  { %v2630_v48 = vmul.f32 %v2628_v42, %v4204_v58  ;;  %v2635_v32 = vmul.f32 %v2633_v16, %v4189_v41 }
0x1329   :  { %v2657_v19 = vadd.f32 %v2630_v48, %v2625_v60 }
0x132b   :  { %v2638_v17 = vpop.permute.xlu1 %2637  ;;  %v2648_v57 = vpop.permute.xlu0 %2647  ;;  %v2660_v52 = vadd.f32 %v2657_v19, %v2656_v25  ;;  %v2689_v19 = vld [vmem:[#allocation2 + $0x48] sm:$0xff] }
0x132c   :  { %v2640_v5 = vmul.f32 %v2638_v17, %v4192_v53  ;;  %v2650_v24 = vmul.f32 %v2648_v57, %v4198_v26 }
0x132e   :  { %v2658_v43 = vadd.f32 %v2640_v5, %v2635_v32 }
0x1330   :  { %v2643_v7 = vpop.permute.xlu1 %2642 }
0x1331   :  { %v2645_v23 = vmul.f32 %v2643_v7, %v4194_v54 }
0x1333   :  { %v2659_v51 = vadd.f32 %v2650_v24, %v2645_v23 }
0x1335   :  { %v2661_v55 = vadd.f32 %v2659_v51, %v2658_v43  ;;  %v2653_v6 = vpop.permute.xlu1 %2652 }
0x1336   :  { %v2655_v20 = vmul.f32 %v2653_v6, %v4221_v56 }
0x1337   :  { %v2662_v27 = vadd.f32 %v2661_v55, %v2660_v52 }
0x1339   :  { %v2663_v28 = vadd.f32 %v2662_v27, %v2655_v20 }
0x133b   :  { %3619 = vtanh.f32 %v2663_v28 }
0x1345   :  { %v3620_v29 = vpop.eup %3619 }
0x1346   :  { %2669 = vrot.lane.b32.xlu1 %v3620_v29, %s3644_s3  ;;  %v2665_v36 = vadd.f32 1.0, %v3620_v29 }
0x1348   :  { %v2666_v39 = vmul.f32 0.5, %v2665_v36 }
0x134a   :  { %v2667_v3 = vmul.f32 %v2666_v39, %v2603_v8 }
0x13b8   :  { %v2670_v1 = vpop.permute.xlu1 %2669 }
0x13b9   :  { %v2672_v45 = vmul.f32 %v2670_v1, %v2666_v39 }
0x13bb   :  { %2674 = vrot.lane.b32.xlu0 %v2672_v45, %s3643_s27 }
0x142d   :  { %v2675_v9 = vpop.permute.xlu0 %2674 }
0x142e   :  { %v2677_v59 = vadd.f32 %v2675_v9, %v2667_v3 }
0x1430   :  { %3621 = vtanh.f32 %v2677_v59 }
0x143a   :  { %v3622_v21 = vpop.eup %3621 }
0x143b   :  { %2680 = vrot.lane.b32.xlu1 %v3622_v21, %s3647_s29 }
0x14ad   :  { %v2681_v61 = vpop.permute.xlu1 %2680 }
0x14ae   :  { %v4482_v2 = vmul.f32 %v2681_v61, %v2666_v39 }
0x14b0   :  { %2696 = vperm.xlu1 %3563, %v4482_v2   ;;  %2691 = vperm.xlu0 %3562, %v4482_v2  }
0x14b4   :  { %3564 = vset.pattern.permute.xlu1 %v3648_v47  ;;  %3565 = vset.pattern.permute.xlu0 %v3649_v34 }
0x14b5   :  { %2701 = vperm.xlu1 %3564, %v4482_v2   ;;  %2706 = vperm.xlu0 %3565, %v4482_v2  }
0x14b9   :  { %3566 = vset.pattern.permute.xlu1 %v3650_v37  ;;  %3568 = vset.pattern.permute.xlu0 %v3651_v38 }
0x14ba   :  { %2711 = vperm.xlu1 %3566, %v4482_v2   ;;  %2721 = vperm.xlu0 %3568, %v4482_v2  }
0x14be   :  { %3567 = vset.pattern.permute.xlu1 %v3652_v63  ;;  %3570 = vset.pattern.permute.xlu0 %v3646_v13 }
0x14bf   :  { %2716 = vperm.xlu1 %3567, %v4482_v2  }
0x14c3   :  { %3569 = vset.pattern.permute.xlu1 %v3653_v22 }
0x14c4   :  { %2726 = vperm.xlu1 %3569, %v4482_v2  }
0x14c8   :  { %3571 = vset.pattern.permute.xlu1 %v3645_v11 }
0x152f   :  { %v2697_v4 = vpop.permute.xlu1 %2696  ;;  %v2692_v8 = vpop.permute.xlu0 %2691 }
0x1530   :  { %v2699_v16 = vmul.f32 %v2697_v4, %v4202_v49  ;;  %v2694_v17 = vmul.f32 %v2692_v8, %v4207_v14 }
0x1532   :  { %v2730_v32 = vadd.f32 %v2694_v17, %v2689_v19 }
0x1534   :  { %v2702_v15 = vpop.permute.xlu1 %2701  ;;  %v2707_v18 = vpop.permute.xlu0 %2706 }
0x1535   :  { %v2704_v40 = vmul.f32 %v2702_v15, %v4204_v58  ;;  %v2709_v0 = vmul.f32 %v2707_v18, %v4189_v41 }
0x1537   :  { %v2731_v60 = vadd.f32 %v2704_v40, %v2699_v16 }
0x1539   :  { %v2712_v31 = vpop.permute.xlu1 %2711  ;;  %v2722_v42 = vpop.permute.xlu0 %2721  ;;  %v2734_v33 = vadd.f32 %v2731_v60, %v2730_v32 }
0x153a   :  { %v2714_v48 = vmul.f32 %v2712_v31, %v4192_v53  ;;  %v2724_v5 = vmul.f32 %v2722_v42, %v4198_v26 }
0x153c   :  { %v2732_v24 = vadd.f32 %v2714_v48, %v2709_v0 }
0x153e   :  { %v2717_v57 = vpop.permute.xlu1 %2716 }
0x153f   :  { %v2719_v7 = vmul.f32 %v2717_v57, %v4194_v54  ;;  %v2763_v57 = vld [vmem:[#allocation2 + $0x50] sm:$0xff] }
0x1541   :  { %v2733_v23 = vadd.f32 %v2724_v5, %v2719_v7 }
0x1543   :  { %v2735_v25 = vadd.f32 %v2733_v23, %v2732_v24  ;;  %v2727_v43 = vpop.permute.xlu1 %2726 }
0x1544   :  { %v2729_v51 = vmul.f32 %v2727_v43, %v4221_v56 }
0x1545   :  { %v2736_v52 = vadd.f32 %v2735_v25, %v2734_v33 }
0x1547   :  { %v2737_v55 = vadd.f32 %v2736_v52, %v2729_v51 }
0x1549   :  { %3623 = vtanh.f32 %v2737_v55 }
0x1553   :  { %v3624_v6 = vpop.eup %3623 }
0x1554   :  { %2743 = vrot.lane.b32.xlu1 %v3624_v6, %s3644_s3  ;;  %v2739_v20 = vadd.f32 1.0, %v3624_v6 }
0x1556   :  { %v2740_v27 = vmul.f32 0.5, %v2739_v20 }
0x1558   :  { %v2741_v36 = vmul.f32 %v2740_v27, %v2677_v59 }
0x15c6   :  { %v2744_v28 = vpop.permute.xlu1 %2743 }
0x15c7   :  { %v2746_v29 = vmul.f32 %v2744_v28, %v2740_v27 }
0x15c9   :  { %2748 = vrot.lane.b32.xlu0 %v2746_v29, %s3643_s27 }
0x163b   :  { %v2749_v39 = vpop.permute.xlu0 %2748 }
0x163c   :  { %v2751_v1 = vadd.f32 %v2749_v39, %v2741_v36 }
0x163e   :  { %3625 = vtanh.f32 %v2751_v1 }
0x1648   :  { %v3626_v45 = vpop.eup %3625 }
0x1649   :  { %2754 = vrot.lane.b32.xlu1 %v3626_v45, %s3647_s29 }
0x16bb   :  { %v2755_v3 = vpop.permute.xlu1 %2754 }
0x16bc   :  { %v4511_v9 = vmul.f32 %v2755_v3, %v2740_v27 }
0x16be   :  { %2770 = vperm.xlu1 %3571, %v4511_v9   ;;  %2765 = vperm.xlu0 %3570, %v4511_v9  }
0x16c2   :  { %3572 = vset.pattern.permute.xlu1 %v3648_v47  ;;  %3573 = vset.pattern.permute.xlu0 %v3649_v34 }
0x16c3   :  { %2775 = vperm.xlu1 %3572, %v4511_v9   ;;  %2780 = vperm.xlu0 %3573, %v4511_v9  }
0x16c7   :  { %3574 = vset.pattern.permute.xlu1 %v3650_v37  ;;  %3576 = vset.pattern.permute.xlu0 %v3651_v38 }
0x16c8   :  { %2785 = vperm.xlu1 %3574, %v4511_v9   ;;  %2795 = vperm.xlu0 %3576, %v4511_v9  }
0x16cc   :  { %3575 = vset.pattern.permute.xlu1 %v3652_v63  ;;  %3578 = vset.pattern.permute.xlu0 %v3646_v13 }
0x16cd   :  { %2790 = vperm.xlu1 %3575, %v4511_v9  }
0x16d1   :  { %3577 = vset.pattern.permute.xlu1 %v3653_v22 }
0x16d2   :  { %2800 = vperm.xlu1 %3577, %v4511_v9  }
0x16d6   :  { %3579 = vset.pattern.permute.xlu1 %v3645_v11 }
0x173d   :  { %v2771_v59 = vpop.permute.xlu1 %2770  ;;  %v2766_v21 = vpop.permute.xlu0 %2765 }
0x173e   :  { %v2773_v31 = vmul.f32 %v2771_v59, %v4202_v49  ;;  %v2768_v13 = vmul.f32 %v2766_v21, %v4207_v14 }
0x1740   :  { %v2804_v60 = vadd.f32 %v2768_v13, %v2763_v57 }
0x1742   :  { %v2776_v61 = vpop.permute.xlu1 %2775  ;;  %v2781_v4 = vpop.permute.xlu0 %2780 }
0x1743   :  { %v2778_v15 = vmul.f32 %v2776_v61, %v4204_v58  ;;  %v2783_v17 = vmul.f32 %v2781_v4, %v4189_v41 }
0x1745   :  { %v2805_v16 = vadd.f32 %v2778_v15, %v2773_v31  ;;  %v2837_v15 = vld [vmem:[#allocation2 + $0x58] sm:$0xff] }
0x1747   :  { %v2786_v8 = vpop.permute.xlu1 %2785  ;;  %v2796_v18 = vpop.permute.xlu0 %2795  ;;  %v2808_v7 = vadd.f32 %v2805_v16, %v2804_v60 }
0x1748   :  { %v2788_v40 = vmul.f32 %v2786_v8, %v4192_v53  ;;  %v2798_v11 = vmul.f32 %v2796_v18, %v4198_v26 }
0x174a   :  { %v2806_v0 = vadd.f32 %v2788_v40, %v2783_v17 }
0x174c   :  { %v2791_v42 = vpop.permute.xlu1 %2790 }
0x174d   :  { %v2793_v48 = vmul.f32 %v2791_v42, %v4194_v54 }
0x174f   :  { %v2807_v5 = vadd.f32 %v2798_v11, %v2793_v48 }
0x1751   :  { %v2809_v19 = vadd.f32 %v2807_v5, %v2806_v0  ;;  %v2801_v32 = vpop.permute.xlu1 %2800 }
0x1752   :  { %v2803_v24 = vmul.f32 %v2801_v32, %v4221_v56 }
0x1753   :  { %v2810_v23 = vadd.f32 %v2809_v19, %v2808_v7 }
0x1755   :  { %v2811_v33 = vadd.f32 %v2810_v23, %v2803_v24 }
0x1757   :  { %3627 = vtanh.f32 %v2811_v33 }
0x1761   :  { %v3628_v25 = vpop.eup %3627 }
0x1762   :  { %2817 = vrot.lane.b32.xlu1 %v3628_v25, %s3644_s3  ;;  %v2813_v43 = vadd.f32 1.0, %v3628_v25 }
0x1764   :  { %v2814_v51 = vmul.f32 0.5, %v2813_v43 }
0x1766   :  { %v2815_v6 = vmul.f32 %v2814_v51, %v2751_v1 }
0x17d4   :  { %v2818_v52 = vpop.permute.xlu1 %2817 }
0x17d5   :  { %v2820_v55 = vmul.f32 %v2818_v52, %v2814_v51 }
0x17d7   :  { %2822 = vrot.lane.b32.xlu0 %v2820_v55, %s3643_s27 }
0x1849   :  { %v2823_v20 = vpop.permute.xlu0 %2822 }
0x184a   :  { %v2825_v27 = vadd.f32 %v2823_v20, %v2815_v6 }
0x184c   :  { %3629 = vtanh.f32 %v2825_v27 }
0x1856   :  { %v3630_v28 = vpop.eup %3629 }
0x1857   :  { %2828 = vrot.lane.b32.xlu1 %v3630_v28, %s3647_s29 }
0x18c9   :  { %v2829_v29 = vpop.permute.xlu1 %2828 }
0x18ca   :  { %v2831_v36 = vmul.f32 %v2829_v29, %v2814_v51 }
0x18cc   :  { %2844 = vperm.xlu1 %3579, %v2831_v36   ;;  %2839 = vperm.xlu0 %3578, %v2831_v36  }
0x18d0   :  { %3580 = vset.pattern.permute.xlu1 %v3648_v47  ;;  %3581 = vset.pattern.permute.xlu0 %v3649_v34 }
0x18d1   :  { %2849 = vperm.xlu1 %3580, %v2831_v36   ;;  %2854 = vperm.xlu0 %3581, %v2831_v36  }
0x18d5   :  { %3582 = vset.pattern.permute.xlu1 %v3650_v37  ;;  %3584 = vset.pattern.permute.xlu0 %v3651_v38 }
0x18d6   :  { %2859 = vperm.xlu1 %3582, %v2831_v36   ;;  %2869 = vperm.xlu0 %3584, %v2831_v36  }
0x18da   :  { %3583 = vset.pattern.permute.xlu1 %v3652_v63  ;;  %3586 = vset.pattern.permute.xlu0 %v3653_v22 }
0x18db   :  { %2864 = vperm.xlu1 %3583, %v2831_v36  }
0x18df   :  { %3585 = vset.pattern.permute.xlu1 %v3653_v22 }
0x18e0   :  { %2874 = vperm.xlu1 %3585, %v2831_v36  }
0x194b   :  { %v2845_v39 = vpop.permute.xlu1 %2844  ;;  %v2840_v47 = vpop.permute.xlu0 %2839 }
0x194c   :  { %v2847_v38 = vmul.f32 %v2845_v39, %v4202_v49  ;;  %v2842_v59 = vmul.f32 %v2840_v47, %v4207_v14 }
0x194e   :  { %v2878_v18 = vadd.f32 %v2842_v59, %v2837_v15 }
0x1950   :  { %v2850_v1 = vpop.permute.xlu1 %2849  ;;  %v2855_v34 = vpop.permute.xlu0 %2854 }
0x1951   :  { %v2852_v3 = vmul.f32 %v2850_v1, %v4204_v58  ;;  %v2857_v4 = vmul.f32 %v2855_v34, %v4189_v41 }
0x1953   :  { %v2879_v61 = vadd.f32 %v2852_v3, %v2847_v38 }
0x1955   :  { %v2860_v45 = vpop.permute.xlu1 %2859  ;;  %v2870_v37 = vpop.permute.xlu0 %2869  ;;  %v2882_v58 = vadd.f32 %v2879_v61, %v2878_v18 }
0x1956   :  { %v2862_v63 = vmul.f32 %v2860_v45, %v4192_v53  ;;  %v2872_v22 = vmul.f32 %v2870_v37, %v4198_v26 }
0x1958   :  { %v2880_v31 = vadd.f32 %v2862_v63, %v2857_v4 }
0x195a   :  { %v2865_v21 = vpop.permute.xlu1 %2864 }
0x195b   :  { %v2867_v8 = vmul.f32 %v2865_v21, %v4194_v54 }
0x195d   :  { %v2881_v13 = vadd.f32 %v2872_v22, %v2867_v8 }
0x195f   :  { %v2883_v40 = vadd.f32 %v2881_v13, %v2880_v31  ;;  %v2875_v42 = vpop.permute.xlu1 %2874 }
0x1960   :  { %v2877_v49 = vmul.f32 %v2875_v42, %v4221_v56 }
0x1961   :  { %v2884_v14 = vadd.f32 %v2883_v40, %v2882_v58 }
0x1963   :  { %v2885_v16 = vadd.f32 %v2884_v14, %v2877_v49 }
0x1965   :  { %3631 = vtanh.f32 %v2885_v16 }
0x196f   :  { %v3632_v53 = vpop.eup %3631 }
0x1970   :  { %2891 = vrot.lane.b32.xlu1 %v3632_v53, %s3644_s3  ;;  %v2887_v41 = vadd.f32 1.0, %v3632_v53 }
0x1972   :  { %v2888_v17 = vmul.f32 0.5, %v2887_v41 }
0x1974   :  { %v2889_v54 = vmul.f32 %v2888_v17, %v2825_v27 }
0x19e2   :  { %v2892_v26 = vpop.permute.xlu1 %2891 }
0x19e3   :  { %v2894_v11 = vmul.f32 %v2892_v26, %v2888_v17 }
0x19e5   :  { %2896 = vrot.lane.b32.xlu0 %v2894_v11, %s3643_s27 }
0x19e9   :  { %2093 = vrot.lane.b32.xlu0 %v4249_v46, %s3654_s30 }
0x19ed   :  { %2241 = vrot.lane.b32.xlu0 %v4308_v62, %s3654_s30 }
0x19f1   :  { %2389 = vrot.lane.b32.xlu0 %v4366_v50, %s3654_s30 }
0x19f5   :  { %2537 = vrot.lane.b32.xlu0 %v4424_v44, %s3654_s30 }
0x19f9   :  { %2685 = vrot.lane.b32.xlu0 %v4482_v2, %s3654_s30 }
0x19fd   :  { %2833 = vrot.lane.b32.xlu0 %v2831_v36, %s3654_s30 }
0x1a57   :  { %v2897_v56 = vpop.permute.xlu0 %2896 }
0x1a58   :  { %v2899_v48 = vadd.f32 %v2897_v56, %v2889_v54 }
0x1a5a   :  { %3633 = vtanh.f32 %v2899_v48  ;;  %2913 = vrot.lane.b32.xlu0 %v2899_v48, %s3655_s7 }
0x1a5b   :  { %v2094_v46 = vpop.permute.xlu0 %2093 }
0x1a5c   :  { %2096 = vst.msk [vmem:[%s4640_s4] sm:$0xff] %vm1015_vm2, %v2094_v46 }
0x1a5f   :  { %v2242_v62 = vpop.permute.xlu0 %2241 }
0x1a60   :  { %2244 = vst.msk [vmem:[%s4640_s4 + $0x10] sm:$0xff] %vm1015_vm2, %v2242_v62 }
0x1a63   :  { %v2390_v50 = vpop.permute.xlu0 %2389 }
0x1a64   :  { %v3634_v44 = vpop.eup %3633  ;;  %2392 = vst.msk [vmem:[%s4640_s4 + $0x20] sm:$0xff] %vm1015_vm2, %v2390_v50 }
0x1a65   :  { %2902 = vrot.lane.b32.xlu1 %v3634_v44, %s3647_s29 }
0x1a67   :  { %v2538_v2 = vpop.permute.xlu0 %2537 }
0x1a68   :  { %2540 = vst.msk [vmem:[%s4640_s4 + $0x30] sm:$0xff] %vm1015_vm2, %v2538_v2 }
0x1a69   :  { %2167 = vrot.lane.b32.xlu1 %v4279_v10, %s3654_s30 }
0x1a6b   :  { %v2686_v57 = vpop.permute.xlu0 %2685 }
0x1a6c   :  { %2688 = vst.msk [vmem:[%s4640_s4 + $0x40] sm:$0xff] %vm1015_vm2, %v2686_v57 }
0x1a6d   :  { %2315 = vrot.lane.b32.xlu1 %v4337_v35, %s3654_s30 }
0x1a6f   :  { %v2834_v60 = vpop.permute.xlu0 %2833 }
0x1a70   :  { %2836 = vst.msk [vmem:[%s4640_s4 + $0x50] sm:$0xff] %vm1015_vm2, %v2834_v60 }
0x1a71   :  { %2463 = vrot.lane.b32.xlu1 %v4395_v12, %s3654_s30 }
0x1a75   :  { %2611 = vrot.lane.b32.xlu1 %v4453_v30, %s3654_s30 }
0x1a79   :  { %2759 = vrot.lane.b32.xlu1 %v4511_v9, %s3654_s30 }
0x1acc   :  { %v2914_v10 = vpop.permute.xlu0 %2913 }
0x1acd   :  { %2916 = vst.msk [vmem:[%s4641_s6] sm:$0xff] %vm1015_vm2, %v2914_v10 }
0x1ad7   :  { %v2903_v35 = vpop.permute.xlu1 %2902 }
0x1ad8   :  { %v2905_v0 = vmul.f32 %v2903_v35, %v2888_v17 }
0x1ada   :  { %2907 = vrot.lane.b32.xlu1 %v2905_v0, %s3654_s30 }
0x1adb   :  { %v2168_v5 = vpop.permute.xlu1 %2167 }
0x1adc   :  { %2170 = vst.msk [vmem:[%s4640_s4 + $0x8] sm:$0xff] %vm1015_vm2, %v2168_v5 }
0x1adf   :  { %v2316_v12 = vpop.permute.xlu1 %2315 }
0x1ae0   :  { %2318 = vst.msk [vmem:[%s4640_s4 + $0x18] sm:$0xff] %vm1015_vm2, %v2316_v12 }
0x1ae3   :  { %v2464_v30 = vpop.permute.xlu1 %2463 }
0x1ae4   :  { %2466 = vst.msk [vmem:[%s4640_s4 + $0x28] sm:$0xff] %vm1015_vm2, %v2464_v30 }
0x1ae7   :  { %v2612_v9 = vpop.permute.xlu1 %2611 }
0x1ae8   :  { %2614 = vst.msk [vmem:[%s4640_s4 + $0x38] sm:$0xff] %vm1015_vm2, %v2612_v9 }
0x1aeb   :  { %v2760_v7 = vpop.permute.xlu1 %2759 }
0x1aec   :  { %2762 = vst.msk [vmem:[%s4640_s4 + $0x48] sm:$0xff] %vm1015_vm2, %v2760_v7 }
0x1b4c   :  { %v2908_v19 = vpop.permute.xlu1 %2907 }
0x1b4d   :  { %2910 = vst.msk [vmem:[%s4640_s4 + $0x58] sm:$0xff] %vm1015_vm2, %v2908_v19  ;;  %2911 = vst.msk [vmem:[%s4642_s5] sm:$0xff] %vm1015_vm2, %v2908_v19 }

</bundles_post_ra>
